<compile_context>
chip_gen: v6e
topology: v6e:2x2x1
jax: 0.10.0
libtpu: 0.0.40
codegen_flags: <defaults>
</compile_context>

<pallas_src>
import numpy as np
import jax
import jax.numpy as jnp
from jax.experimental import pallas as pl
from jax.experimental.pallas import tpu as pltpu

IN_DIM = 28 * 28        # 784
K_PAD = 896             # 7 * 128, lane-dense padded input width
N_OUT = 10              # ReLUKAN output width == Linear in/out width
GRID = 10               # ReLU basis functions per input feature
OUT_PAD = 128           # lane-dense padded output width inside the kernel
BASIS_LEFT = 0.0
BASIS_RIGHT = 1.0

_HIGH = jax.lax.Precision.HIGHEST   # reference / pack-time only


def _round_up(x, m):
    return ((x + m - 1) // m) * m


def _relukan_kernel(x_ref, plow_ref, phigh_ref, wkan_ref, blin_ref,
                    out_ref, basis_ref):
    # x_ref:     (TB, K_PAD)  f32          input batch tile (padded cols are 0)
    # plow_ref:  (GRID, K_PAD) f32         phase_low   (grid-major, padded)
    # phigh_ref: (GRID, K_PAD) f32         phase_height
    # wkan_ref:  (GRID*K_PAD, OUT_PAD) bf16  fused KAN*norm*Linear weight
    # blin_ref:  (1, OUT_PAD)  f32         Linear bias (zero-padded)
    # out_ref:   (TB, OUT_PAD) f32
    # basis_ref: (TB, GRID*K_PAD) bf16 VMEM scratch — basis for all grid fns
    x = x_ref[...]

    # Build the full long-K basis: one (TB, K_PAD) tile per grid function,
    # computed in f32 on the VPU, stored bf16 (lane-aligned static slices).
    for g in range(GRID):
        plow = plow_ref[pl.ds(g, 1), :]          # (1, K_PAD)
        phigh = phigh_ref[pl.ds(g, 1), :]        # (1, K_PAD)
        x1 = jnp.maximum(x - plow, 0.0)          # relu(x - phase_low)
        x2 = jnp.maximum(phigh - x, 0.0)         # relu(phase_height - x)
        b = x1 * x2
        b = b * b                                # (x1*x2)^2 ; norm folded into wkan
        basis_ref[:, pl.ds(g * K_PAD, K_PAD)] = b.astype(jnp.bfloat16)

    # Single long-K bf16 matmul with f32 accumulation; output written once.
    out = jnp.dot(basis_ref[...], wkan_ref[...],
                  preferred_element_type=jnp.float32)
    out_ref[...] = (out + blin_ref[...]).astype(out_ref.dtype)


@jax.jit
def mnist_relu_kan(x_nchw, packed):
    B = x_nchw.shape[0]
    x = x_nchw.reshape(B, -1).astype(jnp.float32)        # nn.Flatten
    plow, phigh, wkan, blin = packed

    # Batch tile: big enough to feed the 256-deep MXU well, small enough that
    # the bf16 basis scratch (~9 MB at TB=512) fits v7x's 64 MiB VMEM.
    TB = min(512, _round_up(B, 8))
    B_pad = _round_up(B, TB)
    x = jnp.pad(x, ((0, B_pad - B), (0, K_PAD - IN_DIM)))
    nb = B_pad // TB

    out_pad = pl.pallas_call(
        _relukan_kernel,
        out_shape=jax.ShapeDtypeStruct((B_pad, OUT_PAD), jnp.float32),
        grid_spec=pltpu.PrefetchScalarGridSpec(
            num_scalar_prefetch=0,
            grid=(nb,),
            in_specs=[
                pl.BlockSpec((TB, K_PAD), lambda i: (i, 0)),               # x (pipelined)
                pl.BlockSpec((GRID, K_PAD), lambda i: (0, 0)),             # phase_low (resident)
                pl.BlockSpec((GRID, K_PAD), lambda i: (0, 0)),             # phase_height (resident)
                pl.BlockSpec((GRID * K_PAD, OUT_PAD), lambda i: (0, 0)),   # fused bf16 KAN weight
                pl.BlockSpec((1, OUT_PAD), lambda i: (0, 0)),              # Linear bias (resident)
            ],
            out_specs=pl.BlockSpec((TB, OUT_PAD), lambda i: (i, 0)),
            scratch_shapes=[pltpu.VMEM((TB, GRID * K_PAD), jnp.bfloat16)],
        ),
        compiler_params=pltpu.CompilerParams(
            dimension_semantics=("parallel",),
            vmem_limit_bytes=48 * 1024 * 1024),
    )(x, plow, phigh, wkan, blin)

    return out_pad[:B, :N_OUT]


def init_params(key):
    """Parameters with the shapes/initialization implied by the PyTorch module."""
    ks = jax.random.split(key, 5)
    centers = np.linspace(BASIS_LEFT, BASIS_RIGHT, GRID)
    step = (BASIS_RIGHT - BASIS_LEFT) / (GRID - 1)
    plow0 = np.tile(centers - step, (IN_DIM, 1)).astype(np.float32)    # (784, 10)
    phigh0 = np.tile(centers + step, (IN_DIM, 1)).astype(np.float32)   # (784, 10)
    # phase_low / phase_height are trainable (train_ab=True); perturb slightly so
    # the test exercises genuinely per-feature phases.
    phase_low = jnp.asarray(plow0) + 0.01 * jax.random.normal(ks[0], (IN_DIM, GRID), jnp.float32)
    phase_height = jnp.asarray(phigh0) + 0.01 * jax.random.normal(ks[1], (IN_DIM, GRID), jnp.float32)
    # coff = init_mu + init_sigma * randn, with init_mu=1, init_sigma=1
    coff = 1.0 + jax.random.normal(ks[2], (IN_DIM, N_OUT, GRID), jnp.float32)
    # nn.Linear(10, 10) default init: U(-1/sqrt(10), 1/sqrt(10))
    bound = 1.0 / np.sqrt(N_OUT)
    w_lin = jax.random.uniform(ks[3], (N_OUT, N_OUT), jnp.float32, -bound, bound)
    b_lin = jax.random.uniform(ks[4], (N_OUT,), jnp.float32, -bound, bound)
    return dict(phase_low=phase_low, phase_height=phase_height, coff=coff,
                w_lin=w_lin, b_lin=b_lin)


def pack_params(p):
    """Fold norm_coeff AND the final Linear into one bf16 weight (pack-time glue)."""
    norm = (p['phase_height'] - p['phase_low']) ** 4 / 16.0                  # (784, G)
    # wk[g, i, o] = norm[i, g] * sum_m coff[i, m, g] * w_lin[o, m]
    wk = jnp.einsum('img,om->gio', p['coff'], p['w_lin'], precision=_HIGH)   # (G, 784, 10)
    wk = wk * jnp.transpose(norm)[:, :, None]
    wk = jnp.pad(wk, ((0, 0), (0, K_PAD - IN_DIM), (0, OUT_PAD - N_OUT)))    # (G, 896, 128)
    wkan = wk.reshape(GRID * K_PAD, OUT_PAD).astype(jnp.bfloat16)            # (8960, 128) bf16
    plow = jnp.pad(jnp.transpose(p['phase_low']), ((0, 0), (0, K_PAD - IN_DIM)))      # (G, 896)
    phigh = jnp.pad(jnp.transpose(p['phase_height']), ((0, 0), (0, K_PAD - IN_DIM)))  # (G, 896)
    blin = jnp.zeros((1, OUT_PAD), jnp.float32).at[0, :N_OUT].set(p['b_lin'])
    return plow, phigh, wkan, blin


def reference(x_nchw, p):
    """Pure-JAX reference mirroring the PyTorch forward exactly."""
    B = x_nchw.shape[0]
    x = x_nchw.reshape(B, -1).astype(jnp.float32)                         # Flatten
    norm = (p['phase_height'] - p['phase_low']) ** 4 / 16.0               # (784, G)
    xe = x[:, :, None]                                                    # (B, 784, 1)
    x1 = jnp.maximum(xe - p['phase_low'][None], 0.0)
    x2 = jnp.maximum(p['phase_height'][None] - xe, 0.0)
    b = x1 * x2
    b = b * b * norm[None]                                                # (B, 784, G)
    y = jnp.einsum('big,iog->bo', b, p['coff'], precision=_HIGH)          # sum over (input, grid)
    return jnp.dot(y, p['w_lin'].T, precision=_HIGH) + p['b_lin']         # nn.Linear(10, 10)


if __name__ == "__main__":
    key = jax.random.PRNGKey(0)
    kx, kp = jax.random.split(key)
    x = jax.random.normal(kx, (2, 1, 28, 28), jnp.float32)   # small MNIST-shaped batch
    params = init_params(kp)
    packed = pack_params(params)

    out = mnist_relu_kan(x, packed)
    out = jax.block_until_ready(out)
    assert out.shape == (2, N_OUT)

    ref = reference(x, params)
    if not bool(jnp.allclose(out, ref, rtol=1e-3, atol=1e-3)):
        raise AssertionError(
            f"kernel/reference mismatch, max abs diff = "
            f"{float(jnp.max(jnp.abs(out - ref)))}")
    print("KERNEL_OK")
</pallas_src>

<mosaic_0001>
module attributes {stable_mosaic.version = 11 : i64} {
  func.func @_relukan_kernel(%arg0: i32, %arg1: memref<8x896xf32, #tpu.memory_space<vmem>>, %arg2: memref<10x896xf32, #tpu.memory_space<vmem>>, %arg3: memref<10x896xf32, #tpu.memory_space<vmem>>, %arg4: memref<8960x128xbf16, #tpu.memory_space<vmem>>, %arg5: memref<1x128xf32, #tpu.memory_space<vmem>>, %arg6: memref<8x128xf32, #tpu.memory_space<vmem>>, %arg7: memref<8x8960xbf16, #tpu.memory_space<vmem>>) attributes {dimension_semantics = [#tpu.dimension_semantics<parallel>], iteration_bounds = array<i64: 1>, scalar_prefetch = 0 : i64, scratch_operands = 1 : i64, tpu.core_type = #tpu.core_type<tc>, window_params = [{transform_indices = @transform_0, window_bounds = array<i64: 8, 896>}, {pipeline_mode = #tpu.pipeline_mode<synchronous>, transform_indices = @transform_1, window_bounds = array<i64: 10, 896>}, {pipeline_mode = #tpu.pipeline_mode<synchronous>, transform_indices = @transform_2, window_bounds = array<i64: 10, 896>}, {pipeline_mode = #tpu.pipeline_mode<synchronous>, transform_indices = @transform_3, window_bounds = array<i64: 8960, 128>}, {pipeline_mode = #tpu.pipeline_mode<synchronous>, transform_indices = @transform_4, window_bounds = array<i64: 1, 128>}, {transform_indices = @transform_5, window_bounds = array<i64: 8, 128>}]} {
    %c0 = arith.constant 0 : index
    %c0_0 = arith.constant 0 : index
    %0 = vector.load %arg1[%c0, %c0_0] : memref<8x896xf32, #tpu.memory_space<vmem>>, vector<8x896xf32>
    %c0_1 = arith.constant 0 : index
    %c0_2 = arith.constant 0 : index
    %1 = vector.load %arg2[%c0_1, %c0_2] : memref<10x896xf32, #tpu.memory_space<vmem>>, vector<1x896xf32>
    %c0_3 = arith.constant 0 : index
    %c0_4 = arith.constant 0 : index
    %2 = vector.load %arg3[%c0_3, %c0_4] : memref<10x896xf32, #tpu.memory_space<vmem>>, vector<1x896xf32>
    %3 = vector.broadcast %1 : vector<1x896xf32> to vector<8x896xf32>
    %4 = arith.subf %0, %3 : vector<8x896xf32>
    %cst = arith.constant 0.000000e+00 : f32
    %5 = vector.broadcast %cst : f32 to vector<8x896xf32>
    %6 = arith.maximumf %4, %5 : vector<8x896xf32>
    %7 = vector.broadcast %2 : vector<1x896xf32> to vector<8x896xf32>
    %8 = arith.subf %7, %0 : vector<8x896xf32>
    %cst_5 = arith.constant 0.000000e+00 : f32
    %9 = vector.broadcast %cst_5 : f32 to vector<8x896xf32>
    %10 = arith.maximumf %8, %9 : vector<8x896xf32>
    %11 = arith.mulf %6, %10 : vector<8x896xf32>
    %12 = arith.mulf %11, %11 : vector<8x896xf32>
    %13 = arith.truncf %12 : vector<8x896xf32> to vector<8x896xbf16>
    %c0_6 = arith.constant 0 : index
    %c0_7 = arith.constant 0 : index
    %14 = vector.load %arg7[%c0_6, %c0_7] : memref<8x8960xbf16, #tpu.memory_space<vmem>>, vector<8x896xbf16>
    tpu.vector_store %arg7[%c0_6, %c0_7], %13 {strides = array<i32>} : memref<8x8960xbf16, #tpu.memory_space<vmem>>, vector<8x896xbf16>,
    %c1 = arith.constant 1 : index
    %c0_8 = arith.constant 0 : index
    %15 = vector.load %arg2[%c1, %c0_8] : memref<10x896xf32, #tpu.memory_space<vmem>>, vector<1x896xf32>
    %c1_9 = arith.constant 1 : index
    %c0_10 = arith.constant 0 : index
    %16 = vector.load %arg3[%c1_9, %c0_10] : memref<10x896xf32, #tpu.memory_space<vmem>>, vector<1x896xf32>
    %17 = vector.broadcast %15 : vector<1x896xf32> to vector<8x896xf32>
    %18 = arith.subf %0, %17 : vector<8x896xf32>
    %cst_11 = arith.constant 0.000000e+00 : f32
    %19 = vector.broadcast %cst_11 : f32 to vector<8x896xf32>
    %20 = arith.maximumf %18, %19 : vector<8x896xf32>
    %21 = vector.broadcast %16 : vector<1x896xf32> to vector<8x896xf32>
    %22 = arith.subf %21, %0 : vector<8x896xf32>
    %cst_12 = arith.constant 0.000000e+00 : f32
    %23 = vector.broadcast %cst_12 : f32 to vector<8x896xf32>
    %24 = arith.maximumf %22, %23 : vector<8x896xf32>
    %25 = arith.mulf %20, %24 : vector<8x896xf32>
    %26 = arith.mulf %25, %25 : vector<8x896xf32>
    %27 = arith.truncf %26 : vector<8x896xf32> to vector<8x896xbf16>
    %c0_13 = arith.constant 0 : index
    %c896 = arith.constant 896 : index
    %28 = vector.load %arg7[%c0_13, %c896] : memref<8x8960xbf16, #tpu.memory_space<vmem>>, vector<8x896xbf16>
    tpu.vector_store %arg7[%c0_13, %c896], %27 {strides = array<i32>} : memref<8x8960xbf16, #tpu.memory_space<vmem>>, vector<8x896xbf16>,
    %c2 = arith.constant 2 : index
    %c0_14 = arith.constant 0 : index
    %29 = vector.load %arg2[%c2, %c0_14] : memref<10x896xf32, #tpu.memory_space<vmem>>, vector<1x896xf32>
    %c2_15 = arith.constant 2 : index
    %c0_16 = arith.constant 0 : index
    %30 = vector.load %arg3[%c2_15, %c0_16] : memref<10x896xf32, #tpu.memory_space<vmem>>, vector<1x896xf32>
    %31 = vector.broadcast %29 : vector<1x896xf32> to vector<8x896xf32>
    %32 = arith.subf %0, %31 : vector<8x896xf32>
    %cst_17 = arith.constant 0.000000e+00 : f32
    %33 = vector.broadcast %cst_17 : f32 to vector<8x896xf32>
    %34 = arith.maximumf %32, %33 : vector<8x896xf32>
    %35 = vector.broadcast %30 : vector<1x896xf32> to vector<8x896xf32>
    %36 = arith.subf %35, %0 : vector<8x896xf32>
    %cst_18 = arith.constant 0.000000e+00 : f32
    %37 = vector.broadcast %cst_18 : f32 to vector<8x896xf32>
    %38 = arith.maximumf %36, %37 : vector<8x896xf32>
    %39 = arith.mulf %34, %38 : vector<8x896xf32>
    %40 = arith.mulf %39, %39 : vector<8x896xf32>
    %41 = arith.truncf %40 : vector<8x896xf32> to vector<8x896xbf16>
    %c0_19 = arith.constant 0 : index
    %c1792 = arith.constant 1792 : index
    %42 = vector.load %arg7[%c0_19, %c1792] : memref<8x8960xbf16, #tpu.memory_space<vmem>>, vector<8x896xbf16>
    tpu.vector_store %arg7[%c0_19, %c1792], %41 {strides = array<i32>} : memref<8x8960xbf16, #tpu.memory_space<vmem>>, vector<8x896xbf16>,
    %c3 = arith.constant 3 : index
    %c0_20 = arith.constant 0 : index
    %43 = vector.load %arg2[%c3, %c0_20] : memref<10x896xf32, #tpu.memory_space<vmem>>, vector<1x896xf32>
    %c3_21 = arith.constant 3 : index
    %c0_22 = arith.constant 0 : index
    %44 = vector.load %arg3[%c3_21, %c0_22] : memref<10x896xf32, #tpu.memory_space<vmem>>, vector<1x896xf32>
    %45 = vector.broadcast %43 : vector<1x896xf32> to vector<8x896xf32>
    %46 = arith.subf %0, %45 : vector<8x896xf32>
    %cst_23 = arith.constant 0.000000e+00 : f32
    %47 = vector.broadcast %cst_23 : f32 to vector<8x896xf32>
    %48 = arith.maximumf %46, %47 : vector<8x896xf32>
    %49 = vector.broadcast %44 : vector<1x896xf32> to vector<8x896xf32>
    %50 = arith.subf %49, %0 : vector<8x896xf32>
    %cst_24 = arith.constant 0.000000e+00 : f32
    %51 = vector.broadcast %cst_24 : f32 to vector<8x896xf32>
    %52 = arith.maximumf %50, %51 : vector<8x896xf32>
    %53 = arith.mulf %48, %52 : vector<8x896xf32>
    %54 = arith.mulf %53, %53 : vector<8x896xf32>
    %55 = arith.truncf %54 : vector<8x896xf32> to vector<8x896xbf16>
    %c0_25 = arith.constant 0 : index
    %c2688 = arith.constant 2688 : index
    %56 = vector.load %arg7[%c0_25, %c2688] : memref<8x8960xbf16, #tpu.memory_space<vmem>>, vector<8x896xbf16>
    tpu.vector_store %arg7[%c0_25, %c2688], %55 {strides = array<i32>} : memref<8x8960xbf16, #tpu.memory_space<vmem>>, vector<8x896xbf16>,
    %c4 = arith.constant 4 : index
    %c0_26 = arith.constant 0 : index
    %57 = vector.load %arg2[%c4, %c0_26] : memref<10x896xf32, #tpu.memory_space<vmem>>, vector<1x896xf32>
    %c4_27 = arith.constant 4 : index
    %c0_28 = arith.constant 0 : index
    %58 = vector.load %arg3[%c4_27, %c0_28] : memref<10x896xf32, #tpu.memory_space<vmem>>, vector<1x896xf32>
    %59 = vector.broadcast %57 : vector<1x896xf32> to vector<8x896xf32>
    %60 = arith.subf %0, %59 : vector<8x896xf32>
    %cst_29 = arith.constant 0.000000e+00 : f32
    %61 = vector.broadcast %cst_29 : f32 to vector<8x896xf32>
    %62 = arith.maximumf %60, %61 : vector<8x896xf32>
    %63 = vector.broadcast %58 : vector<1x896xf32> to vector<8x896xf32>
    %64 = arith.subf %63, %0 : vector<8x896xf32>
    %cst_30 = arith.constant 0.000000e+00 : f32
    %65 = vector.broadcast %cst_30 : f32 to vector<8x896xf32>
    %66 = arith.maximumf %64, %65 : vector<8x896xf32>
    %67 = arith.mulf %62, %66 : vector<8x896xf32>
    %68 = arith.mulf %67, %67 : vector<8x896xf32>
    %69 = arith.truncf %68 : vector<8x896xf32> to vector<8x896xbf16>
    %c0_31 = arith.constant 0 : index
    %c3584 = arith.constant 3584 : index
    %70 = vector.load %arg7[%c0_31, %c3584] : memref<8x8960xbf16, #tpu.memory_space<vmem>>, vector<8x896xbf16>
    tpu.vector_store %arg7[%c0_31, %c3584], %69 {strides = array<i32>} : memref<8x8960xbf16, #tpu.memory_space<vmem>>, vector<8x896xbf16>,
    %c5 = arith.constant 5 : index
    %c0_32 = arith.constant 0 : index
    %71 = vector.load %arg2[%c5, %c0_32] : memref<10x896xf32, #tpu.memory_space<vmem>>, vector<1x896xf32>
    %c5_33 = arith.constant 5 : index
    %c0_34 = arith.constant 0 : index
    %72 = vector.load %arg3[%c5_33, %c0_34] : memref<10x896xf32, #tpu.memory_space<vmem>>, vector<1x896xf32>
    %73 = vector.broadcast %71 : vector<1x896xf32> to vector<8x896xf32>
    %74 = arith.subf %0, %73 : vector<8x896xf32>
    %cst_35 = arith.constant 0.000000e+00 : f32
    %75 = vector.broadcast %cst_35 : f32 to vector<8x896xf32>
    %76 = arith.maximumf %74, %75 : vector<8x896xf32>
    %77 = vector.broadcast %72 : vector<1x896xf32> to vector<8x896xf32>
    %78 = arith.subf %77, %0 : vector<8x896xf32>
    %cst_36 = arith.constant 0.000000e+00 : f32
    %79 = vector.broadcast %cst_36 : f32 to vector<8x896xf32>
    %80 = arith.maximumf %78, %79 : vector<8x896xf32>
    %81 = arith.mulf %76, %80 : vector<8x896xf32>
    %82 = arith.mulf %81, %81 : vector<8x896xf32>
    %83 = arith.truncf %82 : vector<8x896xf32> to vector<8x896xbf16>
    %c0_37 = arith.constant 0 : index
    %c4480 = arith.constant 4480 : index
    %84 = vector.load %arg7[%c0_37, %c4480] : memref<8x8960xbf16, #tpu.memory_space<vmem>>, vector<8x896xbf16>
    tpu.vector_store %arg7[%c0_37, %c4480], %83 {strides = array<i32>} : memref<8x8960xbf16, #tpu.memory_space<vmem>>, vector<8x896xbf16>,
    %c6 = arith.constant 6 : index
    %c0_38 = arith.constant 0 : index
    %85 = vector.load %arg2[%c6, %c0_38] : memref<10x896xf32, #tpu.memory_space<vmem>>, vector<1x896xf32>
    %c6_39 = arith.constant 6 : index
    %c0_40 = arith.constant 0 : index
    %86 = vector.load %arg3[%c6_39, %c0_40] : memref<10x896xf32, #tpu.memory_space<vmem>>, vector<1x896xf32>
    %87 = vector.broadcast %85 : vector<1x896xf32> to vector<8x896xf32>
    %88 = arith.subf %0, %87 : vector<8x896xf32>
    %cst_41 = arith.constant 0.000000e+00 : f32
    %89 = vector.broadcast %cst_41 : f32 to vector<8x896xf32>
    %90 = arith.maximumf %88, %89 : vector<8x896xf32>
    %91 = vector.broadcast %86 : vector<1x896xf32> to vector<8x896xf32>
    %92 = arith.subf %91, %0 : vector<8x896xf32>
    %cst_42 = arith.constant 0.000000e+00 : f32
    %93 = vector.broadcast %cst_42 : f32 to vector<8x896xf32>
    %94 = arith.maximumf %92, %93 : vector<8x896xf32>
    %95 = arith.mulf %90, %94 : vector<8x896xf32>
    %96 = arith.mulf %95, %95 : vector<8x896xf32>
    %97 = arith.truncf %96 : vector<8x896xf32> to vector<8x896xbf16>
    %c0_43 = arith.constant 0 : index
    %c5376 = arith.constant 5376 : index
    %98 = vector.load %arg7[%c0_43, %c5376] : memref<8x8960xbf16, #tpu.memory_space<vmem>>, vector<8x896xbf16>
    tpu.vector_store %arg7[%c0_43, %c5376], %97 {strides = array<i32>} : memref<8x8960xbf16, #tpu.memory_space<vmem>>, vector<8x896xbf16>,
    %c7 = arith.constant 7 : index
    %c0_44 = arith.constant 0 : index
    %99 = vector.load %arg2[%c7, %c0_44] : memref<10x896xf32, #tpu.memory_space<vmem>>, vector<1x896xf32>
    %c7_45 = arith.constant 7 : index
    %c0_46 = arith.constant 0 : index
    %100 = vector.load %arg3[%c7_45, %c0_46] : memref<10x896xf32, #tpu.memory_space<vmem>>, vector<1x896xf32>
    %101 = vector.broadcast %99 : vector<1x896xf32> to vector<8x896xf32>
    %102 = arith.subf %0, %101 : vector<8x896xf32>
    %cst_47 = arith.constant 0.000000e+00 : f32
    %103 = vector.broadcast %cst_47 : f32 to vector<8x896xf32>
    %104 = arith.maximumf %102, %103 : vector<8x896xf32>
    %105 = vector.broadcast %100 : vector<1x896xf32> to vector<8x896xf32>
    %106 = arith.subf %105, %0 : vector<8x896xf32>
    %cst_48 = arith.constant 0.000000e+00 : f32
    %107 = vector.broadcast %cst_48 : f32 to vector<8x896xf32>
    %108 = arith.maximumf %106, %107 : vector<8x896xf32>
    %109 = arith.mulf %104, %108 : vector<8x896xf32>
    %110 = arith.mulf %109, %109 : vector<8x896xf32>
    %111 = arith.truncf %110 : vector<8x896xf32> to vector<8x896xbf16>
    %c0_49 = arith.constant 0 : index
    %c6272 = arith.constant 6272 : index
    %112 = vector.load %arg7[%c0_49, %c6272] : memref<8x8960xbf16, #tpu.memory_space<vmem>>, vector<8x896xbf16>
    tpu.vector_store %arg7[%c0_49, %c6272], %111 {strides = array<i32>} : memref<8x8960xbf16, #tpu.memory_space<vmem>>, vector<8x896xbf16>,
    %c8 = arith.constant 8 : index
    %c0_50 = arith.constant 0 : index
    %113 = vector.load %arg2[%c8, %c0_50] : memref<10x896xf32, #tpu.memory_space<vmem>>, vector<1x896xf32>
    %c8_51 = arith.constant 8 : index
    %c0_52 = arith.constant 0 : index
    %114 = vector.load %arg3[%c8_51, %c0_52] : memref<10x896xf32, #tpu.memory_space<vmem>>, vector<1x896xf32>
    %115 = vector.broadcast %113 : vector<1x896xf32> to vector<8x896xf32>
    %116 = arith.subf %0, %115 : vector<8x896xf32>
    %cst_53 = arith.constant 0.000000e+00 : f32
    %117 = vector.broadcast %cst_53 : f32 to vector<8x896xf32>
    %118 = arith.maximumf %116, %117 : vector<8x896xf32>
    %119 = vector.broadcast %114 : vector<1x896xf32> to vector<8x896xf32>
    %120 = arith.subf %119, %0 : vector<8x896xf32>
    %cst_54 = arith.constant 0.000000e+00 : f32
    %121 = vector.broadcast %cst_54 : f32 to vector<8x896xf32>
    %122 = arith.maximumf %120, %121 : vector<8x896xf32>
    %123 = arith.mulf %118, %122 : vector<8x896xf32>
    %124 = arith.mulf %123, %123 : vector<8x896xf32>
    %125 = arith.truncf %124 : vector<8x896xf32> to vector<8x896xbf16>
    %c0_55 = arith.constant 0 : index
    %c7168 = arith.constant 7168 : index
    %126 = vector.load %arg7[%c0_55, %c7168] : memref<8x8960xbf16, #tpu.memory_space<vmem>>, vector<8x896xbf16>
    tpu.vector_store %arg7[%c0_55, %c7168], %125 {strides = array<i32>} : memref<8x8960xbf16, #tpu.memory_space<vmem>>, vector<8x896xbf16>,
    %c9 = arith.constant 9 : index
    %c0_56 = arith.constant 0 : index
    %127 = vector.load %arg2[%c9, %c0_56] : memref<10x896xf32, #tpu.memory_space<vmem>>, vector<1x896xf32>
    %c9_57 = arith.constant 9 : index
    %c0_58 = arith.constant 0 : index
    %128 = vector.load %arg3[%c9_57, %c0_58] : memref<10x896xf32, #tpu.memory_space<vmem>>, vector<1x896xf32>
    %129 = vector.broadcast %127 : vector<1x896xf32> to vector<8x896xf32>
    %130 = arith.subf %0, %129 : vector<8x896xf32>
    %cst_59 = arith.constant 0.000000e+00 : f32
    %131 = vector.broadcast %cst_59 : f32 to vector<8x896xf32>
    %132 = arith.maximumf %130, %131 : vector<8x896xf32>
    %133 = vector.broadcast %128 : vector<1x896xf32> to vector<8x896xf32>
    %134 = arith.subf %133, %0 : vector<8x896xf32>
    %cst_60 = arith.constant 0.000000e+00 : f32
    %135 = vector.broadcast %cst_60 : f32 to vector<8x896xf32>
    %136 = arith.maximumf %134, %135 : vector<8x896xf32>
    %137 = arith.mulf %132, %136 : vector<8x896xf32>
    %138 = arith.mulf %137, %137 : vector<8x896xf32>
    %139 = arith.truncf %138 : vector<8x896xf32> to vector<8x896xbf16>
    %c0_61 = arith.constant 0 : index
    %c8064 = arith.constant 8064 : index
    %140 = vector.load %arg7[%c0_61, %c8064] : memref<8x8960xbf16, #tpu.memory_space<vmem>>, vector<8x896xbf16>
    tpu.vector_store %arg7[%c0_61, %c8064], %139 {strides = array<i32>} : memref<8x8960xbf16, #tpu.memory_space<vmem>>, vector<8x896xbf16>,
    %c0_62 = arith.constant 0 : index
    %c0_63 = arith.constant 0 : index
    %141 = vector.load %arg7[%c0_62, %c0_63] : memref<8x8960xbf16, #tpu.memory_space<vmem>>, vector<8x8960xbf16>
    %c0_64 = arith.constant 0 : index
    %c0_65 = arith.constant 0 : index
    %142 = vector.load %arg4[%c0_64, %c0_65] : memref<8960x128xbf16, #tpu.memory_space<vmem>>, vector<8960x128xbf16>
    %cst_66 = arith.constant dense<0.000000e+00> : vector<8x128xf32>
    %143 = tpu.matmul %141, %142, %cst_66 {dimension_numbers = #tpu.dot_dimension_numbers<[1], [0], [0], [1], [0, 0, 1, 1], [], []>} : vector<8x8960xbf16>, vector<8960x128xbf16>, vector<8x128xf32> -> vector<8x128xf32>
    %c0_67 = arith.constant 0 : index
    %c0_68 = arith.constant 0 : index
    %144 = vector.load %arg5[%c0_67, %c0_68] : memref<1x128xf32, #tpu.memory_space<vmem>>, vector<1x128xf32>
    %145 = vector.broadcast %144 : vector<1x128xf32> to vector<8x128xf32>
    %146 = arith.addf %143, %145 : vector<8x128xf32>
    %c0_69 = arith.constant 0 : index
    %c0_70 = arith.constant 0 : index
    %147 = vector.load %arg6[%c0_69, %c0_70] : memref<8x128xf32, #tpu.memory_space<vmem>>, vector<8x128xf32>
    tpu.vector_store %arg6[%c0_69, %c0_70], %146 {strides = array<i32>} : memref<8x128xf32, #tpu.memory_space<vmem>>, vector<8x128xf32>,
    return
  }
  func.func @transform_0(%arg0: i32) -> (i32, i32) {
    %c0_i32 = arith.constant 0 : i32
    %c0_i32_0 = arith.constant 0 : i32
    return %arg0, %c0_i32 : i32, i32
  }
  func.func @transform_1(%arg0: i32) -> (i32, i32) {
    %c0_i32 = arith.constant 0 : i32
    %c0_i32_0 = arith.constant 0 : i32
    %c0_i32_1 = arith.constant 0 : i32
    return %c0_i32, %c0_i32_0 : i32, i32
  }
  func.func @transform_2(%arg0: i32) -> (i32, i32) {
    %c0_i32 = arith.constant 0 : i32
    %c0_i32_0 = arith.constant 0 : i32
    %c0_i32_1 = arith.constant 0 : i32
    return %c0_i32, %c0_i32_0 : i32, i32
  }
  func.func @transform_3(%arg0: i32) -> (i32, i32) {
    %c0_i32 = arith.constant 0 : i32
    %c0_i32_0 = arith.constant 0 : i32
    %c0_i32_1 = arith.constant 0 : i32
    return %c0_i32, %c0_i32_0 : i32, i32
  }
  func.func @transform_4(%arg0: i32) -> (i32, i32) {
    %c0_i32 = arith.constant 0 : i32
    %c0_i32_0 = arith.constant 0 : i32
    %c0_i32_1 = arith.constant 0 : i32
    return %c0_i32, %c0_i32_0 : i32, i32
  }
  func.func @transform_5(%arg0: i32) -> (i32, i32) {
    %c0_i32 = arith.constant 0 : i32
    %c0_i32_0 = arith.constant 0 : i32
    return %arg0, %c0_i32 : i32, i32
  }
}

</mosaic_0001>

<bundles_post_ra>
// kernel: mnist_relu_kan.1
= control target key start
LH: loop header
LB: loop body
LE: loop exit
PB: predicated region body
PF: predicated region fallthrough
CT: control target
= control target key end

     0   :  { %10 = vsyncpa [#allocation4], 0  ;;  %s10832_s0 = inlined_call_operand.vmem [shape: f32[8,896], index: 0, kind: input, shape index: {}]   ;;  %s10833_s1 = inlined_call_operand.hbm [shape: f32[10,896], index: 1, kind: input, shape index: {}]   ;;  %s10834_s2 = inlined_call_operand.hbm [shape: f32[10,896], index: 2, kind: input, shape index: {}]   ;;  %s10835_s3 = inlined_call_operand.hbm [shape: bf16[8960,128], index: 3, kind: input, shape index: {}]   ;;  %s10836_s4 = inlined_call_operand.hbm [shape: f32[1,128], index: 4, kind: input, shape index: {}]   ;;  %s10837_s5 = inlined_call_operand.vmem [shape: f32[8,128], index: 5, kind: output, shape index: {}]  }
   0x1   :  { %11 = vsyncpa [#allocation6], 0 }
   0x2   :  { %12 = vsyncpa [#allocation9], 0  ;;  %s10037_s18 = smov [#allocation5]   ;;  %s10038_s20 = smov [#allocation3]  }
   0x3   :  { %s32_s19 = sshll.u32 %s10037_s18, 4  ;;  %s20_s21 = sshll.u32 %s10038_s20, 4  ;;  %s33_s19 = int_to_ptr.vmem [resolvable:$true] %s32_s19  ;;  %s21_s21 = int_to_ptr.vmem [resolvable:$true] %s20_s21 }
   0x4   :  { %s9959_s22 = scalar_lea.vmem %s33_s19, 1792  ;;  %p9964_p1 = scmp.lt.s32.totalorder %s33_s19, %s33_s19 }
   0x5   :  { %p9960_p0 = scmp.ne.s32.totalorder %s33_s19, %s9959_s22  ;;  %p9965_p2 = scmp.lt.s32.totalorder %s9959_s22, %s9959_s22 }
   0x7   :  { %p9966_p3 = por %p9965_p2, %p9964_p1 }
   0x9   :  { %p9967_p4 = pnand %p9966_p3, %p9960_p0 }
   0xb   :  { %9970 = shalt.err (!%p9967_p4)
}
   0xc   :  { %s10039_s23 = smov 896   ;;  %s10040_s24 = smov 56  }
   0xd   :  { %38 = dma.hbm_to_vmem [thread:$0]  %s10834_s2, 1792, %s33_s19, [#allocation6], %s10039_s23, %s10039_s23, %s10040_s24  }
   0xe   :  { %s9979_s27 = scalar_lea.vmem %s21_s21, 1792  ;;  %p9984_p6 = scmp.lt.s32.totalorder %s21_s21, %s21_s21 }
   0xf   :  { %p9980_p5 = scmp.ne.s32.totalorder %s21_s21, %s9979_s27  ;;  %p9985_p7 = scmp.lt.s32.totalorder %s9979_s27, %s9979_s27 }
  0x11   :  { %p9986_p8 = por %p9985_p7, %p9984_p6 }
  0x13   :  { %p9987_p9 = pnand %p9986_p8, %p9980_p5 }
  0x15   :  { %9990 = shalt.err (!%p9987_p9)
}
  0x16   :  { %26 = dma.hbm_to_vmem [thread:$0]  %s10833_s1, 1792, %s21_s21, [#allocation4], %s10039_s23, %s10039_s23, %s10040_s24  }
  0x17   :  { %s10041_s30 = smov [#allocation7]  }
  0x18   :  { %s44_s6 = sshll.u32 %s10041_s30, 4  ;;  %s45_s6 = int_to_ptr.vmem [resolvable:$true] %s44_s6 }
  0x19   :  { %s9999_s7 = scalar_lea.vmem %s45_s6, 71680  ;;  %p10004_p11 = scmp.lt.s32.totalorder %s45_s6, %s45_s6 }
  0x1a   :  { %p10000_p10 = scmp.ne.s32.totalorder %s45_s6, %s9999_s7  ;;  %p10005_p12 = scmp.lt.s32.totalorder %s9999_s7, %s9999_s7 }
  0x1c   :  { %p10006_p13 = por %p10005_p12, %p10004_p11 }
  0x1e   :  { %p10007_p0 = pnand %p10006_p13, %p10000_p10 }
  0x20   :  { %10010 = shalt.err (!%p10007_p0)
}
  0x21   :  { %s10042_s2 = smov 64   ;;  %s10043_s8 = smov 4  }
  0x22   :  { %50 = dma.hbm_to_vmem [thread:$0]  %s10835_s3, 71680, %s45_s6, [#allocation6], %s10042_s2, %s10042_s2, %s10043_s8  }
  0x23   :  { %s10044_s11 = smov [#allocation8]  }
  0x24   :  { %s57_s12 = sshll.u32 %s10044_s11, 4  ;;  %s58_s12 = int_to_ptr.vmem [resolvable:$true] %s57_s12 }
  0x25   :  { %s10019_s1 = scalar_lea.vmem %s58_s12, 16  ;;  %s10023_s13 = scalar_lea.vmem %s58_s12, 32 }
  0x26   :  { %p10020_p1 = scmp.ne.s32.totalorder %s58_s12, %s10019_s1  ;;  %p10024_p2 = scmp.lt.s32.totalorder %s58_s12, %s58_s12 }
  0x27   :  { %p10025_p3 = scmp.lt.s32.totalorder %s10023_s13, %s10019_s1 }
  0x29   :  { %p10026_p4 = por %p10025_p3, %p10024_p2 }
  0x2b   :  { %p10027_p5 = pnand %p10026_p4, %p10020_p1 }
  0x2d   :  { %10030 = shalt.err (!%p10027_p5)
}
  0x2e   :  { %60 = dma.hbm_to_vmem [thread:$0]  %s10836_s4, 16, %s58_s12, [#allocation9]  }
  0x2f   :  { %10031 = dma.done.wait [#allocation4], 1792  }
  0x30   :  { %10032 = vsyncadd [#allocation4], 4294965504 }
  0x31   :  { %10033 = dma.done.wait [#allocation6], 73472  }
  0x32   :  { %10034 = vsyncadd [#allocation6], 4294893824 }
  0x33   :  { %10035 = dma.done.wait [#allocation9], 16  }
  0x34   :  { %10036 = vsyncadd [#allocation9], 4294967280  ;;  %v9293_v0 = vld [vmem:[#allocation7 + $0x78] sm:$0xff]   ;;  %v9297_v4 = vld [vmem:[#allocation7 + $0x70] sm:$0xff]   ;;  %v88_v23 = vlaneseq }
  0x35   :  { %v9294_v1 = vld [vmem:[#allocation7 + $0x38] sm:$0xff]   ;;  %8515 = vmatprep.subr.bf16.mxu0 %v9293_v0  ;;  %v9298_v5 = vld [vmem:[#allocation7 + $0x30] sm:$0xff]   ;;  %v9301_v8 = vld [vmem:[#allocation7 + $0x68] sm:$0xff]  }
  0x36   :  { %v9295_v2 = vld [vmem:[#allocation7 + $0xf8] sm:$0xff]   ;;  %8516 = vmatpush3.bf16.msra.mxu0 %v9294_v1  ;;  %v9299_v6 = vld [vmem:[#allocation7 + $0xf0] sm:$0xff]   ;;  %v9302_v9 = vld [vmem:[#allocation7 + $0x28] sm:$0xff]   ;;  %v10087_v28 = vshrl.u32 %v88_v23, 7 }
  0x37   :  { %v9296_v3 = vld [vmem:[#allocation7 + $0xb8] sm:$0xff]   ;;  %8537 = vmatprep.subr.bf16.mxu1 %v9295_v2  ;;  %8517 = vmatprep.subr.bf16.mxu0 %v9297_v4  ;;  %v9300_v7 = vld [vmem:[#allocation7 + $0xb0] sm:$0xff]   ;;  %v9303_v10 = vld [vmem:[#allocation7 + $0xe8] sm:$0xff]  }
  0x38   :  { %8538 = vmatpush3.bf16.msra.mxu1 %v9296_v3  ;;  %v9304_v11 = vld [vmem:[#allocation7 + $0xa8] sm:$0xff]   ;;  %v9305_v12 = vld [vmem:[#allocation7 + $0x60] sm:$0xff]   ;;  %v9309_v16 = vld [vmem:[#allocation7 + $0x58] sm:$0xff]   ;;  %v10090_v33 = vsub.s32 0, %v10087_v28  ;;  %v10093_v35 = vsub.s32 1, %v10087_v28  ;;  %v10096_v36 = vsub.s32 2, %v10087_v28 }
  0x39   :  { %8539 = vmatprep.subr.bf16.mxu1 %v9299_v6  ;;  %v9306_v13 = vld [vmem:[#allocation7 + $0x20] sm:$0xff]   ;;  %v9310_v17 = vld [vmem:[#allocation7 + $0x18] sm:$0xff]   ;;  %v9313_v20 = vld [vmem:[#allocation7 + $0x50] sm:$0xff]   ;;  %v10099_v37 = vsub.s32 3, %v10087_v28 }
  0x3a   :  { %8518 = vmatpush3.bf16.msra.mxu0 %v9298_v5  ;;  %v9307_v14 = vld [vmem:[#allocation7 + $0xe0] sm:$0xff]   ;;  %v9311_v18 = vld [vmem:[#allocation7 + $0xd8] sm:$0xff]   ;;  %v9314_v21 = vld [vmem:[#allocation7 + $0x10] sm:$0xff]  }
  0x3b   :  { %8519 = vmatprep.subr.bf16.mxu0 %v9301_v8  ;;  %v9308_v15 = vld [vmem:[#allocation7 + $0xa0] sm:$0xff]   ;;  %v9312_v19 = vld [vmem:[#allocation7 + $0x98] sm:$0xff]   ;;  %v9315_v22 = vld [vmem:[#allocation7 + $0xd0] sm:$0xff]  }
  0x3c   :  { %8540 = vmatpush3.bf16.msra.mxu1 %v9300_v7  ;;  %v9316_v24 = vld [vmem:[#allocation7 + $0x90] sm:$0xff]   ;;  %v9317_v25 = vld [vmem:[#allocation7 + $0x48] sm:$0xff]   ;;  %v9321_v30 = vld [vmem:[#allocation7 + $0x40] sm:$0xff]  }
  0x3d   :  { %8541 = vmatprep.subr.bf16.mxu1 %v9303_v10  ;;  %v9318_v26 = vld [vmem:[#allocation7 + $0x8] sm:$0xff]   ;;  %v9322_v31 = vld [vmem:[#allocation7] sm:$0xff]   ;;  %v10109_v39 = vld [vmem:[%s10832_s0 + $0x8] sm:$0xff] }
  0x3e   :  { %8520 = vmatpush3.bf16.msra.mxu0 %v9302_v9  ;;  %v9319_v27 = vld [vmem:[#allocation7 + $0xc8] sm:$0xff]   ;;  %v9323_v32 = vld [vmem:[#allocation7 + $0xc0] sm:$0xff]   ;;  %v9325_v48 = vld [vmem:[#allocation7 + $0x178] sm:$0xff]  }
  0x3f   :  { %8521 = vmatprep.subr.bf16.mxu0 %v9305_v12  ;;  %v9320_v29 = vld [vmem:[#allocation7 + $0x88] sm:$0xff]   ;;  %v9324_v44 = vld [vmem:[#allocation7 + $0x80] sm:$0xff]   ;;  %v10122_v49 = vld [vmem:[%s10832_s0 + $0x10] sm:$0xff] }
  0x40   :  { %8542 = vmatpush3.bf16.msra.mxu1 %v9304_v11  ;;  %v81_v34 = vld [vmem:[#allocation3] ss:$8 sm:$0xf] }
  0x41   :  { %8543 = vmatprep.subr.bf16.mxu1 %v9307_v14  ;;  %v10104_v38 = vld [vmem:[%s10832_s0] sm:$0xff]  ;;  %v10127_v50 = vld [vmem:[%s10832_s0 + $0x18] sm:$0xff]  ;;  %v9327_v61 = vld [vmem:[#allocation7 + $0x1f8] sm:$0xff]  }
  0x42   :  { %8522 = vmatpush3.bf16.msra.mxu0 %v9306_v13  ;;  %v82_v40 = vld [vmem:[#allocation3] ss:$8 sm:$0xf0] }
  0x43   :  { %8523 = vmatprep.subr.bf16.mxu0 %v9309_v16  ;;  %v84_v41 = vld [vmem:[#allocation5] ss:$8 sm:$0xf]  ;;  %v10111_v42 = vor.u32 %v82_v40, %v81_v34 }
  0x44   :  { %8544 = vmatpush3.bf16.msra.mxu1 %v9308_v15  ;;  %v85_v43 = vld [vmem:[#allocation5] ss:$8 sm:$0xf0] }
  0x45   :  { %8545 = vmatprep.subr.bf16.mxu1 %v9311_v18  ;;  %v10113_v45 = vor.u32 %v85_v43, %v84_v41  ;;  %v91_v46 = vrot.slane %v10111_v42, %v10090_v33  ;;  %v95_v47 = vrot.slane %v10111_v42, %v10093_v35  ;;  %v99_v51 = vrot.slane %v10111_v42, %v10096_v36  ;;  %v9326_v18 = vld [vmem:[#allocation7 + $0x138] sm:$0xff]   ;;  %v9337_v34 = vld [vmem:[#allocation7 + $0x160] sm:$0xff]  }
  0x46   :  { %8524 = vmatpush3.bf16.msra.mxu0 %v9310_v17  ;;  %v103_v52 = vrot.slane %v10111_v42, %v10099_v37  ;;  %v9339_v40 = vld [vmem:[#allocation7 + $0x1e0] sm:$0xff]  }
  0x47   :  { %8525 = vmatprep.subr.bf16.mxu0 %v9313_v20  ;;  %v141_v53 = vrot.slane %v10113_v45, %v10090_v33  ;;  %v145_v54 = vrot.slane %v10113_v45, %v10093_v35  ;;  %v149_v55 = vrot.slane %v10113_v45, %v10096_v36  ;;  %v153_v56 = vrot.slane %v10113_v45, %v10099_v37  ;;  %v9338_v41 = vld [vmem:[#allocation7 + $0x120] sm:$0xff]  }
  0x48   :  { %8546 = vmatpush3.bf16.msra.mxu1 %v9312_v19  ;;  %v123_v57 = vsub.f32 %v10104_v38, %v91_v46  ;;  %v124_v58 = vsub.f32 %v10109_v39, %v95_v47  ;;  %v125_v59 = vsub.f32 %v10122_v49, %v99_v51  ;;  %v126_v60 = vsub.f32 %v10127_v50, %v103_v52  ;;  %v9328_v19 = vld [vmem:[#allocation7 + $0x1b8] sm:$0xff]   ;;  %v9340_v43 = vld [vmem:[#allocation7 + $0x1a0] sm:$0xff]  }
  0x49   :  { %8547 = vmatprep.subr.bf16.mxu1 %v9315_v22  ;;  %v173_v62 = vsub.f32 %v141_v53, %v10104_v38  ;;  %v174_v63 = vsub.f32 %v145_v54, %v10109_v39  ;;  %v175_v0 = vsub.f32 %v149_v55, %v10122_v49  ;;  %v176_v1 = vsub.f32 %v153_v56, %v10127_v50  ;;  %v9341_v46 = vld [vmem:[#allocation7 + $0x158] sm:$0xff]   ;;  %v9345_v54 = vld [vmem:[#allocation7 + $0x150] sm:$0xff]  }
  0x4a   :  { %8526 = vmatpush3.bf16.msra.mxu0 %v9314_v21  ;;  %v130_v2 = vmax.f32 %v123_v57, 0.0  ;;  %v131_v3 = vmax.f32 %v124_v58, 0.0  ;;  %v132_v4 = vmax.f32 %v125_v59, 0.0  ;;  %v133_v5 = vmax.f32 %v126_v60, 0.0  ;;  %v9342_v51 = vld [vmem:[#allocation7 + $0x118] sm:$0xff]   ;;  %v9347_v58 = vld [vmem:[#allocation7 + $0x1d0] sm:$0xff]  }
  0x4b   :  { %8527 = vmatprep.subr.bf16.mxu0 %v9317_v25  ;;  %v180_v6 = vmax.f32 %v173_v62, 0.0  ;;  %v181_v7 = vmax.f32 %v174_v63, 0.0  ;;  %v182_v8 = vmax.f32 %v175_v0, 0.0  ;;  %v183_v9 = vmax.f32 %v176_v1, 0.0  ;;  %v9331_v25 = vld [vmem:[#allocation7 + $0x1f0] sm:$0xff]   ;;  %v9344_v52 = vld [vmem:[#allocation7 + $0x198] sm:$0xff]  }
  0x4c   :  { %8548 = vmatpush3.bf16.msra.mxu1 %v9316_v24  ;;  %v9329_v24 = vld [vmem:[#allocation7 + $0x170] sm:$0xff]   ;;  %v10153_v47 = vsub.s32 5, %v10087_v28  ;;  %v10156_v53 = vsub.s32 6, %v10087_v28  ;;  %v9349_v1 = vld [vmem:[#allocation7 + $0x148] sm:$0xff]  }
  0x4d   :  { %8549 = vmatprep.subr.bf16.mxu1 %v9319_v27  ;;  %v187_v10 = vmul.f32 %v180_v6, %v130_v2  ;;  %v188_v11 = vmul.f32 %v181_v7, %v131_v3  ;;  %v189_v12 = vmul.f32 %v182_v8, %v132_v4  ;;  %v190_v13 = vmul.f32 %v183_v9, %v133_v5  ;;  %v9332_v27 = vld [vmem:[#allocation7 + $0x1b0] sm:$0xff]   ;;  %v9351_v5 = vld [vmem:[#allocation7 + $0x1c8] sm:$0xff]  }
  0x4e   :  { %8528 = vmatpush3.bf16.msra.mxu0 %v9318_v26  ;;  %v9330_v26 = vld [vmem:[#allocation7 + $0x130] sm:$0xff]   ;;  %v111_v56 = vrot.slane %v10111_v42, %v10153_v47  ;;  %v161_v59 = vrot.slane %v10113_v45, %v10153_v47  ;;  %v115_v63 = vrot.slane %v10111_v42, %v10156_v53  ;;  %v165_v0 = vrot.slane %v10113_v45, %v10156_v53  ;;  %v9350_v7 = vld [vmem:[#allocation7 + $0x108] sm:$0xff]  }
  0x4f   :  { %8529 = vmatprep.subr.bf16.mxu0 %v9321_v30  ;;  %v194_v14 = vmul.f32 %v187_v10, %v187_v10  ;;  %v195_v15 = vmul.f32 %v188_v11, %v188_v11  ;;  %v196_v16 = vmul.f32 %v189_v12, %v189_v12  ;;  %v197_v17 = vmul.f32 %v190_v13, %v190_v13  ;;  %v9335_v30 = vld [vmem:[#allocation7 + $0x1e8] sm:$0xff]   ;;  %v9348_v60 = vld [vmem:[#allocation7 + $0x190] sm:$0xff]   ;;  %v9353_v11 = vld [vmem:[#allocation7 + $0x140] sm:$0xff]  }
  0x50   :  { %8550 = vmatpush3.bf16.msra.mxu1 %v9320_v29  ;;  %v9333_v29 = vld [vmem:[#allocation7 + $0x168] sm:$0xff]   ;;  %v10174_v62 = vld [vmem:[%s10832_s0 + $0x28] sm:$0xff] }
  0x51   :  { %8551 = vmatprep.subr.bf16.mxu1 %v9323_v32  ;;  %v9921_v20 = vpack.c.bf16 %v194_v14, %v194_v14  ;;  %v9922_v21 = vpack.c.bf16 %v195_v15, %v195_v15  ;;  %v9923_v22 = vpack.c.bf16 %v196_v16, %v196_v16  ;;  %v9924_v23 = vpack.c.bf16 %v197_v17, %v197_v17  ;;  %v9336_v32 = vld [vmem:[#allocation7 + $0x1a8] sm:$0xff]  }
  0x52   :  { %8530 = vmatpush3.bf16.msra.mxu0 %v9322_v31  ;;  %v9334_v31 = vld [vmem:[#allocation7 + $0x128] sm:$0xff]   ;;  %v128_v3 = vsub.f32 %v10174_v62, %v111_v56  ;;  %v178_v6 = vsub.f32 %v161_v59, %v10174_v62  ;;  %v9361_v56 = vld [vmem:[#allocation7 + $0x2f8] sm:$0xff]  }
  0x53   :  { %8559 = vmatprep.subr.bf16.mxu0 %v9325_v48  ;;  %6428 = vmatprep.mubr.bf16.mxu0 %v9922_v21  ;;  %v9343_v48 = vld [vmem:[#allocation7 + $0x1d8] sm:$0xff]   ;;  %v9352_v8 = vld [vmem:[#allocation7 + $0x188] sm:$0xff]  }
  0x54   :  { %8552 = vmatpush3.bf16.msra.mxu1 %v9324_v44  ;;  %6468 = vmatprep.mubr.bf16.mxu1 %v9924_v23  ;;  %v10150_v44 = vsub.s32 4, %v10087_v28  ;;  %v9346_v28 = vld [vmem:[#allocation7 + $0x110] sm:$0xff]   ;;  %v135_v9 = vmax.f32 %v128_v3, 0.0  ;;  %v185_v12 = vmax.f32 %v178_v6, 0.0 }
  0x55   :  { %8581 = vmatprep.subr.bf16.mxu1 %v9327_v61  ;;  %6429 = vmatmul.mubr.bf16.vlgmr.msra.gmra.mxu0 %v9921_v20  ;;  %v10169_v61 = vld [vmem:[%s10832_s0 + $0x20] sm:$0xff]  ;;  %v9363_v3 = vld [vmem:[#allocation7 + $0x270] sm:$0xff]  }
  0x56   :  { %8560 = vmatpush3.bf16.msra.mxu0 %v9326_v18  ;;  %v107_v55 = vrot.slane %v10111_v42, %v10150_v44  ;;  %v157_v57 = vrot.slane %v10113_v45, %v10150_v44  ;;  %v10187_v45 = vld [vmem:[%s10832_s0 + $0x30] sm:$0xff]  ;;  %v192_v20 = vmul.f32 %v185_v12, %v135_v9 }
  0x57   :  { %6469 = vmatmul.mubr.bf16.vlgmr.msra.gmra.mxu1 %v9923_v22  ;;  %8561 = vmatprep.subr.bf16.mxu0 %v9329_v24  ;;  %v129_v13 = vsub.f32 %v10187_v45, %v115_v63  ;;  %v179_v14 = vsub.f32 %v165_v0, %v10187_v45  ;;  %v235_v15 = vld [vmem:[#allocation3 + $0x1] ss:$8 sm:$0xf] }
  0x58   :  { %8582 = vmatpush3.bf16.msra.mxu1 %v9328_v19  ;;  %v127_v2 = vsub.f32 %v10169_v61, %v107_v55  ;;  %v177_v4 = vsub.f32 %v157_v57, %v10169_v61  ;;  %v236_v17 = vld [vmem:[#allocation3 + $0x1] ss:$8 sm:$0xf0] }
  0x59   :  { %8583 = vmatprep.subr.bf16.mxu1 %v9331_v25  ;;  %v239_v18 = vld [vmem:[#allocation5 + $0x1] ss:$8 sm:$0xf]  ;;  %v136_v21 = vmax.f32 %v129_v13, 0.0  ;;  %v186_v22 = vmax.f32 %v179_v14, 0.0  ;;  %v10191_v23 = vor.u32 %v236_v17, %v235_v15 }
  0x5a   :  { %8562 = vmatpush3.bf16.msra.mxu0 %v9330_v26  ;;  %v134_v42 = vmax.f32 %v127_v2, 0.0  ;;  %v184_v10 = vmax.f32 %v177_v4, 0.0  ;;  %v9355_v19 = vld [vmem:[#allocation7 + $0x1c0] sm:$0xff]   ;;  %v9360_v63 = vld [vmem:[#allocation7 + $0x238] sm:$0xff]   ;;  %v9364_v15 = vld [vmem:[#allocation7 + $0x230] sm:$0xff]  }
  0x5b   :  { %8563 = vmatprep.subr.bf16.mxu0 %v9333_v29  ;;  %v240_v24 = vld [vmem:[#allocation5 + $0x1] ss:$8 sm:$0xf0]  ;;  %v199_v29 = vmul.f32 %v192_v20, %v192_v20  ;;  %v258_v57 = vrot.slane %v10191_v23, %v10099_v37  ;;  %v266_v12 = vrot.slane %v10191_v23, %v10153_v47 }
  0x5c   :  { %8584 = vmatpush3.bf16.msra.mxu1 %v9332_v27  ;;  %v191_v16 = vmul.f32 %v184_v10, %v134_v42  ;;  %v10193_v26 = vor.u32 %v240_v24, %v239_v18  ;;  %v9354_v27 = vld [vmem:[#allocation7 + $0x100] sm:$0xff]   ;;  %v262_v42 = vrot.slane %v10191_v23, %v10150_v44  ;;  %v9367_v18 = vld [vmem:[#allocation7 + $0x268] sm:$0xff]  }
  0x5d   :  { %8585 = vmatprep.subr.bf16.mxu1 %v9335_v30  ;;  %v193_v30 = vmul.f32 %v186_v22, %v136_v21  ;;  %v9926_v59 = vpack.c.bf16 %v199_v29, %v199_v29  ;;  %v283_v20 = vsub.f32 %v10174_v62, %v266_v12 }
  0x5e   :  { %8564 = vmatpush3.bf16.msra.mxu0 %v9334_v31  ;;  %v198_v25 = vmul.f32 %v191_v16, %v191_v16  ;;  %v246_v31 = vrot.slane %v10191_v23, %v10090_v33  ;;  %v282_v16 = vsub.f32 %v10169_v61, %v262_v42  ;;  %v312_v17 = vrot.slane %v10193_v26, %v10150_v44  ;;  %v9380_v42 = vld [vmem:[#allocation7 + $0x210] sm:$0xff]  }
  0x5f   :  { %8565 = vmatprep.subr.bf16.mxu0 %v9337_v34  ;;  %v9356_v34 = vld [vmem:[#allocation7 + $0x180] sm:$0xff]   ;;  %6508 = vmatprep.mubr.bf16.mxu0 %v9926_v59 }
  0x60   :  { %8586 = vmatpush3.bf16.msra.mxu1 %v9336_v32  ;;  %v250_v32 = vrot.slane %v10191_v23, %v10093_v35  ;;  %v332_v24 = vsub.f32 %v312_v17, %v10169_v61  ;;  %v289_v29 = vmax.f32 %v282_v16, 0.0  ;;  %v9374_v16 = vld [vmem:[#allocation7 + $0x2a0] sm:$0xff]  }
  0x61   :  { %8587 = vmatprep.subr.bf16.mxu1 %v9339_v40  ;;  %v296_v40 = vrot.slane %v10193_v26, %v10090_v33 }
  0x62   :  { %8566 = vmatpush3.bf16.msra.mxu0 %v9338_v41  ;;  %v300_v41 = vrot.slane %v10193_v26, %v10093_v35 }
  0x63   :  { %8567 = vmatprep.subr.bf16.mxu0 %v9341_v46  ;;  %v9357_v46 = vld [vmem:[#allocation7 + $0x278] sm:$0xff]  }
  0x64   :  { %8588 = vmatpush3.bf16.msra.mxu1 %v9340_v43  ;;  %v254_v43 = vrot.slane %v10191_v23, %v10096_v36  ;;  %v329_v55 = vsub.f32 %v300_v41, %v10109_v39  ;;  %v9371_v41 = vld [vmem:[#allocation7 + $0x260] sm:$0xff]  }
  0x65   :  { %8589 = vmatprep.subr.bf16.mxu1 %v9343_v48  ;;  %v200_v48 = vmul.f32 %v193_v30, %v193_v30 }
  0x66   :  { %8568 = vmatpush3.bf16.msra.mxu0 %v9342_v51  ;;  %v278_v51 = vsub.f32 %v10104_v38, %v246_v31  ;;  %v336_v2 = vmax.f32 %v329_v55, 0.0  ;;  %v280_v4 = vsub.f32 %v10122_v49, %v254_v43 }
  0x67   :  { %8569 = vmatprep.subr.bf16.mxu0 %v9345_v54  ;;  %v328_v54 = vsub.f32 %v296_v40, %v10104_v38  ;;  %v281_v38 = vsub.f32 %v10127_v50, %v258_v57  ;;  %v290_v40 = vmax.f32 %v283_v20, 0.0  ;;  %v9388_v20 = vld [vmem:[#allocation7 + $0x200] sm:$0xff]  }
  0x68   :  { %8590 = vmatpush3.bf16.msra.mxu1 %v9344_v52  ;;  %v279_v52 = vsub.f32 %v10109_v39, %v250_v32  ;;  %v304_v39 = vrot.slane %v10193_v26, %v10096_v36  ;;  %v9368_v32 = vld [vmem:[#allocation7 + $0x228] sm:$0xff]  }
  0x69   :  { %8591 = vmatprep.subr.bf16.mxu1 %v9347_v58  ;;  %v9925_v58 = vpack.c.bf16 %v198_v25, %v198_v25  ;;  %v288_v9 = vmax.f32 %v281_v38, 0.0  ;;  %v320_v25 = vrot.slane %v10193_v26, %v10156_v53 }
  0x6a   :  { %8570 = vmatpush3.bf16.msra.mxu0 %v9346_v28  ;;  %v8478_v28 = vpack.c.bf16 %v200_v48, %v200_v48  ;;  %v286_v0 = vmax.f32 %v279_v52, 0.0  ;;  %v330_v10 = vsub.f32 %v304_v39, %v10122_v49  ;;  %v316_v49 = vrot.slane %v10193_v26, %v10153_v47 }
  0x6b   :  { %8571 = vmatprep.subr.bf16.mxu0 %v9349_v1  ;;  %v335_v1 = vmax.f32 %v328_v54, 0.0  ;;  %v9372_v54 = vld [vmem:[#allocation7 + $0x220] sm:$0xff]  }
  0x6c   :  { %8592 = vmatpush3.bf16.msra.mxu1 %v9348_v60  ;;  %v285_v60 = vmax.f32 %v278_v51, 0.0  ;;  %233 = vst [vmem:[#allocation2 + $0x18] sm:$0xf] %v8478_v28  ;;  %v333_v30 = vsub.f32 %v316_v49, %v10174_v62  ;;  %v9362_v28 = vld [vmem:[#allocation7 + $0x2b8] sm:$0xff]  }
  0x6d   :  { %8593 = vmatprep.subr.bf16.mxu1 %v9351_v5  ;;  %v308_v5 = vrot.slane %v10193_v26, %v10099_v37  ;;  %v9393_v49 = vld [vmem:[#allocation7 + $0x378] sm:$0xff]  }
  0x6e   :  { %8572 = vmatpush3.bf16.msra.mxu0 %v9350_v7  ;;  %v342_v6 = vmul.f32 %v335_v1, %v285_v60  ;;  %v343_v7 = vmul.f32 %v336_v2, %v286_v0  ;;  %v340_v51 = vmax.f32 %v333_v30, 0.0  ;;  %v9365_v1 = vld [vmem:[#allocation7 + $0x2f0] sm:$0xff]  }
  0x6f   :  { %8573 = vmatprep.subr.bf16.mxu0 %v9353_v11  ;;  %v331_v11 = vsub.f32 %v308_v5, %v10127_v50  ;;  %v270_v50 = vrot.slane %v10191_v23, %v10156_v53  ;;  %v334_v23 = vsub.f32 %v320_v25, %v10187_v45  ;;  %v9379_v5 = vld [vmem:[#allocation7 + $0x250] sm:$0xff]  }
  0x70   :  { %8594 = vmatpush3.bf16.msra.mxu1 %v9352_v8  ;;  %v287_v8 = vmax.f32 %v280_v4, 0.0  ;;  %v349_v13 = vmul.f32 %v342_v6, %v342_v6  ;;  %v350_v14 = vmul.f32 %v343_v7, %v343_v7  ;;  %v9376_v4 = vld [vmem:[#allocation7 + $0x218] sm:$0xff]   ;;  %v9366_v6 = vld [vmem:[#allocation7 + $0x2b0] sm:$0xff]  }
  0x71   :  { %8595 = vmatprep.subr.bf16.mxu1 %v9355_v19  ;;  %v337_v19 = vmax.f32 %v330_v10, 0.0  ;;  %v338_v22 = vmax.f32 %v331_v11, 0.0  ;;  %v284_v31 = vsub.f32 %v10187_v45, %v270_v50  ;;  %v341_v57 = vmax.f32 %v334_v23, 0.0  ;;  %v9370_v10 = vld [vmem:[#allocation7 + $0x2a8] sm:$0xff]   ;;  %v9373_v11 = vld [vmem:[#allocation7 + $0x2e0] sm:$0xff]   ;;  %v9378_v50 = vld [vmem:[#allocation7 + $0x298] sm:$0xff]  }
  0x72   :  { %8574 = vmatpush3.bf16.msra.mxu0 %v9354_v27  ;;  %v8479_v21 = vpack.c.bf16 %v350_v14, %v349_v13  ;;  %v9384_v13 = vld [vmem:[#allocation7 + $0x208] sm:$0xff]   ;;  %v9399_v25 = vld [vmem:[#allocation7 + $0x370] sm:$0xff]   ;;  %v9407_v23 = vld [vmem:[#allocation7 + $0x360] sm:$0xff]  }
  0x73   :  { %8603 = vmatprep.subr.bf16.mxu0 %v9357_v46  ;;  %v344_v27 = vmul.f32 %v337_v19, %v287_v8  ;;  %v339_v46 = vmax.f32 %v332_v24, 0.0  ;;  %v291_v52 = vmax.f32 %v284_v31, 0.0  ;;  %v9369_v8 = vld [vmem:[#allocation7 + $0x2e8] sm:$0xff]   ;;  %v9396_v24 = vld [vmem:[#allocation7 + $0x338] sm:$0xff]   ;;  %v9400_v30 = vld [vmem:[#allocation7 + $0x330] sm:$0xff]  }
  0x74   :  { %8596 = vmatpush3.bf16.msra.mxu1 %v9356_v34  ;;  %385 = vst [vmem:[#allocation2 + $0x1c] sm:$0xff] %v8479_v21  ;;  %v345_v34 = vmul.f32 %v338_v22, %v288_v9  ;;  %v9383_v9 = vld [vmem:[#allocation7 + $0x248] sm:$0xff]   ;;  %v9381_v21 = vld [vmem:[#allocation7 + $0x2d0] sm:$0xff]  }
  0x75   :  { %8625 = vmatprep.subr.bf16.mxu1 %v9361_v56  ;;  %6509 = vmatmul.mubr.bf16.vlgmr.msra.gmra.mxu0 %v9925_v58  ;;  %v351_v43 = vmul.f32 %v344_v27, %v344_v27  ;;  %v346_v26 = vmul.f32 %v339_v46, %v289_v29  ;;  %v347_v56 = vmul.f32 %v340_v51, %v290_v40  ;;  %v9375_v58 = vld [vmem:[#allocation7 + $0x258] sm:$0xff]   ;;  %v9382_v27 = vld [vmem:[#allocation7 + $0x290] sm:$0xff]   ;;  %v9385_v29 = vld [vmem:[#allocation7 + $0x2c8] sm:$0xff]  }
  0x76   :  { %8604 = vmatpush3.bf16.msra.mxu0 %v9360_v63  ;;  %v352_v48 = vmul.f32 %v345_v34, %v345_v34  ;;  %v348_v63 = vmul.f32 %v341_v57, %v291_v52  ;;  %v9403_v31 = vld [vmem:[#allocation7 + $0x368] sm:$0xff]   ;;  %v9389_v34 = vld [vmem:[#allocation7 + $0x2c0] sm:$0xff]   ;;  %v9398_v51 = vld [vmem:[#allocation7 + $0x3b8] sm:$0xff]  }
  0x77   :  { %8605 = vmatprep.subr.bf16.mxu0 %v9363_v3  ;;  %v353_v59 = vmul.f32 %v346_v26, %v346_v26  ;;  %v354_v60 = vmul.f32 %v347_v56, %v347_v56  ;;  %v9404_v40 = vld [vmem:[#allocation7 + $0x328] sm:$0xff]   ;;  %v9408_v46 = vld [vmem:[#allocation7 + $0x320] sm:$0xff]   ;;  %v9401_v52 = vld [vmem:[#allocation7 + $0x3f0] sm:$0xff]  }
  0x78   :  { %v8480_v55 = vpack.c.bf16 %v352_v48, %v351_v43  ;;  %v355_v39 = vmul.f32 %v348_v63, %v348_v63  ;;  %v9397_v43 = vld [vmem:[#allocation7 + $0x3f8] sm:$0xff]   ;;  %v9402_v56 = vld [vmem:[#allocation7 + $0x3b0] sm:$0xff]   ;;  %v9405_v57 = vld [vmem:[#allocation7 + $0x3e8] sm:$0xff]  }
  0x79   :  { %v8481_v38 = vpack.c.bf16 %v354_v60, %v353_v59  ;;  %v9411_v48 = vld [vmem:[#allocation7 + $0x358] sm:$0xff]   ;;  %v9419_v59 = vld [vmem:[#allocation7 + $0x348] sm:$0xff]   ;;  %v9409_v60 = vld [vmem:[#allocation7 + $0x3e0] sm:$0xff]  }
  0x7a   :  { %8606 = vmatpush3.bf16.msra.mxu0 %v9364_v15  ;;  %386 = vst [vmem:[#allocation2 + $0x24] sm:$0xff] %v8480_v55  ;;  %v8482_v7 = vpack.c.bf16 %v355_v39, %v355_v39  ;;  %v9387_v15 = vld [vmem:[#allocation7 + $0x240] sm:$0xff]   ;;  %v9415_v55 = vld [vmem:[#allocation7 + $0x350] sm:$0xff]   ;;  %v9420_v63 = vld [vmem:[#allocation7 + $0x308] sm:$0xff]  }
  0x7b   :  { %8607 = vmatprep.subr.bf16.mxu0 %v9367_v18  ;;  %v1632_v0 = vld [vmem:[#allocation2 + $0x18] sm:$0xff]  ;;  %387 = vst [vmem:[#allocation2 + $0x2c] sm:$0xff] %v8481_v38  ;;  %v9377_v18 = vld [vmem:[#allocation7 + $0x2d8] sm:$0xff]  }
  0x7c   :  { %v7851_v2 = vcombine.low %v1632_v0, %v1632_v0  ;;  %v7852_v3 = vcombine.high %v1632_v0, %v1632_v0  ;;  %388 = vst [vmem:[#allocation2 + $0x34] sm:$0xf] %v8482_v7  ;;  %v390_v38 = vld [vmem:[#allocation3 + $0x2] ss:$8 sm:$0xf] }
  0x7d   :  { %v9413_v39 = vld [vmem:[#allocation7 + $0x3d8] sm:$0xff]  }
  0x7e   :  { %8608 = vmatpush3.bf16.msra.mxu0 %v9368_v32  ;;  %6548 = vmatprep.mubr.bf16.mxu1 %v7852_v3  ;;  %v9386_v32 = vld [vmem:[#allocation7 + $0x288] sm:$0xff]   ;;  %v9410_v3 = vld [vmem:[#allocation7 + $0x3a0] sm:$0xff]   ;;  %v9429_v7 = vld [vmem:[#allocation7 + $0x478] sm:$0xff]  }
  0x7f   :  { %8609 = vmatprep.subr.bf16.mxu0 %v9371_v41  ;;  %6549 = vmatmul.mubr.bf16.vlgmr.msra.gmra.mxu1 %v7851_v2  ;;  %v9392_v41 = vld [vmem:[#allocation7 + $0x280] sm:$0xff]  }
  0x80   :  { %8626 = vmatpush3.bf16.msra.mxu1 %v9362_v28  ;;  %v9406_v28 = vld [vmem:[#allocation7 + $0x3a8] sm:$0xff]  }
  0x81   :  { %8627 = vmatprep.subr.bf16.mxu1 %v9365_v1  ;;  %v1633_v12 = vld [vmem:[#allocation2 + $0x20] sm:$0xff]  ;;  %v9423_v1 = vld [vmem:[#allocation7 + $0x340] sm:$0xff]  }
  0x82   :  { %8610 = vmatpush3.bf16.msra.mxu0 %v9372_v54  ;;  %v7854_v14 = vcombine.high %v1633_v12, %v1633_v12  ;;  %v1634_v17 = vld [vmem:[#allocation2 + $0x28] sm:$0xff]  ;;  %v7853_v22 = vcombine.low %v1633_v12, %v1633_v12  ;;  %v9412_v54 = vld [vmem:[#allocation7 + $0x318] sm:$0xff]  }
  0x83   :  { %8611 = vmatprep.subr.bf16.mxu0 %v9375_v58  ;;  %v7856_v19 = vcombine.high %v1634_v17, %v1634_v17  ;;  %v7855_v26 = vcombine.low %v1634_v17, %v1634_v17  ;;  %v9416_v58 = vld [vmem:[#allocation7 + $0x310] sm:$0xff]   ;;  %v1635_v0 = vld [vmem:[#allocation2 + $0x30] sm:$0xff] }
  0x84   :  { %8628 = vmatpush3.bf16.msra.mxu1 %v9366_v6  ;;  %6588 = vmatprep.mubr.bf16.mxu0 %v7854_v14  ;;  %v7858_v2 = vcombine.high %v1635_v0, %v1635_v0  ;;  %v394_v6 = vld [vmem:[#allocation5 + $0x2] ss:$8 sm:$0xf] }
  0x85   :  { %8629 = vmatprep.subr.bf16.mxu1 %v9369_v8  ;;  %6628 = vmatprep.mubr.bf16.mxu1 %v7856_v19 }
  0x86   :  { %8612 = vmatpush3.bf16.msra.mxu0 %v9376_v4  ;;  %v9424_v4 = vld [vmem:[#allocation7 + $0x300] sm:$0xff]  }
  0x87   :  { %8613 = vmatprep.subr.bf16.mxu0 %v9379_v5  ;;  %v391_v5 = vld [vmem:[#allocation3 + $0x2] ss:$8 sm:$0xf0] }
  0x88   :  { %8630 = vmatpush3.bf16.msra.mxu1 %v9370_v10  ;;  %v10237_v8 = vor.u32 %v391_v5, %v390_v38  ;;  %v9422_v38 = vld [vmem:[#allocation7 + $0x388] sm:$0xff]  }
  0x89   :  { %8631 = vmatprep.subr.bf16.mxu1 %v9373_v11  ;;  %v9414_v11 = vld [vmem:[#allocation7 + $0x398] sm:$0xff]  }
  0x8a   :  { %8614 = vmatpush3.bf16.msra.mxu0 %v9380_v42  ;;  %v395_v42 = vld [vmem:[#allocation5 + $0x2] ss:$8 sm:$0xf0]  ;;  %v401_v12 = vrot.slane %v10237_v8, %v10090_v33  ;;  %v409_v14 = vrot.slane %v10237_v8, %v10096_v36 }
  0x8b   :  { %8615 = vmatprep.subr.bf16.mxu0 %v9383_v9  ;;  %v7857_v9 = vcombine.low %v1635_v0, %v1635_v0  ;;  %v10239_v10 = vor.u32 %v395_v42, %v394_v6 }
  0x8c   :  { %8632 = vmatpush3.bf16.msra.mxu1 %v9374_v16  ;;  %v9417_v16 = vld [vmem:[#allocation7 + $0x3d0] sm:$0xff]  }
  0x8d   :  { %8633 = vmatprep.subr.bf16.mxu1 %v9377_v18  ;;  %v451_v17 = vrot.slane %v10239_v10, %v10090_v33  ;;  %v455_v18 = vrot.slane %v10239_v10, %v10093_v35  ;;  %v459_v19 = vrot.slane %v10239_v10, %v10096_v36 }
  0x8e   :  { %8616 = vmatpush3.bf16.msra.mxu0 %v9384_v13  ;;  %v405_v13 = vrot.slane %v10237_v8, %v10093_v35 }
  0x8f   :  { %8617 = vmatprep.subr.bf16.mxu0 %v9387_v15  ;;  %v413_v15 = vrot.slane %v10237_v8, %v10099_v37 }
  0x90   :  { %8634 = vmatpush3.bf16.msra.mxu1 %v9378_v50 }
  0x91   :  { %8635 = vmatprep.subr.bf16.mxu1 %v9381_v21  ;;  %v10266_v21 = vld [vmem:[%s10832_s0 + $0x8] sm:$0xff] }
  0x92   :  { %8618 = vmatpush3.bf16.msra.mxu0 %v9388_v20  ;;  %v463_v20 = vrot.slane %v10239_v10, %v10099_v37 }
  0x93   :  { %8647 = vmatprep.subr.bf16.mxu0 %v9393_v49  ;;  %v10260_v49 = vld [vmem:[%s10832_s0] sm:$0xff] }
  0x94   :  { %8636 = vmatpush3.bf16.msra.mxu1 %v9382_v27  ;;  %v433_v50 = vsub.f32 %v10260_v49, %v401_v12  ;;  %v475_v12 = vrot.slane %v10239_v10, %v10156_v53 }
  0x95   :  { %6589 = vmatmul.mubr.bf16.vlgmr.msra.gmra.mxu0 %v7853_v22  ;;  %8637 = vmatprep.subr.bf16.mxu1 %v9385_v29  ;;  %v434_v22 = vsub.f32 %v10266_v21, %v405_v13  ;;  %v483_v29 = vsub.f32 %v451_v17, %v10260_v49  ;;  %v9425_v13 = vld [vmem:[#allocation7 + $0x3c0] sm:$0xff]  }
  0x96   :  { %8648 = vmatpush3.bf16.msra.mxu0 %v9396_v24  ;;  %6668 = vmatprep.mubr.bf16.mxu0 %v7858_v2  ;;  %v9430_v24 = vld [vmem:[#allocation7 + $0x438] sm:$0xff]  }
  0x97   :  { %8649 = vmatprep.subr.bf16.mxu0 %v9399_v25  ;;  %v10272_v25 = vld [vmem:[%s10832_s0 + $0x10] sm:$0xff] }
  0x98   :  { %8638 = vmatpush3.bf16.msra.mxu1 %v9386_v32  ;;  %v435_v27 = vsub.f32 %v10272_v25, %v409_v14  ;;  %v10280_v32 = vld [vmem:[%s10832_s0 + $0x18] sm:$0xff] }
  0x99   :  { %8639 = vmatprep.subr.bf16.mxu1 %v9389_v34  ;;  %v436_v34 = vsub.f32 %v10280_v32, %v413_v15  ;;  %v9428_v15 = vld [vmem:[#allocation7 + $0x380] sm:$0xff]  }
  0x9a   :  { %8650 = vmatpush3.bf16.msra.mxu0 %v9400_v30  ;;  %v484_v30 = vsub.f32 %v455_v18, %v10266_v21  ;;  %v489_v18 = vsub.f32 %v475_v12, %v10187_v45  ;;  %v9459_v12 = vld [vmem:[#allocation7 + $0x4c0] sm:$0xff]  }
  0x9b   :  { %8651 = vmatprep.subr.bf16.mxu0 %v9403_v31  ;;  %v9433_v31 = vld [vmem:[#allocation7 + $0x470] sm:$0xff]   ;;  %v443_v0 = vmax.f32 %v436_v34, 0.0  ;;  %v9432_v34 = vld [vmem:[#allocation7 + $0x4b8] sm:$0xff]  }
  0x9c   :  { %8640 = vmatpush3.bf16.msra.mxu1 %v9392_v41  ;;  %v441_v41 = vmax.f32 %v434_v22, 0.0 }
  0x9d   :  { %8669 = vmatprep.subr.bf16.mxu1 %v9397_v43  ;;  %v485_v43 = vsub.f32 %v459_v19, %v10272_v25 }
  0x9e   :  { %8652 = vmatpush3.bf16.msra.mxu0 %v9404_v40  ;;  %v9418_v40 = vld [vmem:[#allocation7 + $0x390] sm:$0xff]  }
  0x9f   :  { %8653 = vmatprep.subr.bf16.mxu0 %v9407_v23  ;;  %6629 = vmatmul.mubr.bf16.vlgmr.msra.gmra.mxu1 %v7855_v26  ;;  %v440_v23 = vmax.f32 %v433_v50, 0.0  ;;  %v491_v26 = vmax.f32 %v484_v30, 0.0  ;;  %v492_v2 = vmax.f32 %v485_v43, 0.0 }
  0xa0   :  { %8670 = vmatpush3.bf16.msra.mxu1 %v9398_v51  ;;  %v490_v51 = vmax.f32 %v483_v29, 0.0  ;;  %v9445_v29 = vld [vmem:[#allocation7 + $0x458] sm:$0xff]  }
  0xa1   :  { %8671 = vmatprep.subr.bf16.mxu1 %v9401_v52  ;;  %v417_v52 = vrot.slane %v10237_v8, %v10150_v44 }
  0xa2   :  { %8654 = vmatpush3.bf16.msra.mxu0 %v9408_v46  ;;  %v486_v46 = vsub.f32 %v463_v20, %v10280_v32  ;;  %v9431_v20 = vld [vmem:[#allocation7 + $0x4f8] sm:$0xff]  }
  0xa3   :  { %8655 = vmatprep.subr.bf16.mxu0 %v9411_v48  ;;  %v9421_v48 = vld [vmem:[#allocation7 + $0x3c8] sm:$0xff]  }
  0xa4   :  { %8672 = vmatpush3.bf16.msra.mxu1 %v9402_v56  ;;  %v442_v56 = vmax.f32 %v435_v27, 0.0  ;;  %v493_v6 = vmax.f32 %v486_v46, 0.0 }
  0xa5   :  { %8673 = vmatprep.subr.bf16.mxu1 %v9405_v57  ;;  %v467_v57 = vrot.slane %v10239_v10, %v10150_v44 }
  0xa6   :  { %8656 = vmatpush3.bf16.msra.mxu0 %v9412_v54  ;;  %v421_v54 = vrot.slane %v10237_v8, %v10153_v47  ;;  %v499_v42 = vmul.f32 %v492_v2, %v442_v56  ;;  %v9458_v2 = vld [vmem:[#allocation7 + $0x400] sm:$0xff]  }
  0xa7   :  { %8657 = vmatprep.subr.bf16.mxu0 %v9415_v55  ;;  %v9434_v55 = vld [vmem:[#allocation7 + $0x430] sm:$0xff]  }
  0xa8   :  { %8674 = vmatpush3.bf16.msra.mxu1 %v9406_v28  ;;  %v497_v28 = vmul.f32 %v490_v51, %v440_v23  ;;  %v10302_v17 = vmul.f32 %v499_v42, %v499_v42  ;;  %v9449_v51 = vld [vmem:[#allocation7 + $0x450] sm:$0xff]  }
  0xa9   :  { %8675 = vmatprep.subr.bf16.mxu1 %v9409_v60  ;;  %v498_v60 = vmul.f32 %v491_v26, %v441_v41  ;;  %v9466_v42 = vld [vmem:[#allocation7 + $0x530] sm:$0xff]  }
  0xaa   :  { %8658 = vmatpush3.bf16.msra.mxu0 %v9416_v58  ;;  %v471_v58 = vrot.slane %v10239_v10, %v10153_v47 }
  0xab   :  { %8659 = vmatprep.subr.bf16.mxu0 %v9419_v59  ;;  %v425_v59 = vrot.slane %v10237_v8, %v10156_v53  ;;  %v505_v5 = vmul.f32 %v498_v60, %v498_v60  ;;  %v9438_v8 = vld [vmem:[#allocation7 + $0x428] sm:$0xff]  }
  0xac   :  { %8676 = vmatpush3.bf16.msra.mxu1 %v9410_v3  ;;  %v438_v3 = vsub.f32 %v10174_v62, %v421_v54  ;;  %v9439_v54 = vld [vmem:[#allocation7 + $0x4e8] sm:$0xff]  }
  0xad   :  { %8677 = vmatprep.subr.bf16.mxu1 %v9413_v39  ;;  %v504_v39 = vmul.f32 %v497_v28, %v497_v28  ;;  %v9927_v19 = vpack.c.bf16 %v505_v5, %v505_v5  ;;  %v9443_v28 = vld [vmem:[#allocation7 + $0x4e0] sm:$0xff]   ;;  %v9454_v60 = vld [vmem:[#allocation7 + $0x408] sm:$0xff]   ;;  %v9462_v5 = vld [vmem:[#allocation7 + $0x538] sm:$0xff]  }
  0xae   :  { %8660 = vmatpush3.bf16.msra.mxu0 %v9420_v63  ;;  %v9437_v63 = vld [vmem:[#allocation7 + $0x468] sm:$0xff]   ;;  %v445_v14 = vmax.f32 %v438_v3, 0.0  ;;  %v9461_v3 = vld [vmem:[#allocation7 + $0x578] sm:$0xff]  }
  0xaf   :  { %8661 = vmatprep.subr.bf16.mxu0 %v9423_v1  ;;  %v437_v1 = vsub.f32 %v10169_v61, %v417_v52  ;;  %6708 = vmatprep.mubr.bf16.mxu1 %v9927_v19  ;;  %v9928_v23 = vpack.c.bf16 %v504_v39, %v504_v39  ;;  %v9436_v52 = vld [vmem:[#allocation7 + $0x4b0] sm:$0xff]   ;;  %v9931_v39 = vpack.c.bf16 %v10302_v17, %v10302_v17  ;;  %v9477_v17 = vld [vmem:[#allocation7 + $0x558] sm:$0xff]  }
  0xb0   :  { %8678 = vmatpush3.bf16.msra.mxu1 %v9414_v11  ;;  %v439_v11 = vsub.f32 %v10187_v45, %v425_v59  ;;  %v9435_v45 = vld [vmem:[#allocation7 + $0x4f0] sm:$0xff]   ;;  %v9440_v59 = vld [vmem:[#allocation7 + $0x4a8] sm:$0xff]  }
  0xb1   :  { %8679 = vmatprep.subr.bf16.mxu1 %v9417_v16  ;;  %v9441_v16 = vld [vmem:[#allocation7 + $0x460] sm:$0xff]   ;;  %v9467_v19 = vld [vmem:[#allocation7 + $0x5f0] sm:$0xff]  }
  0xb2   :  { %8662 = vmatpush3.bf16.msra.mxu0 %v9424_v4  ;;  %v487_v4 = vsub.f32 %v467_v57, %v10169_v61  ;;  %v500_v61 = vmul.f32 %v493_v6, %v443_v0  ;;  %v446_v27 = vmax.f32 %v439_v11, 0.0  ;;  %v9450_v57 = vld [vmem:[#allocation7 + $0x410] sm:$0xff]   ;;  %v9444_v0 = vld [vmem:[#allocation7 + $0x4a0] sm:$0xff]   ;;  %v9456_v11 = vld [vmem:[#allocation7 + $0x488] sm:$0xff]  }
  0xb3   :  { %8691 = vmatprep.subr.bf16.mxu0 %v9429_v7  ;;  %v488_v7 = vsub.f32 %v471_v58, %v10174_v62  ;;  %v9453_v58 = vld [vmem:[#allocation7 + $0x448] sm:$0xff]   ;;  %v9465_v6 = vld [vmem:[#allocation7 + $0x570] sm:$0xff]  }
  0xb4   :  { %8680 = vmatpush3.bf16.msra.mxu1 %v9418_v40  ;;  %v494_v62 = vmax.f32 %v487_v4, 0.0  ;;  %v507_v50 = vmul.f32 %v500_v61, %v500_v61  ;;  %v9448_v4 = vld [vmem:[#allocation7 + $0x498] sm:$0xff]   ;;  %v9473_v61 = vld [vmem:[#allocation7 + $0x560] sm:$0xff]  }
  0xb5   :  { %6669 = vmatmul.mubr.bf16.vlgmr.msra.gmra.mxu0 %v7857_v9  ;;  %v444_v9 = vmax.f32 %v437_v1, 0.0  ;;  %8681 = vmatprep.subr.bf16.mxu1 %v9421_v48  ;;  %v495_v22 = vmax.f32 %v488_v7, 0.0  ;;  %v9446_v48 = vld [vmem:[#allocation7 + $0x418] sm:$0xff]   ;;  %v9452_v7 = vld [vmem:[#allocation7 + $0x490] sm:$0xff]  }
  0xb6   :  { %8692 = vmatpush3.bf16.msra.mxu0 %v9430_v24  ;;  %v9442_v24 = vld [vmem:[#allocation7 + $0x420] sm:$0xff]   ;;  %v9929_v41 = vpack.c.bf16 %v507_v50, %v507_v50  ;;  %v9447_v1 = vld [vmem:[#allocation7 + $0x4d8] sm:$0xff]   ;;  %v9481_v50 = vld [vmem:[#allocation7 + $0x550] sm:$0xff]  }
  0xb7   :  { %8693 = vmatprep.subr.bf16.mxu0 %v9433_v31  ;;  %v501_v10 = vmul.f32 %v494_v62, %v444_v9  ;;  %v502_v30 = vmul.f32 %v495_v22, %v445_v14  ;;  %v496_v31 = vmax.f32 %v489_v18, 0.0  ;;  %v9469_v9 = vld [vmem:[#allocation7 + $0x568] sm:$0xff]   ;;  %v9460_v14 = vld [vmem:[#allocation7 + $0x480] sm:$0xff]   ;;  %v9464_v62 = vld [vmem:[#allocation7 + $0x5b8] sm:$0xff]  }
  0xb8   :  { %8682 = vmatpush3.bf16.msra.mxu1 %v9422_v38  ;;  %6748 = vmatprep.mubr.bf16.mxu0 %v9929_v41  ;;  %v9451_v38 = vld [vmem:[#allocation7 + $0x4d0] sm:$0xff]  }
  0xb9   :  { %8683 = vmatprep.subr.bf16.mxu1 %v9425_v13  ;;  %v10305_v40 = vmul.f32 %v501_v10, %v501_v10  ;;  %v509_v43 = vmul.f32 %v502_v30, %v502_v30  ;;  %v503_v46 = vmul.f32 %v496_v31, %v446_v27  ;;  %v9470_v13 = vld [vmem:[#allocation7 + $0x528] sm:$0xff]   ;;  %v9468_v22 = vld [vmem:[#allocation7 + $0x5b0] sm:$0xff]   ;;  %v9475_v30 = vld [vmem:[#allocation7 + $0x5e0] sm:$0xff]  }
  0xba   :  { %8694 = vmatpush3.bf16.msra.mxu0 %v9434_v55  ;;  %v9482_v10 = vld [vmem:[#allocation7 + $0x510] sm:$0xff]   ;;  %v9485_v27 = vld [vmem:[#allocation7 + $0x548] sm:$0xff]  }
  0xbb   :  { %8695 = vmatprep.subr.bf16.mxu0 %v9437_v63  ;;  %v510_v26 = vmul.f32 %v503_v46, %v503_v46  ;;  %v9930_v55 = vpack.c.bf16 %v509_v43, %v509_v43  ;;  %v9457_v63 = vld [vmem:[#allocation7 + $0x440] sm:$0xff]   ;;  %v9932_v18 = vpack.c.bf16 %v10305_v40, %v10305_v40  ;;  %v9486_v31 = vld [vmem:[#allocation7 + $0x508] sm:$0xff]  }
  0xbc   :  { %8684 = vmatpush3.bf16.msra.mxu1 %v9428_v15  ;;  %v9463_v15 = vld [vmem:[#allocation7 + $0x5f8] sm:$0xff]   ;;  %v9476_v40 = vld [vmem:[#allocation7 + $0x5a0] sm:$0xff]  }
  0xbd   :  { %8713 = vmatprep.subr.bf16.mxu1 %v9431_v20  ;;  %v8486_v56 = vpack.c.bf16 %v510_v26, %v510_v26  ;;  %v9478_v20 = vld [vmem:[#allocation7 + $0x518] sm:$0xff]   ;;  %v9490_v46 = vld [vmem:[#allocation7 + $0x500] sm:$0xff]  }
  0xbe   :  { %8696 = vmatpush3.bf16.msra.mxu0 %v9438_v8  ;;  %v9455_v8 = vld [vmem:[#allocation7 + $0x4c8] sm:$0xff]  }
  0xbf   :  { %8697 = vmatprep.subr.bf16.mxu0 %v9441_v16  ;;  %6709 = vmatmul.mubr.bf16.vlgmr.msra.gmra.mxu1 %v9928_v23  ;;  %543 = vst [vmem:[#allocation2 + $0x50] sm:$0xf] %v8486_v56  ;;  %v9474_v16 = vld [vmem:[#allocation7 + $0x520] sm:$0xff]  }
  0xc0   :  { %8714 = vmatpush3.bf16.msra.mxu1 %v9432_v34  ;;  %6788 = vmatprep.mubr.bf16.mxu1 %v9930_v55  ;;  %v9489_v34 = vld [vmem:[#allocation7 + $0x540] sm:$0xff]   ;;  %v9495_v55 = vld [vmem:[#allocation7 + $0x678] sm:$0xff]  }
  0xc1   :  { %8715 = vmatprep.subr.bf16.mxu1 %v9435_v45  ;;  %v545_v23 = vld [vmem:[#allocation3 + $0x3] ss:$8 sm:$0xf] }
  0xc2   :  { %8698 = vmatpush3.bf16.msra.mxu0 %v9442_v24  ;;  %v9471_v24 = vld [vmem:[#allocation7 + $0x5e8] sm:$0xff]   ;;  %v9479_v45 = vld [vmem:[#allocation7 + $0x5d8] sm:$0xff]  }
  0xc3   :  { %8699 = vmatprep.subr.bf16.mxu0 %v9445_v29  ;;  %v9472_v29 = vld [vmem:[#allocation7 + $0x5a8] sm:$0xff]  }
  0xc4   :  { %8716 = vmatpush3.bf16.msra.mxu1 %v9436_v52  ;;  %v546_v41 = vld [vmem:[#allocation3 + $0x3] ss:$8 sm:$0xf0] }
  0xc5   :  { %8717 = vmatprep.subr.bf16.mxu1 %v9439_v54  ;;  %v549_v43 = vld [vmem:[#allocation5 + $0x3] ss:$8 sm:$0xf] }
  0xc6   :  { %8700 = vmatpush3.bf16.msra.mxu0 %v9446_v48  ;;  %v10311_v48 = vor.u32 %v546_v41, %v545_v23 }
  0xc7   :  { %8701 = vmatprep.subr.bf16.mxu0 %v9449_v51  ;;  %v550_v51 = vld [vmem:[#allocation5 + $0x3] ss:$8 sm:$0xf0] }
  0xc8   :  { %8718 = vmatpush3.bf16.msra.mxu1 %v9440_v59  ;;  %v10313_v26 = vor.u32 %v550_v51, %v549_v43  ;;  %v556_v52 = vrot.slane %v10311_v48, %v10090_v33  ;;  %v560_v54 = vrot.slane %v10311_v48, %v10093_v35  ;;  %v564_v56 = vrot.slane %v10311_v48, %v10096_v36 }
  0xc9   :  { %8719 = vmatprep.subr.bf16.mxu1 %v9443_v28 }
  0xca   :  { %8702 = vmatpush3.bf16.msra.mxu0 %v9450_v57  ;;  %v568_v57 = vrot.slane %v10311_v48, %v10099_v37  ;;  %v610_v59 = vrot.slane %v10313_v26, %v10093_v35  ;;  %v614_v28 = vrot.slane %v10313_v26, %v10096_v36  ;;  %v630_v23 = vrot.slane %v10313_v26, %v10156_v53 }
  0xcb   :  { %8703 = vmatprep.subr.bf16.mxu0 %v9453_v58  ;;  %v606_v58 = vrot.slane %v10313_v26, %v10090_v33 }
  0xcc   :  { %8720 = vmatpush3.bf16.msra.mxu1 %v9444_v0  ;;  %v588_v0 = vsub.f32 %v10260_v49, %v556_v52  ;;  %v10368_v52 = vld [vmem:[%s10832_s0 + $0x30] sm:$0xff] }
  0xcd   :  { %8721 = vmatprep.subr.bf16.mxu1 %v9447_v1  ;;  %v589_v1 = vsub.f32 %v10266_v21, %v560_v54 }
  0xce   :  { %8704 = vmatpush3.bf16.msra.mxu0 %v9454_v60  ;;  %v618_v60 = vrot.slane %v10313_v26, %v10099_v37 }
  0xcf   :  { %8705 = vmatprep.subr.bf16.mxu0 %v9457_v63  ;;  %v9480_v63 = vld [vmem:[#allocation7 + $0x598] sm:$0xff]  }
  0xd0   :  { %8722 = vmatpush3.bf16.msra.mxu1 %v9448_v4  ;;  %v638_v4 = vsub.f32 %v606_v58, %v10260_v49  ;;  %v572_v49 = vrot.slane %v10311_v48, %v10150_v44 }
  0xd1   :  { %8723 = vmatprep.subr.bf16.mxu1 %v9451_v38  ;;  %v639_v38 = vsub.f32 %v610_v59, %v10266_v21  ;;  %v576_v21 = vrot.slane %v10311_v48, %v10153_v47  ;;  %v9499_v59 = vld [vmem:[#allocation7 + $0x6f8] sm:$0xff]  }
  0xd2   :  { %8706 = vmatpush3.bf16.msra.mxu0 %v9458_v2  ;;  %v590_v2 = vsub.f32 %v10272_v25, %v564_v56 }
  0xd3   :  { %8735 = vmatprep.subr.bf16.mxu0 %v9461_v3  ;;  %v9483_v3 = vld [vmem:[#allocation7 + $0x5d0] sm:$0xff]  }
  0xd4   :  { %8724 = vmatpush3.bf16.msra.mxu1 %v9452_v7  ;;  %v597_v7 = vmax.f32 %v590_v2, 0.0  ;;  %v9498_v2 = vld [vmem:[#allocation7 + $0x638] sm:$0xff]  }
  0xd5   :  { %6749 = vmatmul.mubr.bf16.vlgmr.msra.gmra.mxu0 %v9931_v39  ;;  %8725 = vmatprep.subr.bf16.mxu1 %v9455_v8  ;;  %v591_v39 = vsub.f32 %v10280_v32, %v568_v57  ;;  %v640_v8 = vsub.f32 %v614_v28, %v10272_v25 }
  0xd6   :  { %8736 = vmatpush3.bf16.msra.mxu0 %v9462_v5  ;;  %v595_v5 = vmax.f32 %v588_v0, 0.0 }
  0xd7   :  { %8737 = vmatprep.subr.bf16.mxu0 %v9465_v6  ;;  %v596_v6 = vmax.f32 %v589_v1, 0.0 }
  0xd8   :  { %8726 = vmatpush3.bf16.msra.mxu1 %v9456_v11  ;;  %v598_v11 = vmax.f32 %v591_v39, 0.0 }
  0xd9   :  { %8727 = vmatprep.subr.bf16.mxu1 %v9459_v12  ;;  %v641_v12 = vsub.f32 %v618_v60, %v10280_v32  ;;  %v626_v32 = vrot.slane %v10313_v26, %v10153_v47 }
  0xda   :  { %8738 = vmatpush3.bf16.msra.mxu0 %v9466_v42  ;;  %v645_v42 = vmax.f32 %v638_v4, 0.0 }
  0xdb   :  { %8739 = vmatprep.subr.bf16.mxu0 %v9469_v9  ;;  %v646_v9 = vmax.f32 %v639_v38, 0.0 }
  0xdc   :  { %8728 = vmatpush3.bf16.msra.mxu1 %v9460_v14  ;;  %v622_v14 = vrot.slane %v10313_v26, %v10150_v44  ;;  %v652_v25 = vmul.f32 %v645_v42, %v595_v5  ;;  %v9494_v26 = vld [vmem:[#allocation7 + $0x580] sm:$0xff]   ;;  %v9501_v42 = vld [vmem:[#allocation7 + $0x670] sm:$0xff]  }
  0xdd   :  { %8757 = vmatprep.subr.bf16.mxu1 %v9463_v15  ;;  %v9487_v15 = vld [vmem:[#allocation7 + $0x5c8] sm:$0xff]  }
  0xde   :  { %8740 = vmatpush3.bf16.msra.mxu0 %v9470_v13  ;;  %v9484_v13 = vld [vmem:[#allocation7 + $0x590] sm:$0xff]  }
  0xdf   :  { %8741 = vmatprep.subr.bf16.mxu0 %v9473_v61  ;;  %6789 = vmatmul.mubr.bf16.vlgmr.msra.gmra.mxu1 %v9932_v18  ;;  %v647_v61 = vmax.f32 %v640_v8, 0.0  ;;  %v10350_v18 = vld [vmem:[%s10832_s0 + $0x20] sm:$0xff] }
  0xe0   :  { %8758 = vmatpush3.bf16.msra.mxu1 %v9464_v62 }
  0xe1   :  { %8759 = vmatprep.subr.bf16.mxu1 %v9467_v19  ;;  %v654_v62 = vmul.f32 %v647_v61, %v597_v7  ;;  %v592_v19 = vsub.f32 %v10350_v18, %v572_v49  ;;  %v9504_v61 = vld [vmem:[#allocation7 + $0x6b0] sm:$0xff]   ;;  %v9505_v49 = vld [vmem:[#allocation7 + $0x668] sm:$0xff]  }
  0xe2   :  { %8742 = vmatpush3.bf16.msra.mxu0 %v9474_v16  ;;  %v653_v16 = vmul.f32 %v646_v9, %v596_v6  ;;  %v9500_v6 = vld [vmem:[#allocation7 + $0x6b8] sm:$0xff]  }
  0xe3   :  { %8743 = vmatprep.subr.bf16.mxu0 %v9477_v17  ;;  %v648_v17 = vmax.f32 %v641_v12, 0.0  ;;  %v9502_v12 = vld [vmem:[#allocation7 + $0x630] sm:$0xff]  }
  0xe4   :  { %8760 = vmatpush3.bf16.msra.mxu1 %v9468_v22  ;;  %v642_v22 = vsub.f32 %v622_v14, %v10350_v18  ;;  %v9507_v14 = vld [vmem:[#allocation7 + $0x6e8] sm:$0xff]  }
  0xe5   :  { %8761 = vmatprep.subr.bf16.mxu1 %v9471_v24  ;;  %v659_v24 = vmul.f32 %v652_v25, %v652_v25  ;;  %v9509_v25 = vld [vmem:[#allocation7 + $0x660] sm:$0xff]  }
  0xe6   :  { %8744 = vmatpush3.bf16.msra.mxu0 %v9478_v20  ;;  %v10356_v20 = vld [vmem:[%s10832_s0 + $0x28] sm:$0xff]  ;;  %v649_v51 = vmax.f32 %v642_v22, 0.0  ;;  %v9512_v22 = vld [vmem:[#allocation7 + $0x6a0] sm:$0xff]  }
  0xe7   :  { %8745 = vmatprep.subr.bf16.mxu0 %v9481_v50  ;;  %v593_v50 = vsub.f32 %v10356_v20, %v576_v21  ;;  %v9506_v21 = vld [vmem:[#allocation7 + $0x628] sm:$0xff]  }
  0xe8   :  { %8762 = vmatpush3.bf16.msra.mxu1 %v9472_v29  ;;  %v643_v29 = vsub.f32 %v626_v32, %v10356_v20  ;;  %v9511_v32 = vld [vmem:[#allocation7 + $0x6e0] sm:$0xff]  }
  0xe9   :  { %8763 = vmatprep.subr.bf16.mxu1 %v9475_v30  ;;  %v9488_v30 = vld [vmem:[#allocation7 + $0x588] sm:$0xff]  }
  0xea   :  { %8746 = vmatpush3.bf16.msra.mxu0 %v9482_v10  ;;  %v660_v10 = vmul.f32 %v653_v16, %v653_v16  ;;  %v650_v56 = vmax.f32 %v643_v29, 0.0  ;;  %v9510_v16 = vld [vmem:[#allocation7 + $0x620] sm:$0xff]   ;;  %v9516_v29 = vld [vmem:[#allocation7 + $0x698] sm:$0xff]  }
  0xeb   :  { %8747 = vmatprep.subr.bf16.mxu0 %v9485_v27  ;;  %v655_v27 = vmul.f32 %v648_v17, %v598_v11 }
  0xec   :  { %8764 = vmatpush3.bf16.msra.mxu1 %v9476_v40  ;;  %v580_v40 = vrot.slane %v10311_v48, %v10156_v53  ;;  %v8487_v41 = vpack.c.bf16 %v660_v10, %v659_v24  ;;  %v9514_v24 = vld [vmem:[#allocation7 + $0x618] sm:$0xff]  }
  0xed   :  { %8765 = vmatprep.subr.bf16.mxu1 %v9479_v45  ;;  %v9491_v45 = vld [vmem:[#allocation7 + $0x5c0] sm:$0xff]   ;;  %v662_v43 = vmul.f32 %v655_v27, %v655_v27  ;;  %v9515_v27 = vld [vmem:[#allocation7 + $0x6d8] sm:$0xff]  }
  0xee   :  { %8748 = vmatpush3.bf16.msra.mxu0 %v9486_v31  ;;  %v661_v31 = vmul.f32 %v654_v62, %v654_v62  ;;  %v594_v54 = vsub.f32 %v10368_v52, %v580_v40  ;;  %695 = vst [vmem:[#allocation2 + $0x54] sm:$0xff] %v8487_v41  ;;  %v9518_v40 = vld [vmem:[#allocation7 + $0x610] sm:$0xff]  }
  0xef   :  { %8749 = vmatprep.subr.bf16.mxu0 %v9489_v34  ;;  %v599_v34 = vmax.f32 %v592_v19, 0.0  ;;  %v9513_v19 = vld [vmem:[#allocation7 + $0x658] sm:$0xff]  }
  0xf0   :  { %8766 = vmatpush3.bf16.msra.mxu1 %v9480_v63  ;;  %v8488_v48 = vpack.c.bf16 %v662_v43, %v661_v31  ;;  %v601_v58 = vmax.f32 %v594_v54, 0.0  ;;  %v9519_v43 = vld [vmem:[#allocation7 + $0x6d0] sm:$0xff]  }
  0xf1   :  { %8767 = vmatprep.subr.bf16.mxu1 %v9483_v3  ;;  %v656_v57 = vmul.f32 %v649_v51, %v599_v34  ;;  %v9517_v34 = vld [vmem:[#allocation7 + $0x650] sm:$0xff]  }
  0xf2   :  { %8750 = vmatpush3.bf16.msra.mxu0 %v9490_v46  ;;  %v600_v46 = vmax.f32 %v593_v50, 0.0  ;;  %696 = vst [vmem:[#allocation2 + $0x5c] sm:$0xff] %v8488_v48  ;;  %v9520_v54 = vld [vmem:[#allocation7 + $0x690] sm:$0xff]  }
  0xf3   :  { %8779 = vmatprep.subr.bf16.mxu0 %v9495_v55  ;;  %v644_v55 = vsub.f32 %v630_v23, %v10368_v52  ;;  %v663_v63 = vmul.f32 %v656_v57, %v656_v57  ;;  %v7844_v23 = vld [vmem:[#allocation8] ss:$0 sm:$0xff]  ;;  %v9522_v57 = vld [vmem:[#allocation7 + $0x608] sm:$0xff]  }
  0xf4   :  { %8768 = vmatpush3.bf16.msra.mxu1 %v9484_v13  ;;  %v657_v28 = vmul.f32 %v650_v56, %v600_v46  ;;  %v9503_v13 = vld [vmem:[#allocation7 + $0x6f0] sm:$0xff]   ;;  %v9521_v56 = vld [vmem:[#allocation7 + $0x648] sm:$0xff]  }
  0xf5   :  { %8769 = vmatprep.subr.bf16.mxu1 %v9487_v15  ;;  %v651_v60 = vmax.f32 %v644_v55, 0.0  ;;  %v1639_v38 = vld [vmem:[#allocation2 + $0x50] sm:$0xff]  ;;  %v9508_v15 = vld [vmem:[#allocation7 + $0x6a8] sm:$0xff]  }
  0xf6   :  { %v664_v0 = vmul.f32 %v657_v28, %v657_v28  ;;  %v7865_v39 = vcombine.low %v1639_v38, %v1639_v38  ;;  %v7866_v5 = vcombine.high %v1639_v38, %v1639_v38  ;;  %v9523_v28 = vld [vmem:[#allocation7 + $0x6c8] sm:$0xff]   ;;  %v9534_v38 = vld [vmem:[#allocation7 + $0x738] sm:$0xff]  }
  0xf7   :  { %v658_v1 = vmul.f32 %v651_v60, %v601_v58 }
  0xf8   :  { %8770 = vmatpush3.bf16.msra.mxu1 %v9488_v30  ;;  %v8489_v3 = vpack.c.bf16 %v664_v0, %v663_v63  ;;  %6828 = vmatprep.mubr.bf16.mxu0 %v7866_v5  ;;  %v9524_v63 = vld [vmem:[#allocation7 + $0x688] sm:$0xff]   ;;  %v9525_v0 = vld [vmem:[#allocation7 + $0x640] sm:$0xff]   ;;  %v9535_v5 = vld [vmem:[#allocation7 + $0x7f8] sm:$0xff]  }
  0xf9   :  { %8771 = vmatprep.subr.bf16.mxu1 %v9491_v45  ;;  %v665_v4 = vmul.f32 %v658_v1, %v658_v1  ;;  %v1640_v8 = vld [vmem:[#allocation2 + $0x58] sm:$0xff]  ;;  %6829 = vmatmul.mubr.bf16.vlgmr.msra.gmra.mxu0 %v7865_v39 }
  0xfa   :  { %697 = vst [vmem:[#allocation2 + $0x64] sm:$0xff] %v8489_v3  ;;  %v7867_v9 = vcombine.low %v1640_v8, %v1640_v8  ;;  %v7868_v11 = vcombine.high %v1640_v8, %v1640_v8  ;;  %8780 = vmatpush3.bf16.msra.mxu0 %v9498_v2  ;;  %v9526_v1 = vld [vmem:[#allocation7 + $0x600] sm:$0xff]   ;;  %v9537_v8 = vld [vmem:[#allocation7 + $0x770] sm:$0xff]  }
  0xfb   :  { %v8490_v7 = vpack.c.bf16 %v665_v4, %v665_v4  ;;  %8781 = vmatprep.subr.bf16.mxu0 %v9501_v42  ;;  %v9527_v2 = vld [vmem:[#allocation7 + $0x6c0] sm:$0xff]   ;;  %v9531_v4 = vld [vmem:[#allocation7 + $0x778] sm:$0xff]   ;;  %v9538_v42 = vld [vmem:[#allocation7 + $0x730] sm:$0xff]  }
  0xfc   :  { %8772 = vmatpush3.bf16.msra.mxu1 %v9494_v26  ;;  %6868 = vmatprep.mubr.bf16.mxu1 %v7868_v11  ;;  %v9530_v3 = vld [vmem:[#allocation7 + $0x680] sm:$0xff]   ;;  %v9540_v11 = vld [vmem:[#allocation7 + $0x7b0] sm:$0xff]  }
  0xfd   :  { %8801 = vmatprep.subr.bf16.mxu1 %v9499_v59  ;;  %698 = vst [vmem:[#allocation2 + $0x6c] sm:$0xf] %v8490_v7 }
  0xfe   :  { %8782 = vmatpush3.bf16.msra.mxu0 %v9502_v12  ;;  %v9541_v12 = vld [vmem:[#allocation7 + $0x768] sm:$0xff]  }
  0xff   :  { %6869 = vmatmul.mubr.bf16.vlgmr.msra.gmra.mxu1 %v7867_v9  ;;  %8783 = vmatprep.subr.bf16.mxu0 %v9505_v49  ;;  %v9539_v9 = vld [vmem:[#allocation7 + $0x7f0] sm:$0xff]   ;;  %v9544_v49 = vld [vmem:[#allocation7 + $0x7a8] sm:$0xff]  }
 0x100   :  { %8802 = vmatpush3.bf16.msra.mxu1 %v9500_v6  ;;  %v9536_v6 = vld [vmem:[#allocation7 + $0x7b8] sm:$0xff]  }
 0x101   :  { %8803 = vmatprep.subr.bf16.mxu1 %v9503_v13  ;;  %v10372_v17 = vld [vmem:[#allocation2 + $0x60] sm:$0xff] }
 0x102   :  { %v7870_v62 = vcombine.high %v10372_v17, %v10372_v17  ;;  %8784 = vmatpush3.bf16.msra.mxu0 %v9506_v21  ;;  %v7869_v39 = vcombine.low %v10372_v17, %v10372_v17  ;;  %v9542_v13 = vld [vmem:[#allocation7 + $0x728] sm:$0xff]   ;;  %v9545_v21 = vld [vmem:[#allocation7 + $0x760] sm:$0xff]  }
 0x103   :  { %8785 = vmatprep.subr.bf16.mxu0 %v9509_v25  ;;  %v700_v25 = vld [vmem:[#allocation3 + $0x4] ss:$8 sm:$0xf] }
 0x104   :  { %8804 = vmatpush3.bf16.msra.mxu1 %v9504_v61  ;;  %6908 = vmatprep.mubr.bf16.mxu0 %v7870_v62  ;;  %v10376_v50 = vld [vmem:[#allocation2 + $0x68] sm:$0xff]  ;;  %v9543_v61 = vld [vmem:[#allocation7 + $0x7e8] sm:$0xff]   ;;  %v9549_v62 = vld [vmem:[#allocation7 + $0x758] sm:$0xff]  }
 0x105   :  { %8805 = vmatprep.subr.bf16.mxu1 %v9507_v14  ;;  %v7872_v10 = vcombine.high %v10376_v50, %v10376_v50  ;;  %v7871_v7 = vcombine.low %v10376_v50, %v10376_v50  ;;  %v9546_v14 = vld [vmem:[#allocation7 + $0x720] sm:$0xff]  }
 0x106   :  { %8786 = vmatpush3.bf16.msra.mxu0 %v9510_v16  ;;  %v9548_v16 = vld [vmem:[#allocation7 + $0x7a0] sm:$0xff]  }
 0x107   :  { %6948 = vmatprep.mubr.bf16.mxu1 %v7872_v10  ;;  %8787 = vmatprep.subr.bf16.mxu0 %v9513_v19  ;;  %v701_v17 = vld [vmem:[#allocation3 + $0x4] ss:$8 sm:$0xf0] }
 0x108   :  { %8806 = vmatpush3.bf16.msra.mxu1 %v9508_v15  ;;  %v9547_v15 = vld [vmem:[#allocation7 + $0x7e0] sm:$0xff]   ;;  %v10386_v19 = vor.u32 %v701_v17, %v700_v25  ;;  %v9551_v10 = vld [vmem:[#allocation7 + $0x7d8] sm:$0xff]  }
 0x109   :  { %8807 = vmatprep.subr.bf16.mxu1 %v9511_v32  ;;  %v704_v32 = vld [vmem:[#allocation5 + $0x4] ss:$8 sm:$0xf] }
 0x10a   :  { %8788 = vmatpush3.bf16.msra.mxu0 %v9514_v24  ;;  %v705_v50 = vld [vmem:[#allocation5 + $0x4] ss:$8 sm:$0xf0] }
 0x10b   :  { %8789 = vmatprep.subr.bf16.mxu0 %v9517_v34  ;;  %v10388_v24 = vor.u32 %v705_v50, %v704_v32  ;;  %v9552_v34 = vld [vmem:[#allocation7 + $0x798] sm:$0xff]  }
 0x10c   :  { %8808 = vmatpush3.bf16.msra.mxu1 %v9512_v22  ;;  %v9550_v22 = vld [vmem:[#allocation7 + $0x718] sm:$0xff]  }
 0x10d   :  { %8809 = vmatprep.subr.bf16.mxu1 %v9515_v27  ;;  %v711_v27 = vrot.slane %v10386_v19, %v10090_v33 }
 0x10e   :  { %8790 = vmatpush3.bf16.msra.mxu0 %v9518_v40  ;;  %v761_v40 = vrot.slane %v10388_v24, %v10090_v33 }
 0x10f   :  { %8791 = vmatprep.subr.bf16.mxu0 %v9521_v56  ;;  %v10421_v56 = vld [vmem:[%s10832_s0 + $0x10] sm:$0xff] }
 0x110   :  { %8810 = vmatpush3.bf16.msra.mxu1 %v9516_v29  ;;  %v715_v29 = vrot.slane %v10386_v19, %v10093_v35 }
 0x111   :  { %8811 = vmatprep.subr.bf16.mxu1 %v9519_v43  ;;  %v773_v43 = vrot.slane %v10388_v24, %v10099_v37 }
 0x112   :  { %8792 = vmatpush3.bf16.msra.mxu0 %v9522_v57  ;;  %v10427_v57 = vld [vmem:[%s10832_s0 + $0x18] sm:$0xff] }
 0x113   :  { %8793 = vmatprep.subr.bf16.mxu0 %v9525_v0 }
 0x114   :  { %8812 = vmatpush3.bf16.msra.mxu1 %v9520_v54 }
 0x115   :  { %v8531_v30 = vpop.f32.mrf.mxu0  ;;  %8813 = vmatprep.subr.bf16.mxu1 %v9523_v28 }
 0x116   :  { %8794 = vmatpush3.bf16.msra.mxu0 %v9526_v1  ;;  %v796_v1 = vsub.f32 %v773_v43, %v10427_v57  ;;  %v735_v43 = vrot.slane %v10386_v19, %v10156_v53 }
 0x117   :  { %v8553_v31 = vpop.f32.mrf.mxu1  ;;  %v8532_v45 = vpop.f32.mrf.mxu0  ;;  %8823 = vmatprep.subr.bf16.mxu0 %v9531_v4  ;;  %v9557_v4 = vld [vmem:[#allocation7 + $0x748] sm:$0xff]  }
 0x118   :  { %v8533_v46 = vadd.f32 %v8532_v45, %v8531_v30  ;;  %8814 = vmatpush3.bf16.msra.mxu1 %v9524_v63  ;;  %v719_v30 = vrot.slane %v10386_v19, %v10096_v36 }
 0x119   :  { %v8554_v41 = vpop.f32.mrf.mxu1  ;;  %v8534_v55 = vpop.f32.mrf.mxu0  ;;  %8815 = vmatprep.subr.bf16.mxu1 %v9527_v2  ;;  %6909 = vmatmul.mubr.bf16.vlgmr.msra.gmra.mxu0 %v7869_v39 }
 0x11a   :  { %v8555_v51 = vadd.f32 %v8554_v41, %v8553_v31  ;;  %v6431_v26 = vadd.f32 %v8533_v46, %v7844_v23  ;;  %8824 = vmatpush3.bf16.msra.mxu0 %v9534_v38  ;;  %v723_v31 = vrot.slane %v10386_v19, %v10099_v37  ;;  %v765_v23 = vrot.slane %v10388_v24, %v10093_v35  ;;  %v9553_v46 = vld [vmem:[#allocation7 + $0x750] sm:$0xff]  }
 0x11b   :  { %v8556_v48 = vpop.f32.mrf.mxu1  ;;  %v8535_v58 = vpop.f32.mrf.mxu0  ;;  %8825 = vmatprep.subr.bf16.mxu0 %v9537_v8  ;;  %v769_v41 = vrot.slane %v10388_v24, %v10096_v36  ;;  %v10415_v55 = vld [vmem:[%s10832_s0 + $0x8] sm:$0xff] }
 0x11c   :  { %v10380_v60 = vadd.f32 %v8555_v51, %v6431_v26  ;;  %8816 = vmatpush3.bf16.msra.mxu1 %v9530_v3  ;;  %v10409_v51 = vld [vmem:[%s10832_s0] sm:$0xff]  ;;  %v744_v48 = vsub.f32 %v10415_v55, %v715_v29  ;;  %v745_v26 = vsub.f32 %v10421_v56, %v719_v30  ;;  %v746_v58 = vsub.f32 %v10427_v57, %v723_v31  ;;  %v9555_v3 = vld [vmem:[#allocation7 + $0x7d0] sm:$0xff]  }
 0x11d   :  { %v8557_v59 = vpop.f32.mrf.mxu1  ;;  %8845 = vmatprep.subr.bf16.mxu1 %v9535_v5  ;;  %v743_v54 = vsub.f32 %v10409_v51, %v711_v27  ;;  %v793_v28 = vsub.f32 %v761_v40, %v10409_v51  ;;  %v794_v63 = vsub.f32 %v765_v23, %v10415_v55  ;;  %v795_v0 = vsub.f32 %v769_v41, %v10421_v56  ;;  %v9560_v29 = vld [vmem:[#allocation7 + $0x788] sm:$0xff]   ;;  %v9561_v23 = vld [vmem:[#allocation7 + $0x740] sm:$0xff]  }
 0x11e   :  { %8826 = vmatpush3.bf16.msra.mxu0 %v9538_v42  ;;  %v9554_v59 = vld [vmem:[#allocation7 + $0x710] sm:$0xff]   ;;  %v751_v39 = vmax.f32 %v744_v48, 0.0  ;;  %v752_v5 = vmax.f32 %v745_v26, 0.0  ;;  %v781_v27 = vrot.slane %v10388_v24, %v10153_v47  ;;  %v785_v48 = vrot.slane %v10388_v24, %v10156_v53 }
 0x11f   :  { %6949 = vmatmul.mubr.bf16.vlgmr.msra.gmra.mxu1 %v7871_v7  ;;  %8827 = vmatprep.subr.bf16.mxu0 %v9541_v12  ;;  %v750_v38 = vmax.f32 %v743_v54, 0.0  ;;  %v9556_v7 = vld [vmem:[#allocation7 + $0x790] sm:$0xff]   ;;  %v800_v8 = vmax.f32 %v793_v28, 0.0  ;;  %v801_v42 = vmax.f32 %v794_v63, 0.0  ;;  %v9563_v54 = vld [vmem:[#allocation7 + $0x7c0] sm:$0xff]  }
 0x120   :  { %8846 = vmatpush3.bf16.msra.mxu1 %v9536_v6  ;;  %v753_v6 = vmax.f32 %v746_v58, 0.0  ;;  %v9564_v63 = vld [vmem:[#allocation7 + $0x780] sm:$0xff]  }
 0x121   :  { %8847 = vmatprep.subr.bf16.mxu1 %v9539_v9  ;;  %v802_v9 = vmax.f32 %v795_v0, 0.0  ;;  %v808_v25 = vmul.f32 %v801_v42, %v751_v39  ;;  %v9569_v42 = vld [vmem:[#allocation7 + $0x870] sm:$0xff]  }
 0x122   :  { %8828 = vmatpush3.bf16.msra.mxu0 %v9542_v13 }
 0x123   :  { %8829 = vmatprep.subr.bf16.mxu0 %v9545_v21  ;;  %v777_v21 = vrot.slane %v10388_v24, %v10150_v44  ;;  %v815_v31 = vmul.f32 %v808_v25, %v808_v25  ;;  %v9573_v25 = vld [vmem:[#allocation7 + $0x868] sm:$0xff]  }
 0x124   :  { %8848 = vmatpush3.bf16.msra.mxu1 %v9540_v11  ;;  %v803_v11 = vmax.f32 %v796_v1, 0.0 }
 0x125   :  { %8849 = vmatprep.subr.bf16.mxu1 %v9543_v61  ;;  %v727_v61 = vrot.slane %v10386_v19, %v10150_v44  ;;  %v797_v41 = vsub.f32 %v777_v21, %v10350_v18  ;;  %v9933_v28 = vpack.c.bf16 %v815_v31, %v815_v31  ;;  %v9572_v21 = vld [vmem:[#allocation7 + $0x8b0] sm:$0xff]   ;;  %v9581_v31 = vld [vmem:[#allocation7 + $0x858] sm:$0xff]  }
 0x126   :  { %8830 = vmatpush3.bf16.msra.mxu0 %v9546_v14  ;;  %v9558_v14 = vld [vmem:[#allocation7 + $0x708] sm:$0xff]   ;;  %v810_v17 = vmul.f32 %v803_v11, %v753_v6 }
 0x127   :  { %8831 = vmatprep.subr.bf16.mxu0 %v9549_v62  ;;  %v9559_v62 = vld [vmem:[#allocation7 + $0x7c8] sm:$0xff]   ;;  %v804_v58 = vmax.f32 %v797_v41, 0.0  ;;  %6988 = vmatprep.mubr.bf16.mxu0 %v9933_v28 }
 0x128   :  { %8850 = vmatpush3.bf16.msra.mxu1 %v9544_v49  ;;  %v731_v49 = vrot.slane %v10386_v19, %v10153_v47  ;;  %v817_v40 = vmul.f32 %v810_v17, %v810_v17  ;;  %v799_v19 = vsub.f32 %v785_v48, %v10368_v52  ;;  %v9574_v17 = vld [vmem:[#allocation7 + $0x828] sm:$0xff]  }
 0x129   :  { %8851 = vmatprep.subr.bf16.mxu1 %v9547_v15  ;;  %v807_v15 = vmul.f32 %v800_v8, %v750_v38 }
 0x12a   :  { %8832 = vmatpush3.bf16.msra.mxu0 %v9550_v22  ;;  %v747_v22 = vsub.f32 %v10350_v18, %v727_v61  ;;  %v9934_v18 = vpack.c.bf16 %v817_v40, %v817_v40  ;;  %v9571_v61 = vld [vmem:[#allocation7 + $0x8f0] sm:$0xff]   ;;  %v9583_v40 = vld [vmem:[#allocation7 + $0x8d8] sm:$0xff]  }
 0x12b   :  { %8833 = vmatprep.subr.bf16.mxu0 %v9553_v46  ;;  %v814_v30 = vmul.f32 %v807_v15, %v807_v15  ;;  %v9562_v46 = vld [vmem:[#allocation7 + $0x700] sm:$0xff]  }
 0x12c   :  { %8852 = vmatpush3.bf16.msra.mxu1 %v9548_v16  ;;  %v809_v16 = vmul.f32 %v802_v9, %v752_v5  ;;  %7028 = vmatprep.mubr.bf16.mxu1 %v9934_v18  ;;  %v806_v5 = vmax.f32 %v799_v19, 0.0  ;;  %v9588_v18 = vld [vmem:[#allocation7 + $0x890] sm:$0xff]  }
 0x12d   :  { %8853 = vmatprep.subr.bf16.mxu1 %v9551_v10  ;;  %v748_v10 = vsub.f32 %v10356_v20, %v731_v49  ;;  %v9935_v24 = vpack.c.bf16 %v814_v30, %v814_v30  ;;  %v9579_v30 = vld [vmem:[#allocation7 + $0x8e0] sm:$0xff]  }
 0x12e   :  { %8834 = vmatpush3.bf16.msra.mxu0 %v9554_v59  ;;  %v749_v59 = vsub.f32 %v10368_v52, %v735_v43  ;;  %v856_v43 = vld [vmem:[#allocation3 + $0x5] ss:$8 sm:$0xf0] }
 0x12f   :  { %8835 = vmatprep.subr.bf16.mxu0 %v9557_v4  ;;  %v755_v26 = vmax.f32 %v748_v10, 0.0  ;;  %v9567_v4 = vld [vmem:[#allocation7 + $0x8f8] sm:$0xff]   ;;  %v9576_v10 = vld [vmem:[#allocation7 + $0x8a8] sm:$0xff]  }
 0x130   :  { %8854 = vmatpush3.bf16.msra.mxu1 %v9552_v34  ;;  %v816_v34 = vmul.f32 %v809_v16, %v809_v16 }
 0x131   :  { %8855 = vmatprep.subr.bf16.mxu1 %v9555_v3  ;;  %v756_v3 = vmax.f32 %v749_v59, 0.0  ;;  %v9587_v59 = vld [vmem:[#allocation7 + $0x8d0] sm:$0xff]  }
 0x132   :  { %8836 = vmatpush3.bf16.msra.mxu0 %v9558_v14  ;;  %v9936_v8 = vpack.c.bf16 %v816_v34, %v816_v34  ;;  %v9582_v34 = vld [vmem:[#allocation7 + $0x818] sm:$0xff]  }
 0x133   :  { %8837 = vmatprep.subr.bf16.mxu0 %v9561_v23  ;;  %v813_v52 = vmul.f32 %v806_v5, %v756_v3  ;;  %v9584_v23 = vld [vmem:[#allocation7 + $0x898] sm:$0xff]   ;;  %v9589_v3 = vld [vmem:[#allocation7 + $0x848] sm:$0xff]  }
 0x134   :  { %8856 = vmatpush3.bf16.msra.mxu1 %v9556_v7  ;;  %v9568_v7 = vld [vmem:[#allocation7 + $0x8b8] sm:$0xff]  }
 0x135   :  { %v8575_v45 = vpop.f32.mrf.mxu0  ;;  %8857 = vmatprep.subr.bf16.mxu1 %v9559_v62  ;;  %v820_v49 = vmul.f32 %v813_v52, %v813_v52  ;;  %v9591_v52 = vld [vmem:[#allocation7 + $0x8c8] sm:$0xff]  }
 0x136   :  { %8838 = vmatpush3.bf16.msra.mxu0 %v9562_v46  ;;  %v859_v46 = vld [vmem:[#allocation5 + $0x5] ss:$8 sm:$0xf] }
 0x137   :  { %v8576_v2 = vpop.f32.mrf.mxu0  ;;  %v8494_v62 = vpack.c.bf16 %v820_v49, %v820_v49 }
 0x138   :  { %v8577_v13 = vadd.f32 %v8576_v2, %v8575_v45  ;;  %v754_v45 = vmax.f32 %v747_v22, 0.0  ;;  %8858 = vmatpush3.bf16.msra.mxu1 %v9560_v29  ;;  %v9566_v2 = vld [vmem:[#allocation7 + $0x838] sm:$0xff]   ;;  %v9575_v22 = vld [vmem:[#allocation7 + $0x8e8] sm:$0xff]   ;;  %v9578_v29 = vld [vmem:[#allocation7 + $0x820] sm:$0xff]  }
 0x139   :  { %v8578_v12 = vpop.f32.mrf.mxu0  ;;  %8859 = vmatprep.subr.bf16.mxu1 %v9563_v54  ;;  %6989 = vmatmul.mubr.bf16.vlgmr.msra.gmra.mxu0 %v9935_v24  ;;  %853 = vst [vmem:[#allocation2 + $0x88] sm:$0xf] %v8494_v62  ;;  %v9586_v54 = vld [vmem:[#allocation7 + $0x810] sm:$0xff]  }
 0x13a   :  { %v10441_v50 = vadd.f32 %v8577_v13, %v10380_v60  ;;  %v798_v60 = vsub.f32 %v781_v27, %v10356_v20  ;;  %v9565_v20 = vld [vmem:[#allocation7 + $0x878] sm:$0xff]   ;;  %v811_v1 = vmul.f32 %v804_v58, %v754_v45  ;;  %v9570_v12 = vld [vmem:[#allocation7 + $0x830] sm:$0xff]   ;;  %v9577_v27 = vld [vmem:[#allocation7 + $0x860] sm:$0xff]  }
 0x13b   :  { %v8579_v32 = vpop.f32.mrf.mxu0  ;;  %8867 = vmatprep.subr.bf16.mxu0 %v9565_v20  ;;  %v9585_v45 = vld [vmem:[#allocation7 + $0x850] sm:$0xff]  }
 0x13c   :  { %v805_v0 = vmax.f32 %v798_v60, 0.0  ;;  %v10455_v39 = vmul.f32 %v811_v1, %v811_v1  ;;  %8860 = vmatpush3.bf16.msra.mxu1 %v9564_v63  ;;  %8868 = vmatpush3.bf16.msra.mxu0 %v9566_v2  ;;  %v855_v60 = vld [vmem:[#allocation3 + $0x5] ss:$8 sm:$0xf] }
 0x13d   :  { %8889 = vmatprep.subr.bf16.mxu1 %v9567_v4  ;;  %8869 = vmatprep.subr.bf16.mxu0 %v9569_v42  ;;  %v10458_v48 = vor.u32 %v856_v43, %v855_v60 }
 0x13e   :  { %v812_v38 = vmul.f32 %v805_v0, %v755_v26  ;;  %v860_v26 = vld [vmem:[#allocation5 + $0x5] ss:$8 sm:$0xf0] }
 0x13f   :  { %v8597_v6 = vpop.f32.mrf.mxu1  ;;  %7029 = vmatmul.mubr.bf16.vlgmr.msra.gmra.mxu1 %v9936_v8  ;;  %v10460_v28 = vor.u32 %v860_v26, %v859_v46  ;;  %v866_v20 = vrot.slane %v10458_v48, %v10090_v33  ;;  %v870_v0 = vrot.slane %v10458_v48, %v10093_v35  ;;  %v874_v19 = vrot.slane %v10458_v48, %v10096_v36  ;;  %v9596_v26 = vld [vmem:[#allocation7 + $0x880] sm:$0xff]  }
 0x140   :  { %v819_v9 = vmul.f32 %v812_v38, %v812_v38  ;;  %8890 = vmatpush3.bf16.msra.mxu1 %v9568_v7  ;;  %8870 = vmatpush3.bf16.msra.mxu0 %v9570_v12  ;;  %v878_v2 = vrot.slane %v10458_v48, %v10099_v37 }
 0x141   :  { %v8598_v11 = vpop.f32.mrf.mxu1  ;;  %8891 = vmatprep.subr.bf16.mxu1 %v9571_v61  ;;  %8871 = vmatprep.subr.bf16.mxu0 %v9573_v25  ;;  %v916_v24 = vrot.slane %v10460_v28, %v10090_v33  ;;  %v920_v4 = vrot.slane %v10460_v28, %v10093_v35  ;;  %v924_v5 = vrot.slane %v10460_v28, %v10096_v36  ;;  %v9592_v25 = vld [vmem:[#allocation7 + $0x888] sm:$0xff]  }
 0x142   :  { %v8599_v13 = vadd.f32 %v8598_v11, %v8597_v6  ;;  %v9937_v16 = vpack.c.bf16 %v819_v9, %v819_v9  ;;  %v9590_v6 = vld [vmem:[#allocation7 + $0x808] sm:$0xff]   ;;  %v898_v7 = vsub.f32 %v10409_v51, %v866_v20  ;;  %v899_v8 = vsub.f32 %v10415_v55, %v870_v0  ;;  %v10519_v0 = vld [vmem:[%s10832_s0 + $0x30] sm:$0xff] }
 0x143   :  { %v8600_v14 = vpop.f32.mrf.mxu1  ;;  %v900_v9 = vsub.f32 %v10421_v56, %v874_v19  ;;  %v948_v11 = vsub.f32 %v916_v24, %v10409_v51  ;;  %v949_v12 = vsub.f32 %v920_v4, %v10415_v55  ;;  %v928_v61 = vrot.slane %v10460_v28, %v10099_v37  ;;  %v9600_v19 = vld [vmem:[#allocation7 + $0x938] sm:$0xff]   ;;  %v9603_v4 = vld [vmem:[#allocation7 + $0x970] sm:$0xff]  }
 0x144   :  { %v6551_v15 = vadd.f32 %v8599_v13, %v10441_v50  ;;  %7068 = vmatprep.mubr.bf16.mxu0 %v9937_v16  ;;  %8892 = vmatpush3.bf16.msra.mxu1 %v9572_v21  ;;  %v9580_v50 = vld [vmem:[#allocation7 + $0x8a0] sm:$0xff]   ;;  %v901_v13 = vsub.f32 %v10427_v57, %v878_v2  ;;  %v905_v49 = vmax.f32 %v898_v7, 0.0  ;;  %v906_v21 = vmax.f32 %v899_v8, 0.0 }
 0x145   :  { %v8601_v32 = vpop.f32.mrf.mxu1  ;;  %8893 = vmatprep.subr.bf16.mxu1 %v9575_v22  ;;  %8872 = vmatpush3.bf16.msra.mxu0 %v9574_v17  ;;  %v882_v14 = vrot.slane %v10458_v48, %v10150_v44  ;;  %v9593_v16 = vld [vmem:[#allocation7 + $0x840] sm:$0xff]   ;;  %v955_v51 = vmax.f32 %v948_v11, 0.0  ;;  %v956_v17 = vmax.f32 %v949_v12, 0.0  ;;  %v950_v55 = vsub.f32 %v924_v5, %v10421_v56  ;;  %v10497_v22 = vld [vmem:[%s10832_s0 + $0x20] sm:$0xff]  ;;  %v9604_v12 = vld [vmem:[#allocation7 + $0x930] sm:$0xff]  }
 0x146   :  { %8873 = vmatprep.subr.bf16.mxu0 %v9577_v27  ;;  %v932_v32 = vrot.slane %v10460_v28, %v10150_v44  ;;  %v951_v62 = vsub.f32 %v928_v61, %v10427_v57  ;;  %v936_v27 = vrot.slane %v10460_v28, %v10153_v47  ;;  %v9594_v57 = vld [vmem:[#allocation7 + $0x800] sm:$0xff]  }
 0x147   :  { %v963_v56 = vmul.f32 %v956_v17, %v906_v21  ;;  %v957_v46 = vmax.f32 %v950_v55, 0.0  ;;  %v9602_v55 = vld [vmem:[#allocation7 + $0x9b8] sm:$0xff]  }
 0x148   :  { %8894 = vmatpush3.bf16.msra.mxu1 %v9576_v10  ;;  %v902_v10 = vsub.f32 %v10497_v22, %v882_v14 }
 0x149   :  { %8895 = vmatprep.subr.bf16.mxu1 %v9579_v30  ;;  %8874 = vmatpush3.bf16.msra.mxu0 %v9578_v29  ;;  %v9595_v29 = vld [vmem:[#allocation7 + $0x8c0] sm:$0xff]   ;;  %v962_v30 = vmul.f32 %v955_v51, %v905_v49  ;;  %v970_v43 = vmul.f32 %v963_v56, %v963_v56 }
 0x14a   :  { %8875 = vmatprep.subr.bf16.mxu0 %v9581_v31  ;;  %v890_v31 = vrot.slane %v10458_v48, %v10156_v53  ;;  %v9611_v56 = vld [vmem:[#allocation7 + $0x960] sm:$0xff]  }
 0x14b   :  { %v969_v60 = vmul.f32 %v962_v30, %v962_v30 }
 0x14c   :  { %8896 = vmatpush3.bf16.msra.mxu1 %v9580_v50  ;;  %v907_v50 = vmax.f32 %v900_v9, 0.0 }
 0x14d   :  { %8897 = vmatprep.subr.bf16.mxu1 %v9583_v40  ;;  %8876 = vmatpush3.bf16.msra.mxu0 %v9582_v34  ;;  %v908_v34 = vmax.f32 %v901_v13, 0.0  ;;  %v10507_v40 = vld [vmem:[%s10832_s0 + $0x28] sm:$0xff] }
 0x14e   :  { %8877 = vmatprep.subr.bf16.mxu0 %v9585_v45  ;;  %v940_v45 = vrot.slane %v10460_v28, %v10156_v53  ;;  %v964_v20 = vmul.f32 %v957_v46, %v907_v50  ;;  %v909_v28 = vmax.f32 %v902_v10, 0.0  ;;  %v9605_v50 = vld [vmem:[#allocation7 + $0x9f0] sm:$0xff]  }
 0x14f   :  { %v9619_v46 = vld [vmem:[#allocation7 + $0x950] sm:$0xff]  }
 0x150   :  { %8898 = vmatpush3.bf16.msra.mxu1 %v9584_v23  ;;  %v954_v24 = vsub.f32 %v940_v45, %v10519_v0  ;;  %v971_v5 = vmul.f32 %v964_v20, %v964_v20  ;;  %v9610_v45 = vld [vmem:[#allocation7 + $0x9a8] sm:$0xff]  }
 0x151   :  { %8899 = vmatprep.subr.bf16.mxu1 %v9587_v59  ;;  %8878 = vmatpush3.bf16.msra.mxu0 %v9586_v54  ;;  %v952_v54 = vsub.f32 %v932_v32, %v10497_v22  ;;  %v953_v59 = vsub.f32 %v936_v27, %v10507_v40 }
 0x152   :  { %8879 = vmatprep.subr.bf16.mxu0 %v9589_v3  ;;  %v961_v21 = vmax.f32 %v954_v24, 0.0  ;;  %v9624_v24 = vld [vmem:[#allocation7 + $0x908] sm:$0xff]  }
 0x154   :  { %8900 = vmatpush3.bf16.msra.mxu1 %v9588_v18  ;;  %v9601_v18 = vld [vmem:[#allocation7 + $0x9f8] sm:$0xff]  }
 0x155   :  { %v8619_v41 = vpop.f32.mrf.mxu0  ;;  %8901 = vmatprep.subr.bf16.mxu1 %v9591_v52  ;;  %8880 = vmatpush3.bf16.msra.mxu0 %v9590_v6  ;;  %v959_v6 = vmax.f32 %v952_v54, 0.0 }
 0x156   :  { %8881 = vmatprep.subr.bf16.mxu0 %v9593_v16 }
 0x157   :  { %v8620_v58 = vpop.f32.mrf.mxu0  ;;  %v966_v52 = vmul.f32 %v959_v6, %v909_v28  ;;  %v9622_v6 = vld [vmem:[#allocation7 + $0x990] sm:$0xff]  }
 0x158   :  { %v8621_v63 = vadd.f32 %v8620_v58, %v8619_v41  ;;  %v9597_v41 = vld [vmem:[#allocation7 + $0x978] sm:$0xff]   ;;  %8902 = vmatpush3.bf16.msra.mxu1 %v9592_v25  ;;  %v958_v58 = vmax.f32 %v951_v62, 0.0  ;;  %v9608_v62 = vld [vmem:[#allocation7 + $0x928] sm:$0xff]  }
 0x159   :  { %v8622_v1 = vpop.f32.mrf.mxu0  ;;  %8903 = vmatprep.subr.bf16.mxu1 %v9595_v29  ;;  %8882 = vmatpush3.bf16.msra.mxu0 %v9594_v57  ;;  %v973_v25 = vmul.f32 %v966_v52, %v966_v52  ;;  %v9612_v57 = vld [vmem:[#allocation7 + $0x920] sm:$0xff]  }
 0x15a   :  { %v10474_v38 = vadd.f32 %v8621_v63, %v6551_v15  ;;  %v886_v15 = vrot.slane %v10458_v48, %v10153_v47  ;;  %v9938_v48 = vpack.c.bf16 %v10455_v39, %v10455_v39  ;;  %v8495_v63 = vpack.c.bf16 %v970_v43, %v969_v60  ;;  %8911 = vmatprep.subr.bf16.mxu0 %v9597_v41  ;;  %v9616_v41 = vld [vmem:[#allocation7 + $0x918] sm:$0xff]  }
 0x15b   :  { %v8623_v42 = vpop.f32.mrf.mxu0  ;;  %v904_v1 = vsub.f32 %v10519_v0, %v890_v31  ;;  %v965_v39 = vmul.f32 %v958_v58, %v908_v34  ;;  %v9606_v31 = vld [vmem:[#allocation7 + $0x9b0] sm:$0xff]   ;;  %v9615_v34 = vld [vmem:[#allocation7 + $0x958] sm:$0xff]   ;;  %v9614_v58 = vld [vmem:[#allocation7 + $0x9a0] sm:$0xff]  }
 0x15c   :  { %v903_v23 = vsub.f32 %v10507_v40, %v886_v15  ;;  %1005 = vst [vmem:[#allocation2 + $0x8c] sm:$0xff] %v8495_v63  ;;  %8904 = vmatpush3.bf16.msra.mxu1 %v9596_v26  ;;  %v960_v42 = vmax.f32 %v953_v59, 0.0  ;;  %7069 = vmatmul.mubr.bf16.vlgmr.msra.gmra.mxu0 %v9938_v48  ;;  %v9607_v15 = vld [vmem:[#allocation7 + $0x968] sm:$0xff]   ;;  %v9613_v48 = vld [vmem:[#allocation7 + $0x9e0] sm:$0xff]  }
 0x15d   :  { %v972_v8 = vmul.f32 %v965_v39, %v965_v39  ;;  %8933 = vmatprep.subr.bf16.mxu1 %v9601_v18  ;;  %v911_v11 = vmax.f32 %v904_v1, 0.0  ;;  %8912 = vmatpush3.bf16.msra.mxu0 %v9600_v19  ;;  %v9620_v18 = vld [vmem:[#allocation7 + $0x910] sm:$0xff]   ;;  %v9623_v1 = vld [vmem:[#allocation7 + $0x948] sm:$0xff]  }
 0x15e   :  { %v910_v3 = vmax.f32 %v903_v23, 0.0  ;;  %8913 = vmatprep.subr.bf16.mxu0 %v9603_v4  ;;  %v9609_v23 = vld [vmem:[#allocation7 + $0x9e8] sm:$0xff]   ;;  %v9627_v4 = vld [vmem:[#allocation7 + $0x940] sm:$0xff]  }
 0x15f   :  { %v8641_v2 = vpop.f32.mrf.mxu1  ;;  %v8496_v61 = vpack.c.bf16 %v972_v8, %v971_v5  ;;  %v968_v17 = vmul.f32 %v961_v21, %v911_v11  ;;  %v9621_v5 = vld [vmem:[#allocation7 + $0x9d0] sm:$0xff]   ;;  %v9633_v8 = vld [vmem:[#allocation7 + $0xa78] sm:$0xff]   ;;  %v9632_v21 = vld [vmem:[#allocation7 + $0x980] sm:$0xff]  }
 0x160   :  { %v967_v49 = vmul.f32 %v960_v42, %v910_v3  ;;  %v9618_v3 = vld [vmem:[#allocation7 + $0x998] sm:$0xff]   ;;  %v9625_v42 = vld [vmem:[#allocation7 + $0x9c8] sm:$0xff]  }
 0x161   :  { %v8642_v7 = vpop.f32.mrf.mxu1  ;;  %1006 = vst [vmem:[#allocation2 + $0x94] sm:$0xff] %v8496_v61  ;;  %8914 = vmatpush3.bf16.msra.mxu0 %v9604_v12  ;;  %v975_v27 = vmul.f32 %v968_v17, %v968_v17  ;;  %v9636_v11 = vld [vmem:[#allocation7 + $0xa38] sm:$0xff]   ;;  %v9629_v61 = vld [vmem:[#allocation7 + $0x9c0] sm:$0xff]  }
 0x162   :  { %v8643_v9 = vadd.f32 %v8642_v7, %v8641_v2  ;;  %v974_v51 = vmul.f32 %v967_v49, %v967_v49  ;;  %8915 = vmatprep.subr.bf16.mxu0 %v9607_v15  ;;  %v9617_v2 = vld [vmem:[#allocation7 + $0x9d8] sm:$0xff]   ;;  %v9628_v7 = vld [vmem:[#allocation7 + $0x900] sm:$0xff]   ;;  %v9640_v15 = vld [vmem:[#allocation7 + $0xa30] sm:$0xff]  }
 0x163   :  { %v8644_v13 = vpop.f32.mrf.mxu1  ;;  %v1646_v32 = vld [vmem:[#allocation2 + $0x88] sm:$0xff]  ;;  %v9637_v17 = vld [vmem:[#allocation7 + $0xaf8] sm:$0xff]  }
 0x164   :  { %v6631_v14 = vadd.f32 %v8643_v9, %v10474_v38  ;;  %v8497_v10 = vpack.c.bf16 %v974_v51, %v973_v25  ;;  %v7879_v29 = vcombine.low %v1646_v32, %v1646_v32  ;;  %v7880_v30 = vcombine.high %v1646_v32, %v1646_v32  ;;  %v9626_v9 = vld [vmem:[#allocation7 + $0x988] sm:$0xff]   ;;  %v9639_v13 = vld [vmem:[#allocation7 + $0xa70] sm:$0xff]   ;;  %v9638_v32 = vld [vmem:[#allocation7 + $0xab8] sm:$0xff]  }
 0x165   :  { %v8645_v16 = vpop.f32.mrf.mxu1  ;;  %v8498_v38 = vpack.c.bf16 %v975_v27, %v975_v27  ;;  %8916 = vmatpush3.bf16.msra.mxu0 %v9608_v62  ;;  %v9643_v51 = vld [vmem:[#allocation7 + $0xa68] sm:$0xff]   ;;  %v9647_v27 = vld [vmem:[#allocation7 + $0xa60] sm:$0xff]  }
 0x166   :  { %1007 = vst [vmem:[#allocation2 + $0x9c] sm:$0xff] %v8497_v10  ;;  %7108 = vmatprep.mubr.bf16.mxu1 %v7880_v30  ;;  %8917 = vmatprep.subr.bf16.mxu0 %v9611_v56  ;;  %v9644_v10 = vld [vmem:[#allocation7 + $0xa28] sm:$0xff]   ;;  %v9642_v30 = vld [vmem:[#allocation7 + $0xab0] sm:$0xff]   ;;  %v9648_v56 = vld [vmem:[#allocation7 + $0xa20] sm:$0xff]  }
 0x167   :  { %7109 = vmatmul.mubr.bf16.vlgmr.msra.gmra.mxu1 %v7879_v29  ;;  %1008 = vst [vmem:[#allocation2 + $0xa4] sm:$0xf] %v8498_v38  ;;  %v9641_v29 = vld [vmem:[#allocation7 + $0xaf0] sm:$0xff]   ;;  %v9645_v38 = vld [vmem:[#allocation7 + $0xae8] sm:$0xff]  }
 0x168   :  { %8934 = vmatpush3.bf16.msra.mxu1 %v9602_v55  ;;  %v1647_v60 = vld [vmem:[#allocation2 + $0x90] sm:$0xff] }
 0x169   :  { %8935 = vmatprep.subr.bf16.mxu1 %v9605_v50  ;;  %8918 = vmatpush3.bf16.msra.mxu0 %v9612_v57  ;;  %v7882_v54 = vcombine.high %v1647_v60, %v1647_v60  ;;  %v7881_v52 = vcombine.low %v1647_v60, %v1647_v60  ;;  %v9651_v50 = vld [vmem:[#allocation7 + $0xa58] sm:$0xff]  }
 0x16a   :  { %8919 = vmatprep.subr.bf16.mxu0 %v9615_v34  ;;  %v9652_v57 = vld [vmem:[#allocation7 + $0xa18] sm:$0xff]  }
 0x16b   :  { %7148 = vmatprep.mubr.bf16.mxu0 %v7882_v54  ;;  %v9656_v54 = vld [vmem:[#allocation7 + $0xa10] sm:$0xff]  }
 0x16c   :  { %8936 = vmatpush3.bf16.msra.mxu1 %v9606_v31  ;;  %v9646_v31 = vld [vmem:[#allocation7 + $0xaa8] sm:$0xff]  }
 0x16d   :  { %8937 = vmatprep.subr.bf16.mxu1 %v9609_v23  ;;  %v10524_v59 = vld [vmem:[#allocation2 + $0x98] sm:$0xff]  ;;  %8920 = vmatpush3.bf16.msra.mxu0 %v9616_v41  ;;  %v9655_v23 = vld [vmem:[#allocation7 + $0xa50] sm:$0xff]  }
 0x16e   :  { %v7884_v20 = vcombine.high %v10524_v59, %v10524_v59  ;;  %8921 = vmatprep.subr.bf16.mxu0 %v9619_v46  ;;  %v7883_v62 = vcombine.low %v10524_v59, %v10524_v59  ;;  %v9649_v41 = vld [vmem:[#allocation7 + $0xae0] sm:$0xff]  }
 0x16f   :  { %v9650_v46 = vld [vmem:[#allocation7 + $0xaa0] sm:$0xff]  }
 0x170   :  { %8938 = vmatpush3.bf16.msra.mxu1 %v9610_v45  ;;  %7188 = vmatprep.mubr.bf16.mxu1 %v7884_v20  ;;  %v10530_v45 = vld [vmem:[#allocation2 + $0xa0] sm:$0xff] }
 0x171   :  { %8939 = vmatprep.subr.bf16.mxu1 %v9613_v48  ;;  %8922 = vmatpush3.bf16.msra.mxu0 %v9620_v18  ;;  %v7886_v60 = vcombine.high %v10530_v45, %v10530_v45  ;;  %v1010_v48 = vld [vmem:[#allocation3 + $0x6] ss:$8 sm:$0xf] }
 0x172   :  { %8923 = vmatprep.subr.bf16.mxu0 %v9623_v1  ;;  %v1011_v59 = vld [vmem:[#allocation3 + $0x6] ss:$8 sm:$0xf0] }
 0x173   :  { %v9659_v20 = vld [vmem:[#allocation7 + $0xa48] sm:$0xff]  }
 0x174   :  { %8940 = vmatpush3.bf16.msra.mxu1 %v9614_v58  ;;  %v9653_v58 = vld [vmem:[#allocation7 + $0xad8] sm:$0xff]  }
 0x175   :  { %v8663_v43 = vpop.f32.mrf.mxu0  ;;  %8941 = vmatprep.subr.bf16.mxu1 %v9617_v2  ;;  %8924 = vmatpush3.bf16.msra.mxu0 %v9624_v24  ;;  %v1015_v1 = vld [vmem:[#allocation5 + $0x6] ss:$8 sm:$0xf0] }
 0x176   :  { %8925 = vmatprep.subr.bf16.mxu0 %v9627_v4 }
 0x177   :  { %v8664_v26 = vpop.f32.mrf.mxu0 }
 0x178   :  { %v8665_v63 = vadd.f32 %v8664_v26, %v8663_v43  ;;  %8942 = vmatpush3.bf16.msra.mxu1 %v9618_v3  ;;  %v9654_v3 = vld [vmem:[#allocation7 + $0xa98] sm:$0xff]  }
 0x179   :  { %v8666_v28 = vpop.f32.mrf.mxu0  ;;  %8943 = vmatprep.subr.bf16.mxu1 %v9621_v5  ;;  %8926 = vmatpush3.bf16.msra.mxu0 %v9628_v7  ;;  %v9660_v7 = vld [vmem:[#allocation7 + $0xa08] sm:$0xff]  }
 0x17a   :  { %v6671_v19 = vadd.f32 %v8665_v63, %v6631_v14  ;;  %8955 = vmatprep.subr.bf16.mxu0 %v9633_v8  ;;  %v1014_v63 = vld [vmem:[#allocation5 + $0x6] ss:$8 sm:$0xf]  ;;  %v10534_v28 = vor.u32 %v1011_v59, %v1010_v48  ;;  %v7885_v59 = vcombine.low %v10530_v45, %v10530_v45 }
 0x17b   :  { %v8667_v39 = vpop.f32.mrf.mxu0  ;;  %v10538_v2 = vor.u32 %v1015_v1, %v1014_v63 }
 0x17c   :  { %8944 = vmatpush3.bf16.msra.mxu1 %v9622_v6  ;;  %7149 = vmatmul.mubr.bf16.vlgmr.msra.gmra.mxu0 %v7881_v52  ;;  %v1021_v24 = vrot.slane %v10534_v28, %v10090_v33  ;;  %v1025_v4 = vrot.slane %v10534_v28, %v10093_v35  ;;  %v1029_v5 = vrot.slane %v10534_v28, %v10096_v36 }
 0x17d   :  { %8945 = vmatprep.subr.bf16.mxu1 %v9625_v42  ;;  %8956 = vmatpush3.bf16.msra.mxu0 %v9636_v11  ;;  %v1033_v6 = vrot.slane %v10534_v28, %v10099_v37  ;;  %v1071_v8 = vrot.slane %v10538_v2, %v10090_v33  ;;  %v1075_v42 = vrot.slane %v10538_v2, %v10093_v35  ;;  %v9663_v11 = vld [vmem:[#allocation7 + $0xa40] sm:$0xff]  }
 0x17e   :  { %8957 = vmatprep.subr.bf16.mxu0 %v9639_v13  ;;  %7228 = vmatprep.mubr.bf16.mxu0 %v7886_v60  ;;  %v1083_v52 = vrot.slane %v10538_v2, %v10099_v37  ;;  %v1045_v60 = vrot.slane %v10534_v28, %v10156_v53 }
 0x17f   :  { %v8685_v12 = vpop.f32.mrf.mxu1 }
 0x180   :  { %8946 = vmatpush3.bf16.msra.mxu1 %v9626_v9  ;;  %v1079_v9 = vrot.slane %v10538_v2, %v10096_v36  ;;  %v1059_v45 = vsub.f32 %v10519_v0, %v1045_v60  ;;  %v9676_v60 = vld [vmem:[#allocation7 + $0xbb0] sm:$0xff]  }
 0x181   :  { %v8686_v49 = vpop.f32.mrf.mxu1  ;;  %8947 = vmatprep.subr.bf16.mxu1 %v9629_v61  ;;  %8958 = vmatpush3.bf16.msra.mxu0 %v9640_v15  ;;  %v10565_v61 = vld [vmem:[%s10832_s0 + $0x8] sm:$0xff] }
 0x182   :  { %v8687_v14 = vadd.f32 %v8686_v49, %v8685_v12  ;;  %8959 = vmatprep.subr.bf16.mxu0 %v9643_v51  ;;  %v10559_v12 = vld [vmem:[%s10832_s0] sm:$0xff]  ;;  %v1054_v49 = vsub.f32 %v10565_v61, %v1025_v4  ;;  %v9657_v15 = vld [vmem:[#allocation7 + $0xad0] sm:$0xff]   ;;  %v10579_v51 = vld [vmem:[%s10832_s0 + $0x18] sm:$0xff]  ;;  %v1095_v4 = vrot.slane %v10538_v2, %v10156_v53 }
 0x183   :  { %v8688_v25 = vpop.f32.mrf.mxu1  ;;  %v1053_v13 = vsub.f32 %v10559_v12, %v1021_v24 }
 0x184   :  { %v6711_v16 = vadd.f32 %v8687_v14, %v6671_v19  ;;  %8948 = vmatpush3.bf16.msra.mxu1 %v9632_v21  ;;  %v10571_v21 = vld [vmem:[%s10832_s0 + $0x10] sm:$0xff]  ;;  %v1103_v25 = vsub.f32 %v1071_v8, %v10559_v12 }
 0x185   :  { %v8689_v55 = vpop.f32.mrf.mxu1  ;;  %8977 = vmatprep.subr.bf16.mxu1 %v9637_v17  ;;  %8960 = vmatpush3.bf16.msra.mxu0 %v9644_v10  ;;  %v1055_v14 = vsub.f32 %v10571_v21, %v1029_v5  ;;  %v1056_v17 = vsub.f32 %v10579_v51, %v1033_v6  ;;  %v1060_v10 = vmax.f32 %v1053_v13, 0.0  ;;  %v9673_v5 = vld [vmem:[#allocation7 + $0xb70] sm:$0xff]  }
 0x186   :  { %8961 = vmatprep.subr.bf16.mxu0 %v9647_v27  ;;  %v1105_v55 = vsub.f32 %v1079_v9, %v10571_v21  ;;  %v1061_v27 = vmax.f32 %v1054_v49, 0.0  ;;  %v1109_v9 = vsub.f32 %v1095_v4, %v10519_v0  ;;  %v1066_v0 = vmax.f32 %v1059_v45, 0.0  ;;  %v9697_v4 = vld [vmem:[#allocation7 + $0xb40] sm:$0xff]   ;;  %v9701_v45 = vld [vmem:[#allocation7 + $0xc78] sm:$0xff]  }
 0x187   :  { %7189 = vmatmul.mubr.bf16.vlgmr.msra.gmra.mxu1 %v7883_v62  ;;  %v9664_v62 = vld [vmem:[#allocation7 + $0xa00] sm:$0xff]   ;;  %v1063_v48 = vmax.f32 %v1056_v17, 0.0 }
 0x188   :  { %8978 = vmatpush3.bf16.msra.mxu1 %v9638_v32  ;;  %v9658_v32 = vld [vmem:[#allocation7 + $0xa90] sm:$0xff]   ;;  %v1112_v63 = vmax.f32 %v1105_v55, 0.0  ;;  %v9677_v55 = vld [vmem:[#allocation7 + $0xb68] sm:$0xff]  }
 0x189   :  { %8979 = vmatprep.subr.bf16.mxu1 %v9641_v29  ;;  %8962 = vmatpush3.bf16.msra.mxu0 %v9648_v56  ;;  %v1106_v29 = vsub.f32 %v1083_v52, %v10579_v51  ;;  %v1110_v56 = vmax.f32 %v1103_v25, 0.0  ;;  %v9668_v52 = vld [vmem:[#allocation7 + $0xa80] sm:$0xff]  }
 0x18a   :  { %8963 = vmatprep.subr.bf16.mxu0 %v9651_v50 }
 0x18b   :  { %v1113_v24 = vmax.f32 %v1106_v29, 0.0  ;;  %v1116_v29 = vmax.f32 %v1109_v9, 0.0  ;;  %v9705_v9 = vld [vmem:[#allocation7 + $0xc70] sm:$0xff]  }
 0x18c   :  { %8980 = vmatpush3.bf16.msra.mxu1 %v9642_v30  ;;  %v1037_v30 = vrot.slane %v10534_v28, %v10150_v44 }
 0x18d   :  { %8981 = vmatprep.subr.bf16.mxu1 %v9645_v38  ;;  %8964 = vmatpush3.bf16.msra.mxu0 %v9652_v57  ;;  %v1041_v38 = vrot.slane %v10534_v28, %v10153_v47  ;;  %v9669_v57 = vld [vmem:[#allocation7 + $0xb78] sm:$0xff]  }
 0x18e   :  { %8965 = vmatprep.subr.bf16.mxu0 %v9655_v23  ;;  %v1057_v23 = vsub.f32 %v10497_v22, %v1037_v30  ;;  %v9670_v28 = vld [vmem:[#allocation7 + $0xb38] sm:$0xff]  }
 0x18f   :  { %v9672_v30 = vld [vmem:[#allocation7 + $0xbb8] sm:$0xff]  }
 0x190   :  { %8982 = vmatpush3.bf16.msra.mxu1 %v9646_v31  ;;  %v1087_v31 = vrot.slane %v10538_v2, %v10150_v44 }
 0x191   :  { %8983 = vmatprep.subr.bf16.mxu1 %v9649_v41  ;;  %8966 = vmatpush3.bf16.msra.mxu0 %v9656_v54  ;;  %v1091_v41 = vrot.slane %v10538_v2, %v10153_v47 }
 0x192   :  { %8967 = vmatprep.subr.bf16.mxu0 %v9659_v20 }
 0x193   :  { %v1108_v20 = vsub.f32 %v1091_v41, %v10507_v40 }
 0x194   :  { %8984 = vmatpush3.bf16.msra.mxu1 %v9650_v46  ;;  %v1117_v46 = vmul.f32 %v1110_v56, %v1060_v10 }
 0x195   :  { %v8707_v34 = vpop.f32.mrf.mxu0  ;;  %8985 = vmatprep.subr.bf16.mxu1 %v9653_v58  ;;  %8968 = vmatpush3.bf16.msra.mxu0 %v9660_v7  ;;  %v9662_v58 = vld [vmem:[#allocation7 + $0xa88] sm:$0xff]   ;;  %v1064_v7 = vmax.f32 %v1057_v23, 0.0  ;;  %v9675_v23 = vld [vmem:[#allocation7 + $0xbf0] sm:$0xff]  }
 0x196   :  { %8969 = vmatprep.subr.bf16.mxu0 %v9663_v11  ;;  %v1124_v1 = vmul.f32 %v1117_v46, %v1117_v46 }
 0x197   :  { %v8708_v43 = vpop.f32.mrf.mxu0 }
 0x198   :  { %v8709_v26 = vadd.f32 %v8708_v43, %v8707_v34  ;;  %8986 = vmatpush3.bf16.msra.mxu1 %v9654_v3  ;;  %v1062_v34 = vmax.f32 %v1055_v14, 0.0  ;;  %v9661_v43 = vld [vmem:[#allocation7 + $0xac8] sm:$0xff]   ;;  %v9674_v14 = vld [vmem:[#allocation7 + $0xb30] sm:$0xff]  }
 0x199   :  { %v8710_v18 = vpop.f32.mrf.mxu0  ;;  %8987 = vmatprep.subr.bf16.mxu1 %v9657_v15  ;;  %8970 = vmatpush3.bf16.msra.mxu0 %v9664_v62  ;;  %v9671_v62 = vld [vmem:[#allocation7 + $0xbf8] sm:$0xff]  }
 0x19a   :  { %v10536_v19 = vadd.f32 %v8709_v26, %v6711_v16  ;;  %v1104_v16 = vsub.f32 %v1075_v42, %v10565_v61  ;;  %v1058_v26 = vsub.f32 %v10507_v40, %v1041_v38  ;;  %v1107_v18 = vsub.f32 %v1087_v31, %v10497_v22  ;;  %8999 = vmatprep.subr.bf16.mxu0 %v9669_v57  ;;  %v9665_v22 = vld [vmem:[#allocation7 + $0xac0] sm:$0xff]   ;;  %v9678_v38 = vld [vmem:[#allocation7 + $0xb28] sm:$0xff]  }
 0x19b   :  { %v8711_v39 = vpop.f32.mrf.mxu0  ;;  %v1119_v6 = vmul.f32 %v1112_v63, %v1062_v34  ;;  %v1120_v40 = vmul.f32 %v1113_v24, %v1063_v48  ;;  %v9681_v34 = vld [vmem:[#allocation7 + $0xb60] sm:$0xff]   ;;  %v9685_v48 = vld [vmem:[#allocation7 + $0xb58] sm:$0xff]   ;;  %v9689_v63 = vld [vmem:[#allocation7 + $0xb50] sm:$0xff]  }
 0x19c   :  { %v1111_v50 = vmax.f32 %v1104_v16, 0.0  ;;  %8988 = vmatpush3.bf16.msra.mxu1 %v9658_v32  ;;  %v1065_v42 = vmax.f32 %v1058_v26, 0.0  ;;  %7229 = vmatmul.mubr.bf16.vlgmr.msra.gmra.mxu0 %v7885_v59  ;;  %v1114_v2 = vmax.f32 %v1107_v18, 0.0  ;;  %v1115_v16 = vmax.f32 %v1108_v20, 0.0  ;;  %v9679_v26 = vld [vmem:[#allocation7 + $0xbe8] sm:$0xff]   ;;  %v9686_v59 = vld [vmem:[#allocation7 + $0xb18] sm:$0xff]  }
 0x19d   :  { %8989 = vmatprep.subr.bf16.mxu1 %v9661_v43  ;;  %v10604_v13 = vmul.f32 %v1119_v6, %v1119_v6  ;;  %9000 = vmatpush3.bf16.msra.mxu0 %v9670_v28  ;;  %v1127_v25 = vmul.f32 %v1120_v40, %v1120_v40  ;;  %v9682_v43 = vld [vmem:[#allocation7 + $0xb20] sm:$0xff]   ;;  %v9687_v28 = vld [vmem:[#allocation7 + $0xbd8] sm:$0xff]   ;;  %v9694_v24 = vld [vmem:[#allocation7 + $0xb08] sm:$0xff]  }
 0x19e   :  { %v1118_v54 = vmul.f32 %v1111_v50, %v1061_v27  ;;  %9001 = vmatprep.subr.bf16.mxu0 %v9673_v5  ;;  %v1121_v32 = vmul.f32 %v1114_v2, %v1064_v7  ;;  %v1122_v27 = vmul.f32 %v1115_v16, %v1065_v42  ;;  %v9940_v50 = vpack.c.bf16 %v1124_v1, %v1124_v1  ;;  %v9683_v18 = vld [vmem:[#allocation7 + $0xbe0] sm:$0xff]   ;;  %v9690_v1 = vld [vmem:[#allocation7 + $0xb10] sm:$0xff]   ;;  %v9702_v42 = vld [vmem:[#allocation7 + $0xc38] sm:$0xff]  }
 0x19f   :  { %v8729_v3 = vpop.f32.mrf.mxu1  ;;  %v9941_v31 = vpack.c.bf16 %v1127_v25, %v1127_v25  ;;  %v9684_v20 = vld [vmem:[#allocation7 + $0xba0] sm:$0xff]   ;;  %v9691_v5 = vld [vmem:[#allocation7 + $0xbd0] sm:$0xff]   ;;  %v9943_v40 = vpack.c.bf16 %v10604_v13, %v10604_v13  ;;  %v9709_v25 = vld [vmem:[#allocation7 + $0xc68] sm:$0xff]  }
 0x1a0   :  { %v1125_v39 = vmul.f32 %v1118_v54, %v1118_v54  ;;  %8990 = vmatpush3.bf16.msra.mxu1 %v9662_v58  ;;  %v10609_v56 = vmul.f32 %v1121_v32, %v1121_v32  ;;  %v1129_v57 = vmul.f32 %v1122_v27, %v1122_v27  ;;  %v9680_v58 = vld [vmem:[#allocation7 + $0xba8] sm:$0xff]   ;;  %v9692_v6 = vld [vmem:[#allocation7 + $0xb90] sm:$0xff]   ;;  %v9698_v7 = vld [vmem:[#allocation7 + $0xb00] sm:$0xff]  }
 0x1a1   :  { %v8730_v8 = vpop.f32.mrf.mxu1  ;;  %8991 = vmatprep.subr.bf16.mxu1 %v9665_v22  ;;  %9002 = vmatpush3.bf16.msra.mxu0 %v9674_v14  ;;  %v9695_v22 = vld [vmem:[#allocation7 + $0xbc8] sm:$0xff]   ;;  %v9703_v13 = vld [vmem:[#allocation7 + $0xcf8] sm:$0xff]  }
 0x1a2   :  { %v8731_v11 = vadd.f32 %v8730_v8, %v8729_v3  ;;  %v9939_v49 = vpack.c.bf16 %v1125_v39, %v1125_v39  ;;  %9003 = vmatprep.subr.bf16.mxu0 %v9677_v55  ;;  %7308 = vmatprep.mubr.bf16.mxu0 %v9941_v31  ;;  %v9942_v46 = vpack.c.bf16 %v1129_v57, %v1129_v57  ;;  %v9693_v39 = vld [vmem:[#allocation7 + $0xb48] sm:$0xff]   ;;  %v9688_v3 = vld [vmem:[#allocation7 + $0xb98] sm:$0xff]   ;;  %v9707_v57 = vld [vmem:[#allocation7 + $0xcf0] sm:$0xff]  }
 0x1a3   :  { %v8732_v15 = vpop.f32.mrf.mxu1  ;;  %v9696_v8 = vld [vmem:[#allocation7 + $0xb88] sm:$0xff]   ;;  %v9704_v55 = vld [vmem:[#allocation7 + $0xcb8] sm:$0xff]  }
 0x1a4   :  { %v10607_v17 = vadd.f32 %v8731_v11, %v10536_v19  ;;  %7268 = vmatprep.mubr.bf16.mxu1 %v9939_v49  ;;  %v1123_v19 = vmul.f32 %v1116_v29, %v1066_v0  ;;  %8992 = vmatpush3.bf16.msra.mxu1 %v9668_v52  ;;  %v9699_v52 = vld [vmem:[#allocation7 + $0xbc0] sm:$0xff]   ;;  %v9706_v49 = vld [vmem:[#allocation7 + $0xc30] sm:$0xff]   ;;  %v9710_v29 = vld [vmem:[#allocation7 + $0xc28] sm:$0xff]  }
 0x1a5   :  { %v8733_v10 = vpop.f32.mrf.mxu1  ;;  %9021 = vmatprep.subr.bf16.mxu1 %v9671_v62  ;;  %9004 = vmatpush3.bf16.msra.mxu0 %v9678_v38  ;;  %v9700_v11 = vld [vmem:[#allocation7 + $0xb80] sm:$0xff]   ;;  %v9944_v62 = vpack.c.bf16 %v10609_v56, %v10609_v56  ;;  %v9711_v56 = vld [vmem:[#allocation7 + $0xce8] sm:$0xff]  }
 0x1a6   :  { %v1130_v41 = vmul.f32 %v1123_v19, %v1123_v19  ;;  %9005 = vmatprep.subr.bf16.mxu0 %v9681_v34  ;;  %v9708_v19 = vld [vmem:[#allocation7 + $0xcb0] sm:$0xff]  }
 0x1a7   :  { %7269 = vmatmul.mubr.bf16.vlgmr.msra.gmra.mxu1 %v9940_v50  ;;  %v9713_v50 = vld [vmem:[#allocation7 + $0xc60] sm:$0xff]  }
 0x1a8   :  { %v8502_v54 = vpack.c.bf16 %v1130_v41, %v1130_v41  ;;  %9022 = vmatpush3.bf16.msra.mxu1 %v9672_v30  ;;  %7348 = vmatprep.mubr.bf16.mxu1 %v9942_v46  ;;  %v9712_v41 = vld [vmem:[#allocation7 + $0xca8] sm:$0xff]   ;;  %v9715_v46 = vld [vmem:[#allocation7 + $0xce0] sm:$0xff]  }
 0x1a9   :  { %9023 = vmatprep.subr.bf16.mxu1 %v9675_v23  ;;  %9006 = vmatpush3.bf16.msra.mxu0 %v9682_v43  ;;  %v9714_v23 = vld [vmem:[#allocation7 + $0xc20] sm:$0xff]   ;;  %v9721_v43 = vld [vmem:[#allocation7 + $0xc50] sm:$0xff]  }
 0x1aa   :  { %1163 = vst [vmem:[#allocation2 + $0xc0] sm:$0xf] %v8502_v54  ;;  %9007 = vmatprep.subr.bf16.mxu0 %v9685_v48  ;;  %v9716_v54 = vld [vmem:[#allocation7 + $0xca0] sm:$0xff]   ;;  %v9722_v48 = vld [vmem:[#allocation7 + $0xc10] sm:$0xff]  }
 0x1ac   :  { %9024 = vmatpush3.bf16.msra.mxu1 %v9676_v60  ;;  %v9718_v60 = vld [vmem:[#allocation7 + $0xc18] sm:$0xff]  }
 0x1ad   :  { %9025 = vmatprep.subr.bf16.mxu1 %v9679_v26  ;;  %9008 = vmatpush3.bf16.msra.mxu0 %v9686_v59  ;;  %v1165_v26 = vld [vmem:[#allocation3 + $0x7] ss:$8 sm:$0xf] }
 0x1ae   :  { %9009 = vmatprep.subr.bf16.mxu0 %v9689_v63  ;;  %v1166_v59 = vld [vmem:[#allocation3 + $0x7] ss:$8 sm:$0xf0] }
 0x1af   :  { %v1169_v63 = vld [vmem:[#allocation5 + $0x7] ss:$8 sm:$0xf] }
 0x1b0   :  { %9026 = vmatpush3.bf16.msra.mxu1 %v9680_v58  ;;  %v9719_v58 = vld [vmem:[#allocation7 + $0xcd8] sm:$0xff]  }
 0x1b1   :  { %9027 = vmatprep.subr.bf16.mxu1 %v9683_v18  ;;  %9010 = vmatpush3.bf16.msra.mxu0 %v9690_v1  ;;  %v9725_v18 = vld [vmem:[#allocation7 + $0xc48] sm:$0xff]  }
 0x1b2   :  { %9011 = vmatprep.subr.bf16.mxu0 %v9693_v39  ;;  %v1170_v1 = vld [vmem:[#allocation5 + $0x7] ss:$8 sm:$0xf0] }
 0x1b3   :  { %v10620_v39 = vor.u32 %v1170_v1, %v1169_v63 }
 0x1b4   :  { %9028 = vmatpush3.bf16.msra.mxu1 %v9684_v20  ;;  %v10618_v20 = vor.u32 %v1166_v59, %v1165_v26 }
 0x1b5   :  { %9029 = vmatprep.subr.bf16.mxu1 %v9687_v28  ;;  %9012 = vmatpush3.bf16.msra.mxu0 %v9694_v24  ;;  %v9720_v28 = vld [vmem:[#allocation7 + $0xc98] sm:$0xff]   ;;  %v1250_v1 = vrot.slane %v10620_v39, %v10156_v53 }
 0x1b6   :  { %9013 = vmatprep.subr.bf16.mxu0 %v9697_v4  ;;  %v1180_v24 = vrot.slane %v10618_v20, %v10093_v35  ;;  %v1184_v4 = vrot.slane %v10618_v20, %v10096_v36 }
 0x1b8   :  { %9030 = vmatpush3.bf16.msra.mxu1 %v9688_v3  ;;  %v1176_v3 = vrot.slane %v10618_v20, %v10090_v33 }
 0x1b9   :  { %9031 = vmatprep.subr.bf16.mxu1 %v9691_v5  ;;  %9014 = vmatpush3.bf16.msra.mxu0 %v9698_v7  ;;  %v8751_v2 = vpop.f32.mrf.mxu0  ;;  %v1188_v5 = vrot.slane %v10618_v20, %v10099_v37  ;;  %v1226_v7 = vrot.slane %v10620_v39, %v10090_v33 }
 0x1ba   :  { %9043 = vmatprep.subr.bf16.mxu0 %v9701_v45  ;;  %v1230_v45 = vrot.slane %v10620_v39, %v10093_v35 }
 0x1bb   :  { %v8752_v14 = vpop.f32.mrf.mxu0 }
 0x1bc   :  { %9032 = vmatpush3.bf16.msra.mxu1 %v9692_v6  ;;  %7309 = vmatmul.mubr.bf16.vlgmr.msra.gmra.mxu0 %v9943_v40  ;;  %v8753_v16 = vadd.f32 %v8752_v14, %v8751_v2  ;;  %v9726_v6 = vld [vmem:[#allocation7 + $0xc08] sm:$0xff]   ;;  %v9729_v40 = vld [vmem:[#allocation7 + $0xc40] sm:$0xff]   ;;  %v1258_v2 = vsub.f32 %v1226_v7, %v10559_v12  ;;  %v1211_v14 = vsub.f32 %v10579_v51, %v1188_v5  ;;  %v10675_v7 = vld [vmem:[%s10832_s0 + $0x30] sm:$0xff] }
 0x1bd   :  { %9033 = vmatprep.subr.bf16.mxu1 %v9695_v22  ;;  %9044 = vmatpush3.bf16.msra.mxu0 %v9702_v42  ;;  %v8754_v32 = vpop.f32.mrf.mxu0  ;;  %v1234_v22 = vrot.slane %v10620_v39, %v10096_v36  ;;  %v1208_v42 = vsub.f32 %v10559_v12, %v1176_v3  ;;  %v9735_v12 = vld [vmem:[#allocation7 + $0xd78] sm:$0xff]  }
 0x1be   :  { %9045 = vmatprep.subr.bf16.mxu0 %v9705_v9  ;;  %v6831_v10 = vadd.f32 %v8753_v16, %v10607_v17  ;;  %v9717_v17 = vld [vmem:[#allocation7 + $0xc58] sm:$0xff]   ;;  %v1209_v9 = vsub.f32 %v10565_v61, %v1180_v24  ;;  %v9730_v16 = vld [vmem:[#allocation7 + $0xc00] sm:$0xff]  }
 0x1bf   :  { %v8773_v15 = vpop.f32.mrf.mxu1  ;;  %v8755_v30 = vpop.f32.mrf.mxu0 }
 0x1c0   :  { %9034 = vmatpush3.bf16.msra.mxu1 %v9696_v8  ;;  %v1238_v8 = vrot.slane %v10620_v39, %v10099_v37  ;;  %v1192_v30 = vrot.slane %v10618_v20, %v10150_v44 }
 0x1c1   :  { %9035 = vmatprep.subr.bf16.mxu1 %v9699_v52  ;;  %v8774_v0 = vpop.f32.mrf.mxu1  ;;  %9046 = vmatpush3.bf16.msra.mxu0 %v9706_v49  ;;  %v1210_v52 = vsub.f32 %v10571_v21, %v1184_v4  ;;  %v1259_v49 = vsub.f32 %v1230_v45, %v10565_v61 }
 0x1c2   :  { %v8775_v27 = vadd.f32 %v8774_v0, %v8773_v15  ;;  %9047 = vmatprep.subr.bf16.mxu0 %v9709_v25  ;;  %v1260_v15 = vsub.f32 %v1234_v22, %v10571_v21  ;;  %v9724_v25 = vld [vmem:[#allocation7 + $0xc90] sm:$0xff]   ;;  %v1261_v0 = vsub.f32 %v1238_v8, %v10579_v51  ;;  %v1196_v21 = vrot.slane %v10618_v20, %v10153_v47  ;;  %v9727_v51 = vld [vmem:[#allocation7 + $0xcc8] sm:$0xff]  }
 0x1c3   :  { %v8776_v38 = vpop.f32.mrf.mxu1  ;;  %v1217_v32 = vmax.f32 %v1210_v52, 0.0  ;;  %v1264_v22 = vsub.f32 %v1250_v1, %v10675_v7 }
 0x1c4   :  { %9036 = vmatpush3.bf16.msra.mxu1 %v9700_v11  ;;  %v10616_v31 = vadd.f32 %v8775_v27, %v6831_v10  ;;  %v9723_v11 = vld [vmem:[#allocation7 + $0xcd0] sm:$0xff]   ;;  %v1266_v10 = vmax.f32 %v1259_v49, 0.0  ;;  %v1218_v27 = vmax.f32 %v1211_v14, 0.0  ;;  %v1268_v61 = vmax.f32 %v1261_v0, 0.0 }
 0x1c5   :  { %9065 = vmatprep.subr.bf16.mxu1 %v9703_v13  ;;  %v8777_v34 = vpop.f32.mrf.mxu1  ;;  %9048 = vmatpush3.bf16.msra.mxu0 %v9710_v29  ;;  %v1215_v13 = vmax.f32 %v1208_v42, 0.0  ;;  %v1267_v29 = vmax.f32 %v1260_v15, 0.0  ;;  %v1271_v49 = vmax.f32 %v1264_v22, 0.0  ;;  %v9759_v22 = vld [vmem:[#allocation7 + $0xdd0] sm:$0xff]  }
 0x1c6   :  { %9049 = vmatprep.subr.bf16.mxu0 %v9713_v50  ;;  %v1242_v50 = vrot.slane %v10620_v39, %v10150_v44  ;;  %v1246_v34 = vrot.slane %v10620_v39, %v10153_v47  ;;  %v9734_v39 = vld [vmem:[#allocation7 + $0xc80] sm:$0xff]  }
 0x1c7   :  { %7349 = vmatmul.mubr.bf16.vlgmr.msra.gmra.mxu1 %v9944_v62  ;;  %v1265_v62 = vmax.f32 %v1258_v2, 0.0 }
 0x1c8   :  { %9066 = vmatpush3.bf16.msra.mxu1 %v9704_v55  ;;  %v1216_v55 = vmax.f32 %v1209_v9, 0.0 }
 0x1c9   :  { %9067 = vmatprep.subr.bf16.mxu1 %v9707_v57  ;;  %9050 = vmatpush3.bf16.msra.mxu0 %v9714_v23  ;;  %v1272_v38 = vmul.f32 %v1265_v62, %v1215_v13  ;;  %v1275_v23 = vmul.f32 %v1268_v61, %v1218_v27  ;;  %v9738_v61 = vld [vmem:[#allocation7 + $0xd38] sm:$0xff]  }
 0x1ca   :  { %9051 = vmatprep.subr.bf16.mxu0 %v9717_v17  ;;  %v1273_v57 = vmul.f32 %v1266_v10, %v1216_v55  ;;  %v10657_v17 = vld [vmem:[%s10832_s0 + $0x20] sm:$0xff] }
 0x1cb   :  { %v1282_v59 = vmul.f32 %v1275_v23, %v1275_v23  ;;  %v9743_v23 = vld [vmem:[#allocation7 + $0xdf0] sm:$0xff]  }
 0x1cc   :  { %9068 = vmatpush3.bf16.msra.mxu1 %v9708_v19  ;;  %v1274_v19 = vmul.f32 %v1267_v29, %v1217_v32 }
 0x1cd   :  { %9069 = vmatprep.subr.bf16.mxu1 %v9711_v56  ;;  %9052 = vmatpush3.bf16.msra.mxu0 %v9718_v60  ;;  %v1212_v56 = vsub.f32 %v10657_v17, %v1192_v30 }
 0x1ce   :  { %9053 = vmatprep.subr.bf16.mxu0 %v9721_v43  ;;  %v1262_v43 = vsub.f32 %v1242_v50, %v10657_v17 }
 0x1cf   :  { %v1219_v63 = vmax.f32 %v1212_v56, 0.0  ;;  %v9742_v56 = vld [vmem:[#allocation7 + $0xd30] sm:$0xff]  }
 0x1d0   :  { %9070 = vmatpush3.bf16.msra.mxu1 %v9712_v41  ;;  %v10663_v41 = vld [vmem:[%s10832_s0 + $0x28] sm:$0xff] }
 0x1d1   :  { %9071 = vmatprep.subr.bf16.mxu1 %v9715_v46  ;;  %9054 = vmatpush3.bf16.msra.mxu0 %v9722_v48  ;;  %v1213_v60 = vsub.f32 %v10663_v41, %v1196_v21  ;;  %v1279_v46 = vmul.f32 %v1272_v38, %v1272_v38  ;;  %v1281_v48 = vmul.f32 %v1274_v19, %v1274_v19  ;;  %v9740_v38 = vld [vmem:[#allocation7 + $0xdb8] sm:$0xff]  }
 0x1d2   :  { %9055 = vmatprep.subr.bf16.mxu0 %v9725_v18  ;;  %v1263_v26 = vsub.f32 %v1246_v34, %v10663_v41  ;;  %v1200_v18 = vrot.slane %v10618_v20, %v10156_v53  ;;  %v9741_v34 = vld [vmem:[#allocation7 + $0xd70] sm:$0xff]  }
 0x1d3   :  { %v1220_v24 = vmax.f32 %v1213_v60, 0.0  ;;  %v8504_v5 = vpack.c.bf16 %v1282_v59, %v1281_v48  ;;  %v9744_v60 = vld [vmem:[#allocation7 + $0xdb0] sm:$0xff]   ;;  %v9748_v48 = vld [vmem:[#allocation7 + $0xda8] sm:$0xff]   ;;  %v9751_v59 = vld [vmem:[#allocation7 + $0xde0] sm:$0xff]  }
 0x1d4   :  { %9072 = vmatpush3.bf16.msra.mxu1 %v9716_v54  ;;  %v1280_v54 = vmul.f32 %v1273_v57, %v1273_v57  ;;  %v1214_v45 = vsub.f32 %v10675_v7, %v1200_v18  ;;  %v1270_v20 = vmax.f32 %v1263_v26, 0.0  ;;  %v9749_v26 = vld [vmem:[#allocation7 + $0xd60] sm:$0xff]  }
 0x1d5   :  { %9073 = vmatprep.subr.bf16.mxu1 %v9719_v58  ;;  %9056 = vmatpush3.bf16.msra.mxu0 %v9726_v6  ;;  %v9728_v58 = vld [vmem:[#allocation7 + $0xc88] sm:$0xff]   ;;  %v1269_v6 = vmax.f32 %v1262_v43, 0.0  ;;  %1316 = vst [vmem:[#allocation2 + $0xcc] sm:$0xff] %v8504_v5  ;;  %v9752_v18 = vld [vmem:[#allocation7 + $0xda0] sm:$0xff]   ;;  %v9754_v5 = vld [vmem:[#allocation7 + $0xd18] sm:$0xff]  }
 0x1d6   :  { %9057 = vmatprep.subr.bf16.mxu0 %v9729_v40  ;;  %v8503_v3 = vpack.c.bf16 %v1280_v54, %v1279_v46  ;;  %v1221_v9 = vmax.f32 %v1214_v45, 0.0  ;;  %v1277_v2 = vmul.f32 %v1270_v20, %v1220_v24  ;;  %v9745_v43 = vld [vmem:[#allocation7 + $0xd68] sm:$0xff]   ;;  %v9755_v24 = vld [vmem:[#allocation7 + $0xdd8] sm:$0xff]   ;;  %v9757_v45 = vld [vmem:[#allocation7 + $0xd50] sm:$0xff]  }
 0x1d7   :  { %v1276_v42 = vmul.f32 %v1269_v6, %v1219_v63  ;;  %v9747_v46 = vld [vmem:[#allocation7 + $0xde8] sm:$0xff]   ;;  %v9756_v6 = vld [vmem:[#allocation7 + $0xd98] sm:$0xff]   ;;  %v9758_v20 = vld [vmem:[#allocation7 + $0xd10] sm:$0xff]  }
 0x1d8   :  { %9074 = vmatpush3.bf16.msra.mxu1 %v9720_v28  ;;  %v9731_v28 = vld [vmem:[#allocation7 + $0xcc0] sm:$0xff]   ;;  %1315 = vst [vmem:[#allocation2 + $0xc4] sm:$0xff] %v8503_v3  ;;  %v1284_v55 = vmul.f32 %v1277_v2, %v1277_v2  ;;  %v1278_v32 = vmul.f32 %v1271_v49, %v1221_v9  ;;  %v9746_v54 = vld [vmem:[#allocation7 + $0xd28] sm:$0xff]  }
 0x1d9   :  { %9075 = vmatprep.subr.bf16.mxu1 %v9723_v11  ;;  %9058 = vmatpush3.bf16.msra.mxu0 %v9730_v16  ;;  %v8795_v4 = vpop.f32.mrf.mxu0  ;;  %v9739_v11 = vld [vmem:[#allocation7 + $0xdf8] sm:$0xff]  }
 0x1da   :  { %9087 = vmatprep.subr.bf16.mxu0 %v9735_v12  ;;  %v1285_v29 = vmul.f32 %v1278_v32, %v1278_v32 }
 0x1db   :  { %v8796_v8 = vpop.f32.mrf.mxu0 }
 0x1dc   :  { %9076 = vmatpush3.bf16.msra.mxu1 %v9724_v25  ;;  %v8797_v52 = vadd.f32 %v8796_v8, %v8795_v4  ;;  %v1283_v25 = vmul.f32 %v1276_v42, %v1276_v42  ;;  %v9761_v8 = vld [vmem:[#allocation7 + $0xd48] sm:$0xff]  }
 0x1dd   :  { %9077 = vmatprep.subr.bf16.mxu1 %v9727_v51  ;;  %v8798_v14 = vpop.f32.mrf.mxu0  ;;  %v9762_v42 = vld [vmem:[#allocation7 + $0xd08] sm:$0xff]  }
 0x1de   :  { %v6911_v16 = vadd.f32 %v8797_v52, %v10616_v31  ;;  %v8505_v27 = vpack.c.bf16 %v1284_v55, %v1283_v25  ;;  %v8506_v31 = vpack.c.bf16 %v1285_v29, %v1285_v29  ;;  %v9764_v52 = vld [vmem:[#allocation7 + $0xd88] sm:$0xff]   ;;  %v9767_v14 = vld [vmem:[#allocation7 + $0xdc0] sm:$0xff]  }
 0x1df   :  { %v8817_v40 = vpop.f32.mrf.mxu1  ;;  %v8799_v0 = vpop.f32.mrf.mxu0  ;;  %v1653_v12 = vld [vmem:[#allocation2 + $0xc0] sm:$0xff]  ;;  %v1654_v51 = vld [vmem:[#allocation2 + $0xc8] sm:$0xff]  ;;  %v9766_v25 = vld [vmem:[#allocation7 + $0xd00] sm:$0xff]  }
 0x1e0   :  { %9078 = vmatpush3.bf16.msra.mxu1 %v9728_v58  ;;  %v7893_v21 = vcombine.low %v1653_v12, %v1653_v12  ;;  %v7894_v50 = vcombine.high %v1653_v12, %v1653_v12  ;;  %1317 = vst [vmem:[#allocation2 + $0xd4] sm:$0xff] %v8505_v27  ;;  %v7895_v57 = vcombine.low %v1654_v51, %v1654_v51  ;;  %1318 = vst [vmem:[#allocation2 + $0xdc] sm:$0xf] %v8506_v31  ;;  %v9750_v58 = vld [vmem:[#allocation7 + $0xd20] sm:$0xff]   ;;  %v9775_v12 = vld [vmem:[#allocation7 + $0xef8] sm:$0xff]  }
 0x1e1   :  { %9079 = vmatprep.subr.bf16.mxu1 %v9731_v28  ;;  %v8818_v15 = vpop.f32.mrf.mxu1  ;;  %v7896_v19 = vcombine.high %v1654_v51, %v1654_v51  ;;  %v9753_v28 = vld [vmem:[#allocation7 + $0xd58] sm:$0xff]   ;;  %v9770_v55 = vld [vmem:[#allocation7 + $0xd80] sm:$0xff]   ;;  %v9779_v31 = vld [vmem:[#allocation7 + $0xef0] sm:$0xff]  }
 0x1e2   :  { %v8819_v13 = vadd.f32 %v8818_v15, %v8817_v40  ;;  %7388 = vmatprep.mubr.bf16.mxu0 %v7894_v50  ;;  %v9763_v40 = vld [vmem:[#allocation7 + $0xdc8] sm:$0xff]  }
 0x1e3   :  { %v8820_v62 = vpop.f32.mrf.mxu1  ;;  %7389 = vmatmul.mubr.bf16.vlgmr.msra.gmra.mxu0 %v7893_v21  ;;  %7428 = vmatprep.mubr.bf16.mxu1 %v7896_v19  ;;  %v9774_v21 = vld [vmem:[#allocation7 + $0xe38] sm:$0xff]   ;;  %v9780_v19 = vld [vmem:[#allocation7 + $0xeb0] sm:$0xff]  }
 0x1e4   :  { %9080 = vmatpush3.bf16.msra.mxu1 %v9734_v39  ;;  %v10680_v10 = vadd.f32 %v8819_v13, %v6911_v16  ;;  %9088 = vmatpush3.bf16.msra.mxu0 %v9738_v61  ;;  %v9760_v39 = vld [vmem:[#allocation7 + $0xd90] sm:$0xff]   ;;  %v9771_v62 = vld [vmem:[#allocation7 + $0xe78] sm:$0xff]  }
 0x1e5   :  { %9109 = vmatprep.subr.bf16.mxu1 %v9739_v11  ;;  %v8821_v30 = vpop.f32.mrf.mxu1  ;;  %9089 = vmatprep.subr.bf16.mxu0 %v9741_v34  ;;  %v9765_v11 = vld [vmem:[#allocation7 + $0xd40] sm:$0xff]   ;;  %v9781_v34 = vld [vmem:[#allocation7 + $0xe68] sm:$0xff]  }
 0x1e7   :  { %7429 = vmatmul.mubr.bf16.vlgmr.msra.gmra.mxu1 %v7895_v57  ;;  %v10682_v63 = vld [vmem:[#allocation2 + $0xd0] sm:$0xff]  ;;  %v10686_v3 = vld [vmem:[#allocation2 + $0xd8] sm:$0xff]  ;;  %v9778_v57 = vld [vmem:[#allocation7 + $0xe30] sm:$0xff]  }
 0x1e8   :  { %9110 = vmatpush3.bf16.msra.mxu1 %v9740_v38  ;;  %9090 = vmatpush3.bf16.msra.mxu0 %v9742_v56  ;;  %v7898_v1 = vcombine.high %v10682_v63, %v10682_v63  ;;  %v7900_v4 = vcombine.high %v10686_v3, %v10686_v3  ;;  %v7897_v30 = vcombine.low %v10682_v63, %v10682_v63  ;;  %v9777_v38 = vld [vmem:[#allocation7 + $0xe70] sm:$0xff]   ;;  %v9782_v56 = vld [vmem:[#allocation7 + $0xe28] sm:$0xff]  }
 0x1e9   :  { %9111 = vmatprep.subr.bf16.mxu1 %v9743_v23  ;;  %9091 = vmatprep.subr.bf16.mxu0 %v9745_v43  ;;  %v7899_v51 = vcombine.low %v10686_v3, %v10686_v3  ;;  %v9783_v23 = vld [vmem:[#allocation7 + $0xee8] sm:$0xff]   ;;  %v9785_v43 = vld [vmem:[#allocation7 + $0xe60] sm:$0xff]  }
 0x1ea   :  { %7468 = vmatprep.mubr.bf16.mxu0 %v7898_v1  ;;  %7508 = vmatprep.mubr.bf16.mxu1 %v7900_v4  ;;  %v1324_v63 = vld [vmem:[#allocation5 + $0x38] ss:$8 sm:$0xf] }
 0x1ec   :  { %9112 = vmatpush3.bf16.msra.mxu1 %v9744_v60  ;;  %9092 = vmatpush3.bf16.msra.mxu0 %v9746_v54  ;;  %v9784_v60 = vld [vmem:[#allocation7 + $0xea8] sm:$0xff]   ;;  %v9787_v54 = vld [vmem:[#allocation7 + $0xee0] sm:$0xff]  }
 0x1ed   :  { %9113 = vmatprep.subr.bf16.mxu1 %v9747_v46  ;;  %9093 = vmatprep.subr.bf16.mxu0 %v9749_v26  ;;  %v9786_v46 = vld [vmem:[#allocation7 + $0xe20] sm:$0xff]   ;;  %v9789_v26 = vld [vmem:[#allocation7 + $0xe58] sm:$0xff]  }
 0x1f0   :  { %9114 = vmatpush3.bf16.msra.mxu1 %v9748_v48  ;;  %9094 = vmatpush3.bf16.msra.mxu0 %v9750_v58  ;;  %v9788_v48 = vld [vmem:[#allocation7 + $0xea0] sm:$0xff]  }
 0x1f1   :  { %9115 = vmatprep.subr.bf16.mxu1 %v9751_v59  ;;  %9095 = vmatprep.subr.bf16.mxu0 %v9753_v28  ;;  %v1320_v58 = vld [vmem:[#allocation3 + $0x38] ss:$8 sm:$0xf] }
 0x1f2   :  { %v1321_v59 = vld [vmem:[#allocation3 + $0x38] ss:$8 sm:$0xf0] }
 0x1f3   :  { %v10697_v1 = vor.u32 %v1321_v59, %v1320_v58  ;;  %v1325_v28 = vld [vmem:[#allocation5 + $0x38] ss:$8 sm:$0xf0] }
 0x1f4   :  { %9116 = vmatpush3.bf16.msra.mxu1 %v9752_v18  ;;  %9096 = vmatpush3.bf16.msra.mxu0 %v9754_v5  ;;  %v9791_v18 = vld [vmem:[#allocation7 + $0xed8] sm:$0xff]   ;;  %v10699_v3 = vor.u32 %v1325_v28, %v1324_v63 }
 0x1f5   :  { %9117 = vmatprep.subr.bf16.mxu1 %v9755_v24  ;;  %9097 = vmatprep.subr.bf16.mxu0 %v9757_v45  ;;  %v9790_v24 = vld [vmem:[#allocation7 + $0xe18] sm:$0xff]   ;;  %v1331_v4 = vrot.slane %v10697_v1, %v10090_v33  ;;  %v1335_v5 = vrot.slane %v10697_v1, %v10093_v35  ;;  %v1343_v45 = vrot.slane %v10697_v1, %v10099_v37 }
 0x1f8   :  { %9118 = vmatpush3.bf16.msra.mxu1 %v9756_v6  ;;  %9098 = vmatpush3.bf16.msra.mxu0 %v9758_v20  ;;  %v1339_v6 = vrot.slane %v10697_v1, %v10096_v36  ;;  %v1381_v20 = vrot.slane %v10699_v3, %v10090_v33 }
 0x1f9   :  { %9119 = vmatprep.subr.bf16.mxu1 %v9759_v22  ;;  %v8839_v9 = vpop.f32.mrf.mxu0  ;;  %9099 = vmatprep.subr.bf16.mxu0 %v9761_v8  ;;  %v9792_v22 = vld [vmem:[#allocation7 + $0xe98] sm:$0xff]   ;;  %v1389_v8 = vrot.slane %v10699_v3, %v10096_v36 }
 0x1fb   :  { %v8840_v2 = vpop.f32.mrf.mxu0 }
 0x1fc   :  { %9120 = vmatpush3.bf16.msra.mxu1 %v9760_v39  ;;  %v8841_v15 = vadd.f32 %v8840_v2, %v8839_v9  ;;  %9100 = vmatpush3.bf16.msra.mxu0 %v9762_v42  ;;  %v1385_v39 = vrot.slane %v10699_v3, %v10093_v35  ;;  %v9793_v42 = vld [vmem:[#allocation7 + $0xe50] sm:$0xff]   ;;  %v10720_v9 = vld [vmem:[%s10832_s0] sm:$0xff] }
 0x1fd   :  { %9121 = vmatprep.subr.bf16.mxu1 %v9763_v40  ;;  %v8842_v16 = vpop.f32.mrf.mxu0  ;;  %9101 = vmatprep.subr.bf16.mxu0 %v9765_v11  ;;  %v1393_v40 = vrot.slane %v10699_v3, %v10099_v37  ;;  %v10726_v11 = vld [vmem:[%s10832_s0 + $0x8] sm:$0xff] }
 0x1fe   :  { %v6991_v32 = vadd.f32 %v8841_v15, %v10680_v10  ;;  %v9776_v10 = vld [vmem:[#allocation7 + $0xeb8] sm:$0xff]   ;;  %v1364_v2 = vsub.f32 %v10726_v11, %v1335_v5  ;;  %v9794_v15 = vld [vmem:[#allocation7 + $0xe10] sm:$0xff]   ;;  %v1413_v16 = vsub.f32 %v1381_v20, %v10720_v9 }
 0x1ff   :  { %v8861_v49 = vpop.f32.mrf.mxu1  ;;  %v8843_v27 = vpop.f32.mrf.mxu0 }
 0x200   :  { %9122 = vmatpush3.bf16.msra.mxu1 %v9764_v52  ;;  %9102 = vmatpush3.bf16.msra.mxu0 %v9766_v25  ;;  %v1363_v52 = vsub.f32 %v10720_v9, %v1331_v4  ;;  %v9795_v25 = vld [vmem:[#allocation7 + $0xed0] sm:$0xff]  }
 0x201   :  { %v8862_v13 = vpop.f32.mrf.mxu1  ;;  %9123 = vmatprep.subr.bf16.mxu1 %v9767_v14  ;;  %9131 = vmatprep.subr.bf16.mxu0 %v9771_v62  ;;  %v9796_v62 = vld [vmem:[#allocation7 + $0xe90] sm:$0xff]  }
 0x202   :  { %v8863_v0 = vadd.f32 %v8862_v13, %v8861_v49  ;;  %v10732_v49 = vld [vmem:[%s10832_s0 + $0x10] sm:$0xff]  ;;  %v1414_v13 = vsub.f32 %v1385_v39, %v10726_v11  ;;  %v1370_v27 = vmax.f32 %v1363_v52, 0.0  ;;  %v1355_v39 = vrot.slane %v10697_v1, %v10156_v53  ;;  %v9802_v52 = vld [vmem:[#allocation7 + $0xe00] sm:$0xff]  }
 0x203   :  { %v8864_v29 = vpop.f32.mrf.mxu1  ;;  %7469 = vmatmul.mubr.bf16.vlgmr.msra.gmra.mxu0 %v7897_v30  ;;  %v1365_v14 = vsub.f32 %v10732_v49, %v1339_v6  ;;  %v9801_v6 = vld [vmem:[#allocation7 + $0xe40] sm:$0xff]  }
 0x204   :  { %v10691_v61 = vadd.f32 %v8863_v0, %v6991_v32  ;;  %9124 = vmatpush3.bf16.msra.mxu1 %v9770_v55  ;;  %9132 = vmatpush3.bf16.msra.mxu0 %v9774_v21  ;;  %v10740_v55 = vld [vmem:[%s10832_s0 + $0x18] sm:$0xff]  ;;  %v1415_v0 = vsub.f32 %v1389_v8, %v10732_v49  ;;  %v1371_v29 = vmax.f32 %v1364_v2, 0.0  ;;  %v1420_v21 = vmax.f32 %v1413_v16, 0.0 }
 0x205   :  { %v8865_v50 = vpop.f32.mrf.mxu1  ;;  %9153 = vmatprep.subr.bf16.mxu1 %v9775_v12  ;;  %9133 = vmatprep.subr.bf16.mxu0 %v9777_v38  ;;  %v1366_v32 = vsub.f32 %v10740_v55, %v1343_v45  ;;  %v1372_v12 = vmax.f32 %v1365_v14, 0.0  ;;  %v1416_v30 = vsub.f32 %v1393_v40, %v10740_v55  ;;  %v9797_v38 = vld [vmem:[#allocation7 + $0xe48] sm:$0xff]   ;;  %v1405_v8 = vrot.slane %v10699_v3, %v10156_v53  ;;  %v9804_v16 = vld [vmem:[#allocation7 + $0xe80] sm:$0xff]  }
 0x206   :  { %v1421_v50 = vmax.f32 %v1414_v13, 0.0 }
 0x207   :  { %7509 = vmatmul.mubr.bf16.vlgmr.msra.gmra.mxu1 %v7899_v51  ;;  %v1373_v51 = vmax.f32 %v1366_v32, 0.0 }
 0x208   :  { %9154 = vmatpush3.bf16.msra.mxu1 %v9776_v10  ;;  %9134 = vmatpush3.bf16.msra.mxu0 %v9778_v57  ;;  %v1422_v10 = vmax.f32 %v1415_v0, 0.0  ;;  %v1347_v57 = vrot.slane %v10697_v1, %v10150_v44 }
 0x209   :  { %9155 = vmatprep.subr.bf16.mxu1 %v9779_v31  ;;  %9135 = vmatprep.subr.bf16.mxu0 %v9781_v34  ;;  %v1423_v31 = vmax.f32 %v1416_v30, 0.0  ;;  %v1397_v34 = vrot.slane %v10699_v3, %v10150_v44 }
 0x20a   :  { %v1367_v58 = vsub.f32 %v10657_v17, %v1347_v57  ;;  %v9809_v57 = vld [vmem:[#allocation7 + $0xf70] sm:$0xff]  }
 0x20b   :  { %v1417_v63 = vsub.f32 %v1397_v34, %v10657_v17  ;;  %v9803_v17 = vld [vmem:[#allocation7 + $0xec0] sm:$0xff]   ;;  %v9811_v34 = vld [vmem:[#allocation7 + $0xff0] sm:$0xff]  }
 0x20c   :  { %9156 = vmatpush3.bf16.msra.mxu1 %v9780_v19  ;;  %9136 = vmatpush3.bf16.msra.mxu0 %v9782_v56  ;;  %v1351_v19 = vrot.slane %v10697_v1, %v10153_v47  ;;  %v1427_v56 = vmul.f32 %v1420_v21, %v1370_v27  ;;  %v1374_v20 = vmax.f32 %v1367_v58, 0.0  ;;  %v9813_v58 = vld [vmem:[#allocation7 + $0xf68] sm:$0xff]  }
 0x20d   :  { %9157 = vmatprep.subr.bf16.mxu1 %v9783_v23  ;;  %9137 = vmatprep.subr.bf16.mxu0 %v9785_v43  ;;  %v9799_v23 = vld [vmem:[#allocation7 + $0xec8] sm:$0xff]   ;;  %v1429_v43 = vmul.f32 %v1422_v10, %v1372_v12  ;;  %v1424_v14 = vmax.f32 %v1417_v63, 0.0  ;;  %v9808_v10 = vld [vmem:[#allocation7 + $0xfb8] sm:$0xff]  }
 0x20e   :  { %v1368_v59 = vsub.f32 %v10663_v41, %v1351_v19  ;;  %v1434_v28 = vmul.f32 %v1427_v56, %v1427_v56 }
 0x20f   :  { %v1436_v4 = vmul.f32 %v1429_v43, %v1429_v43  ;;  %v9812_v43 = vld [vmem:[#allocation7 + $0xfb0] sm:$0xff]  }
 0x210   :  { %9158 = vmatpush3.bf16.msra.mxu1 %v9784_v60  ;;  %9138 = vmatpush3.bf16.msra.mxu0 %v9786_v46  ;;  %v1428_v60 = vmul.f32 %v1421_v50, %v1371_v29  ;;  %v1401_v46 = vrot.slane %v10699_v3, %v10153_v47  ;;  %v9805_v3 = vld [vmem:[#allocation7 + $0xf78] sm:$0xff]   ;;  %v9947_v21 = vpack.c.bf16 %v1434_v28, %v1434_v28  ;;  %v9816_v28 = vld [vmem:[#allocation7 + $0xfa8] sm:$0xff]  }
 0x211   :  { %9159 = vmatprep.subr.bf16.mxu1 %v9787_v54  ;;  %9139 = vmatprep.subr.bf16.mxu0 %v9789_v26  ;;  %v9798_v54 = vld [vmem:[#allocation7 + $0xe08] sm:$0xff]   ;;  %v1430_v26 = vmul.f32 %v1423_v31, %v1373_v51  ;;  %v9807_v29 = vld [vmem:[#allocation7 + $0xff8] sm:$0xff]  }
 0x212   :  { %v1418_v5 = vsub.f32 %v1401_v46, %v10663_v41  ;;  %v1369_v41 = vsub.f32 %v10675_v7, %v1355_v39  ;;  %v9824_v39 = vld [vmem:[#allocation7 + $0xf98] sm:$0xff]  }
 0x213   :  { %v1437_v45 = vmul.f32 %v1430_v26, %v1430_v26 }
 0x214   :  { %9160 = vmatpush3.bf16.msra.mxu1 %v9788_v48  ;;  %9140 = vmatpush3.bf16.msra.mxu0 %v9790_v24  ;;  %v1435_v24 = vmul.f32 %v1428_v60, %v1428_v60  ;;  %v1425_v1 = vmax.f32 %v1418_v5, 0.0  ;;  %v1376_v27 = vmax.f32 %v1369_v41, 0.0  ;;  %v9810_v60 = vld [vmem:[#allocation7 + $0xf30] sm:$0xff]   ;;  %v9818_v5 = vld [vmem:[#allocation7 + $0xf20] sm:$0xff]  }
 0x215   :  { %9161 = vmatprep.subr.bf16.mxu1 %v9791_v18  ;;  %9141 = vmatprep.subr.bf16.mxu0 %v9793_v42  ;;  %v9800_v18 = vld [vmem:[#allocation7 + $0xe88] sm:$0xff]   ;;  %v1375_v42 = vmax.f32 %v1368_v59, 0.0  ;;  %v9946_v32 = vpack.c.bf16 %v1437_v45, %v1437_v45  ;;  %v9821_v45 = vld [vmem:[#allocation7 + $0xf58] sm:$0xff]   ;;  %v9826_v41 = vld [vmem:[#allocation7 + $0xf10] sm:$0xff]  }
 0x216   :  { %v9815_v59 = vld [vmem:[#allocation7 + $0xfe8] sm:$0xff]  }
 0x217   :  { %v1432_v12 = vmul.f32 %v1425_v1, %v1375_v42  ;;  %7588 = vmatprep.mubr.bf16.mxu1 %v9946_v32  ;;  %v1479_v42 = vld [vmem:[#allocation5 + $0x39] ss:$8 sm:$0xf] }
 0x218   :  { %9162 = vmatpush3.bf16.msra.mxu1 %v9792_v22  ;;  %9142 = vmatpush3.bf16.msra.mxu0 %v9794_v15  ;;  %v1419_v15 = vsub.f32 %v1405_v8, %v10675_v7  ;;  %v9806_v7 = vld [vmem:[#allocation7 + $0xf38] sm:$0xff]   ;;  %v9825_v8 = vld [vmem:[#allocation7 + $0xf50] sm:$0xff]   ;;  %v9829_v32 = vld [vmem:[#allocation7 + $0xf48] sm:$0xff]  }
 0x219   :  { %9163 = vmatprep.subr.bf16.mxu1 %v9795_v25  ;;  %9143 = vmatprep.subr.bf16.mxu0 %v9797_v38  ;;  %v9945_v25 = vpack.c.bf16 %v1435_v24, %v1435_v24  ;;  %v1439_v38 = vmul.f32 %v1432_v12, %v1432_v12  ;;  %v9817_v24 = vld [vmem:[#allocation7 + $0xf60] sm:$0xff]   ;;  %v9831_v12 = vld [vmem:[#allocation7 + $0xfc8] sm:$0xff]  }
 0x21a   :  { %v1426_v30 = vmax.f32 %v1419_v15, 0.0 }
 0x21b   :  { %7548 = vmatprep.mubr.bf16.mxu0 %v9945_v25  ;;  %v9828_v25 = vld [vmem:[#allocation7 + $0xf90] sm:$0xff]  }
 0x21c   :  { %v8883_v48 = vpop.f32.mrf.mxu0  ;;  %9164 = vmatpush3.bf16.msra.mxu1 %v9796_v62  ;;  %9144 = vmatpush3.bf16.msra.mxu0 %v9798_v54  ;;  %v1431_v62 = vmul.f32 %v1424_v14, %v1374_v20  ;;  %v1433_v31 = vmul.f32 %v1426_v30, %v1376_v27  ;;  %v9949_v54 = vpack.c.bf16 %v1439_v38, %v1439_v38  ;;  %v9823_v20 = vld [vmem:[#allocation7 + $0xfd8] sm:$0xff]  }
 0x21d   :  { %9165 = vmatprep.subr.bf16.mxu1 %v9799_v23  ;;  %9145 = vmatprep.subr.bf16.mxu0 %v9801_v6  ;;  %v9820_v6 = vld [vmem:[#allocation7 + $0xfa0] sm:$0xff]  }
 0x21e   :  { %v8884_v22 = vpop.f32.mrf.mxu0  ;;  %v10764_v50 = vmul.f32 %v1431_v62, %v1431_v62  ;;  %v1440_v23 = vmul.f32 %v1433_v31, %v1433_v31  ;;  %v1480_v14 = vld [vmem:[#allocation5 + $0x39] ss:$8 sm:$0xf0] }
 0x21f   :  { %v8885_v40 = vadd.f32 %v8884_v22, %v8883_v48  ;;  %v9822_v22 = vld [vmem:[#allocation7 + $0xf18] sm:$0xff]   ;;  %v10770_v15 = vor.u32 %v1480_v14, %v1479_v42 }
 0x220   :  { %v8886_v2 = vpop.f32.mrf.mxu0  ;;  %9166 = vmatpush3.bf16.msra.mxu1 %v9800_v18  ;;  %9146 = vmatpush3.bf16.msra.mxu0 %v9802_v52  ;;  %v8510_v48 = vpack.c.bf16 %v1440_v23, %v1440_v23  ;;  %v9814_v18 = vld [vmem:[#allocation7 + $0xf28] sm:$0xff]   ;;  %v9827_v52 = vld [vmem:[#allocation7 + $0xfd0] sm:$0xff]  }
 0x221   :  { %v7071_v13 = vadd.f32 %v8885_v40, %v10691_v61  ;;  %9167 = vmatprep.subr.bf16.mxu1 %v9803_v17  ;;  %v9948_v61 = vpack.c.bf16 %v1436_v4, %v1436_v4  ;;  %9175 = vmatprep.subr.bf16.mxu0 %v9805_v3  ;;  %v9819_v4 = vld [vmem:[#allocation7 + $0xfe0] sm:$0xff]   ;;  %v1540_v62 = vrot.slane %v10770_v15, %v10093_v35 }
 0x222   :  { %v8887_v0 = vpop.f32.mrf.mxu0  ;;  %1473 = vst [vmem:[#allocation2 + $0xf8] sm:$0xf] %v8510_v48  ;;  %v1475_v17 = vld [vmem:[#allocation3 + $0x39] ss:$8 sm:$0xf]  ;;  %v1544_v27 = vrot.slane %v10770_v15, %v10096_v36 }
 0x223   :  { %7549 = vmatmul.mubr.bf16.vlgmr.msra.gmra.mxu0 %v9947_v21  ;;  %v1476_v40 = vld [vmem:[#allocation3 + $0x39] ss:$8 sm:$0xf0]  ;;  %v1536_v0 = vrot.slane %v10770_v15, %v10090_v33 }
 0x224   :  { %9168 = vmatpush3.bf16.msra.mxu1 %v9804_v16  ;;  %9176 = vmatpush3.bf16.msra.mxu0 %v9806_v7  ;;  %v10768_v2 = vor.u32 %v1476_v40, %v1475_v17  ;;  %v1560_v17 = vrot.slane %v10770_v15, %v10156_v53  ;;  %v9950_v40 = vpack.c.bf16 %v10764_v50, %v10764_v50  ;;  %v9843_v50 = vld [vmem:[#allocation7 + $0x1070] sm:$0xff]  }
 0x225   :  { %9197 = vmatprep.subr.bf16.mxu1 %v9807_v29  ;;  %9177 = vmatprep.subr.bf16.mxu0 %v9809_v57  ;;  %v9830_v29 = vld [vmem:[#allocation7 + $0xf08] sm:$0xff]  }
 0x226   :  { %7628 = vmatprep.mubr.bf16.mxu0 %v9949_v54  ;;  %v1486_v16 = vrot.slane %v10768_v2, %v10090_v33  ;;  %v1494_v1 = vrot.slane %v10768_v2, %v10096_v36  ;;  %v1498_v3 = vrot.slane %v10768_v2, %v10099_v37  ;;  %v1569_v33 = vsub.f32 %v1540_v62, %v10726_v11  ;;  %v9918_v54 = vld [vmem:[%s10832_s0 + $0x20] sm:$0xff] }
 0x227   :  { %v8905_v51 = vpop.f32.mrf.mxu1  ;;  %7589 = vmatmul.mubr.bf16.vlgmr.msra.gmra.mxu1 %v9948_v61  ;;  %v9832_v61 = vld [vmem:[#allocation7 + $0xf88] sm:$0xff]   ;;  %v1548_v36 = vrot.slane %v10770_v15, %v10099_v37  ;;  %v1502_v57 = vrot.slane %v10768_v2, %v10150_v44  ;;  %v1552_v37 = vrot.slane %v10770_v15, %v10150_v44  ;;  %v9919_v44 = vld [vmem:[%s10832_s0 + $0x28] sm:$0xff] }
 0x228   :  { %9198 = vmatpush3.bf16.msra.mxu1 %v9808_v10  ;;  %9178 = vmatpush3.bf16.msra.mxu0 %v9810_v60  ;;  %v1518_v30 = vsub.f32 %v10720_v9, %v1486_v16  ;;  %v1520_v7 = vsub.f32 %v10732_v49, %v1494_v1  ;;  %v1568_v10 = vsub.f32 %v1536_v0, %v10720_v9  ;;  %v9835_v9 = vld [vmem:[#allocation7 + $0xfc0] sm:$0xff]  }
 0x229   :  { %v8906_v19 = vpop.f32.mrf.mxu1  ;;  %9199 = vmatprep.subr.bf16.mxu1 %v9811_v34  ;;  %9179 = vmatprep.subr.bf16.mxu0 %v9813_v58  ;;  %v9833_v34 = vld [vmem:[#allocation7 + $0xf40] sm:$0xff]   ;;  %v1570_v60 = vsub.f32 %v1544_v27, %v10732_v49  ;;  %v1522_v48 = vsub.f32 %v9918_v54, %v1502_v57  ;;  %v1556_v58 = vrot.slane %v10770_v15, %v10153_v47 }
 0x22a   :  { %v8907_v56 = vadd.f32 %v8906_v19, %v8905_v51  ;;  %v1525_v38 = vmax.f32 %v1518_v30, 0.0  ;;  %v1506_v19 = vrot.slane %v10768_v2, %v10153_v47  ;;  %v1575_v23 = vmax.f32 %v1568_v10, 0.0  ;;  %v9837_v47 = vld [vmem:[#allocation7 + $0x1078] sm:$0xff]  }
 0x22b   :  { %v8908_v46 = vpop.f32.mrf.mxu1  ;;  %v1527_v49 = vmax.f32 %v1520_v7, 0.0  ;;  %v9844_v7 = vld [vmem:[#allocation7 + $0x1030] sm:$0xff]  }
 0x22c   :  { %v10766_v26 = vadd.f32 %v8907_v56, %v7071_v13  ;;  %9200 = vmatpush3.bf16.msra.mxu1 %v9812_v43  ;;  %9180 = vmatpush3.bf16.msra.mxu0 %v9814_v18  ;;  %v1490_v13 = vrot.slane %v10768_v2, %v10093_v35  ;;  %v1521_v35 = vsub.f32 %v10740_v55, %v1498_v3 }
 0x22d   :  { %v8909_v63 = vpop.f32.mrf.mxu1  ;;  %9201 = vmatprep.subr.bf16.mxu1 %v9815_v59  ;;  %9181 = vmatprep.subr.bf16.mxu0 %v9817_v24  ;;  %v1571_v46 = vsub.f32 %v1548_v36, %v10740_v55  ;;  %v9834_v59 = vld [vmem:[#allocation7 + $0xf00] sm:$0xff]   ;;  %v1523_v24 = vsub.f32 %v9919_v44, %v1506_v19  ;;  %v9847_v36 = vld [vmem:[#allocation7 + $0x1068] sm:$0xff]  }
 0x22e   :  { %v1519_v21 = vsub.f32 %v10726_v11, %v1490_v13  ;;  %v1576_v11 = vmax.f32 %v1569_v33, 0.0  ;;  %v1582_v63 = vmul.f32 %v1575_v23, %v1525_v38  ;;  %v9836_v55 = vld [vmem:[#allocation7 + $0xf80] sm:$0xff]   ;;  %v9840_v13 = vld [vmem:[#allocation7 + $0x1038] sm:$0xff]   ;;  %v9848_v23 = vld [vmem:[#allocation7 + $0x1028] sm:$0xff]  }
 0x22f   :  { %v1578_v42 = vmax.f32 %v1571_v46, 0.0  ;;  %v9845_v46 = vld [vmem:[#allocation7 + $0x10f0] sm:$0xff]  }
 0x230   :  { %9202 = vmatpush3.bf16.msra.mxu1 %v9816_v28  ;;  %9182 = vmatpush3.bf16.msra.mxu0 %v9818_v5  ;;  %v1526_v31 = vmax.f32 %v1519_v21, 0.0  ;;  %v1528_v5 = vmax.f32 %v1521_v35, 0.0 }
 0x231   :  { %9203 = vmatprep.subr.bf16.mxu1 %v9819_v4  ;;  %9183 = vmatprep.subr.bf16.mxu0 %v9821_v45  ;;  %v1510_v45 = vrot.slane %v10768_v2, %v10156_v53  ;;  %v1529_v2 = vmax.f32 %v1522_v48, 0.0  ;;  %v1530_v53 = vmax.f32 %v1523_v24, 0.0  ;;  %v9846_v48 = vld [vmem:[#allocation7 + $0x10b0] sm:$0xff]  }
 0x232   :  { %v1583_v18 = vmul.f32 %v1576_v11, %v1526_v31  ;;  %v1585_v3 = vmul.f32 %v1578_v42, %v1528_v5 }
 0x234   :  { %9204 = vmatpush3.bf16.msra.mxu1 %v9820_v6  ;;  %9184 = vmatpush3.bf16.msra.mxu0 %v9822_v22  ;;  %v1572_v6 = vsub.f32 %v1552_v37, %v9918_v54  ;;  %v1589_v22 = vmul.f32 %v1582_v63, %v1582_v63  ;;  %v1592_v27 = vmul.f32 %v1585_v3, %v1585_v3  ;;  %v9849_v63 = vld [vmem:[#allocation7 + $0x10e8] sm:$0xff]  }
 0x235   :  { %9205 = vmatprep.subr.bf16.mxu1 %v9823_v20  ;;  %9185 = vmatprep.subr.bf16.mxu0 %v9825_v8  ;;  %v1590_v20 = vmul.f32 %v1583_v18, %v1583_v18  ;;  %v1577_v8 = vmax.f32 %v1570_v60, 0.0  ;;  %v9850_v18 = vld [vmem:[#allocation7 + $0x10a8] sm:$0xff]  }
 0x236   :  { %v1579_v0 = vmax.f32 %v1572_v6, 0.0  ;;  %v9860_v6 = vld [vmem:[#allocation7 + $0x1010] sm:$0xff]  }
 0x237   :  { %v8511_v14 = vpack.c.bf16 %v1590_v20, %v1589_v22  ;;  %v9857_v22 = vld [vmem:[#allocation7 + $0x10d8] sm:$0xff]  }
 0x238   :  { %9206 = vmatpush3.bf16.msra.mxu1 %v9824_v39  ;;  %9186 = vmatpush3.bf16.msra.mxu0 %v9826_v41  ;;  %v1584_v41 = vmul.f32 %v1577_v8, %v1527_v49  ;;  %v1586_v30 = vmul.f32 %v1579_v0, %v1529_v2  ;;  %v9858_v20 = vld [vmem:[#allocation7 + $0x1098] sm:$0xff]   ;;  %v9864_v8 = vld [vmem:[#allocation7 + $0x1008] sm:$0xff]  }
 0x239   :  { %9207 = vmatprep.subr.bf16.mxu1 %v9827_v52  ;;  %9187 = vmatprep.subr.bf16.mxu0 %v9829_v32  ;;  %v1573_v52 = vsub.f32 %v1556_v58, %v9919_v44  ;;  %1625 = vst [vmem:[#allocation2 + $0xfc] sm:$0xff] %v8511_v14  ;;  %v9852_v58 = vld [vmem:[#allocation7 + $0x1020] sm:$0xff]   ;;  %v9859_v44 = vld [vmem:[#allocation7 + $0x1050] sm:$0xff]  }
 0x23a   :  { %v1591_v32 = vmul.f32 %v1584_v41, %v1584_v41  ;;  %v1593_v38 = vmul.f32 %v1586_v30, %v1586_v30  ;;  %v9868_v41 = vld [vmem:[#allocation7 + $0x1000] sm:$0xff]  }
 0x23c   :  { %v8927_v51 = vpop.f32.mrf.mxu0  ;;  %9208 = vmatpush3.bf16.msra.mxu1 %v9828_v25  ;;  %9188 = vmatpush3.bf16.msra.mxu0 %v9830_v29  ;;  %v9920_v25 = vld [vmem:[%s10832_s0 + $0x30] sm:$0xff]  ;;  %v1580_v29 = vmax.f32 %v1573_v52, 0.0  ;;  %v9862_v52 = vld [vmem:[#allocation7 + $0x1090] sm:$0xff]  }
 0x23d   :  { %9209 = vmatprep.subr.bf16.mxu1 %v9831_v12  ;;  %9189 = vmatprep.subr.bf16.mxu0 %v9833_v34  ;;  %v1524_v16 = vsub.f32 %v9920_v25, %v1510_v45  ;;  %v1574_v15 = vsub.f32 %v1560_v17, %v9920_v25  ;;  %v9842_v34 = vld [vmem:[#allocation7 + $0x10b8] sm:$0xff]   ;;  %v9867_v17 = vld [vmem:[#allocation7 + $0x1040] sm:$0xff]  }
 0x23e   :  { %v8928_v56 = vpop.f32.mrf.mxu0  ;;  %v1587_v10 = vmul.f32 %v1580_v29, %v1530_v53  ;;  %v9873_v25 = vld [vmem:[#allocation7 + $0x1178] sm:$0xff]  }
 0x23f   :  { %v8929_v43 = vadd.f32 %v8928_v56, %v8927_v51  ;;  %v1531_v21 = vmax.f32 %v1524_v16, 0.0  ;;  %v8512_v51 = vpack.c.bf16 %v1592_v27, %v1591_v32  ;;  %v1581_v33 = vmax.f32 %v1574_v15, 0.0  ;;  %v9876_v53 = vld [vmem:[#allocation7 + $0x1138] sm:$0xff]   ;;  %v9869_v32 = vld [vmem:[#allocation7 + $0x10c0] sm:$0xff]  }
 0x240   :  { %v8930_v28 = vpop.f32.mrf.mxu0  ;;  %9210 = vmatpush3.bf16.msra.mxu1 %v9832_v61  ;;  %9190 = vmatpush3.bf16.msra.mxu0 %v9834_v59  ;;  %v1594_v57 = vmul.f32 %v1587_v10, %v1587_v10  ;;  %v9855_v59 = vld [vmem:[#allocation7 + $0x1058] sm:$0xff]  }
 0x241   :  { %v7151_v4 = vadd.f32 %v8929_v43, %v10766_v26  ;;  %9211 = vmatprep.subr.bf16.mxu1 %v9835_v9  ;;  %v9841_v26 = vld [vmem:[#allocation7 + $0x10f8] sm:$0xff]   ;;  %9219 = vmatprep.subr.bf16.mxu0 %v9837_v47  ;;  %1626 = vst [vmem:[#allocation2 + $0x104] sm:$0xff] %v8512_v51  ;;  %v1588_v19 = vmul.f32 %v1581_v33, %v1531_v21  ;;  %v1660_v9 = vld [vmem:[#allocation2 + $0xf8] sm:$0xff]  ;;  %v9863_v47 = vld [vmem:[#allocation7 + $0x1048] sm:$0xff]  }
 0x242   :  { %v8931_v39 = vpop.f32.mrf.mxu0  ;;  %v8513_v11 = vpack.c.bf16 %v1594_v57, %v1593_v38  ;;  %v7907_v60 = vcombine.low %v1660_v9, %v1660_v9  ;;  %v7908_v37 = vcombine.high %v1660_v9, %v1660_v9  ;;  %v9851_v43 = vld [vmem:[#allocation7 + $0x1060] sm:$0xff]   ;;  %v9856_v28 = vld [vmem:[#allocation7 + $0x1018] sm:$0xff]   ;;  %v9880_v33 = vld [vmem:[#allocation7 + $0x1128] sm:$0xff]  }
 0x243   :  { %7629 = vmatmul.mubr.bf16.vlgmr.msra.gmra.mxu0 %v9950_v40  ;;  %v1595_v56 = vmul.f32 %v1588_v19, %v1588_v19  ;;  %v9872_v21 = vld [vmem:[#allocation7 + $0x1080] sm:$0xff]   ;;  %v9883_v38 = vld [vmem:[#allocation7 + $0x1158] sm:$0xff]   ;;  %v9885_v57 = vld [vmem:[#allocation7 + $0x1150] sm:$0xff]  }
 0x244   :  { %9212 = vmatpush3.bf16.msra.mxu1 %v9836_v55  ;;  %9220 = vmatpush3.bf16.msra.mxu0 %v9840_v13  ;;  %1627 = vst [vmem:[#allocation2 + $0x10c] sm:$0xff] %v8513_v11  ;;  %v9853_v55 = vld [vmem:[#allocation7 + $0x10e0] sm:$0xff]   ;;  %v9865_v13 = vld [vmem:[#allocation7 + $0x10c8] sm:$0xff]   ;;  %v9886_v19 = vld [vmem:[#allocation7 + $0x1110] sm:$0xff]  }
 0x245   :  { %9241 = vmatprep.subr.bf16.mxu1 %v9841_v26  ;;  %9221 = vmatprep.subr.bf16.mxu0 %v9843_v50  ;;  %v8514_v54 = vpack.c.bf16 %v1595_v56, %v1595_v56  ;;  %v9861_v26 = vld [vmem:[#allocation7 + $0x10d0] sm:$0xff]   ;;  %v9889_v11 = vld [vmem:[#allocation7 + $0x1140] sm:$0xff]  }
 0x246   :  { %7668 = vmatprep.mubr.bf16.mxu1 %v7908_v37  ;;  %v9877_v50 = vld [vmem:[#allocation7 + $0x1170] sm:$0xff]  }
 0x247   :  { %v8949_v1 = vpop.f32.mrf.mxu1  ;;  %7669 = vmatmul.mubr.bf16.vlgmr.msra.gmra.mxu1 %v7907_v60  ;;  %1628 = vst [vmem:[#allocation2 + $0x114] sm:$0xf] %v8514_v54 }
 0x248   :  { %9222 = vmatpush3.bf16.msra.mxu0 %v9844_v7  ;;  %9242 = vmatpush3.bf16.msra.mxu1 %v9842_v34  ;;  %v1661_v49 = vld [vmem:[#allocation2 + $0x100] sm:$0xff] }
 0x249   :  { %v8950_v62 = vpop.f32.mrf.mxu1  ;;  %9223 = vmatprep.subr.bf16.mxu0 %v9847_v36  ;;  %9243 = vmatprep.subr.bf16.mxu1 %v9845_v46  ;;  %v7910_v24 = vcombine.high %v1661_v49, %v1661_v49  ;;  %v7909_v3 = vcombine.low %v1661_v49, %v1661_v49  ;;  %v9882_v36 = vld [vmem:[#allocation7 + $0x1120] sm:$0xff]   ;;  %v9887_v34 = vld [vmem:[#allocation7 + $0x1148] sm:$0xff]  }
 0x24a   :  { %v8951_v12 = vadd.f32 %v8950_v62, %v8949_v1  ;;  %v9866_v1 = vld [vmem:[#allocation7 + $0x1088] sm:$0xff]  }
 0x24b   :  { %v8952_v61 = vpop.f32.mrf.mxu1  ;;  %7708 = vmatprep.mubr.bf16.mxu0 %v7910_v24  ;;  %v10822_v5 = vld [vmem:[#allocation2 + $0x108] sm:$0xff] }
 0x24c   :  { %v10820_v35 = vadd.f32 %v8951_v12, %v7151_v4  ;;  %9224 = vmatpush3.bf16.msra.mxu0 %v9848_v23  ;;  %9244 = vmatpush3.bf16.msra.mxu1 %v9846_v48  ;;  %v9854_v4 = vld [vmem:[#allocation7 + $0x10a0] sm:$0xff]   ;;  %v7912_v45 = vcombine.high %v10822_v5, %v10822_v5  ;;  %v9878_v12 = vld [vmem:[#allocation7 + $0x1130] sm:$0xff]   ;;  %v9879_v61 = vld [vmem:[#allocation7 + $0x1168] sm:$0xff]   ;;  %v7911_v10 = vcombine.low %v10822_v5, %v10822_v5 }
 0x24d   :  { %v8953_v31 = vpop.f32.mrf.mxu1  ;;  %9225 = vmatprep.subr.bf16.mxu0 %v9851_v43  ;;  %9245 = vmatprep.subr.bf16.mxu1 %v9849_v63  ;;  %v9888_v23 = vld [vmem:[#allocation7 + $0x1108] sm:$0xff]   ;;  %v9890_v43 = vld [vmem:[#allocation7 + $0x1100] sm:$0xff]  }
 0x24e   :  { %7748 = vmatprep.mubr.bf16.mxu1 %v7912_v45  ;;  %v1663_v62 = vld [vmem:[#allocation2 + $0x110] sm:$0xff] }
 0x24f   :  { %v7914_v29 = vcombine.high %v1663_v62, %v1663_v62  ;;  %v9884_v31 = vld [vmem:[#allocation7 + $0x1118] sm:$0xff]   ;;  %v7913_v48 = vcombine.low %v1663_v62, %v1663_v62 }
 0x250   :  { %9226 = vmatpush3.bf16.msra.mxu0 %v9852_v58  ;;  %9246 = vmatpush3.bf16.msra.mxu1 %v9850_v18 }
 0x251   :  { %9227 = vmatprep.subr.bf16.mxu0 %v9855_v59  ;;  %9247 = vmatprep.subr.bf16.mxu1 %v9853_v55 }
 0x254   :  { %9228 = vmatpush3.bf16.msra.mxu0 %v9856_v28  ;;  %9248 = vmatpush3.bf16.msra.mxu1 %v9854_v4 }
 0x255   :  { %9229 = vmatprep.subr.bf16.mxu0 %v9859_v44  ;;  %9249 = vmatprep.subr.bf16.mxu1 %v9857_v22 }
 0x258   :  { %9230 = vmatpush3.bf16.msra.mxu0 %v9860_v6  ;;  %9250 = vmatpush3.bf16.msra.mxu1 %v9858_v20 }
 0x259   :  { %9231 = vmatprep.subr.bf16.mxu0 %v9863_v47  ;;  %9251 = vmatprep.subr.bf16.mxu1 %v9861_v26 }
 0x25c   :  { %v8971_v39 = vpop.f32.mrf.mxu0  ;;  %9232 = vmatpush3.bf16.msra.mxu0 %v9864_v8  ;;  %9252 = vmatpush3.bf16.msra.mxu1 %v9862_v52 }
 0x25d   :  { %9233 = vmatprep.subr.bf16.mxu0 %v9867_v17  ;;  %9253 = vmatprep.subr.bf16.mxu1 %v9865_v13 }
 0x25e   :  { %v8972_v40 = vpop.f32.mrf.mxu0 }
 0x25f   :  { %v8973_v42 = vadd.f32 %v8972_v40, %v8971_v39 }
 0x260   :  { %v8974_v14 = vpop.f32.mrf.mxu0  ;;  %9234 = vmatpush3.bf16.msra.mxu0 %v9868_v41  ;;  %9254 = vmatpush3.bf16.msra.mxu1 %v9866_v1 }
 0x261   :  { %v7231_v2 = vadd.f32 %v8973_v42, %v10820_v35  ;;  %9263 = vmatprep.subr.bf16.mxu0 %v9873_v25  ;;  %9255 = vmatprep.subr.bf16.mxu1 %v9869_v32  ;;  %v9881_v35 = vld [vmem:[#allocation7 + $0x1160] sm:$0xff]  }
 0x262   :  { %v8975_v16 = vpop.f32.mrf.mxu0 }
 0x263   :  { %7709 = vmatmul.mubr.bf16.vlgmr.msra.gmra.mxu0 %v7909_v3 }
 0x264   :  { %9264 = vmatpush3.bf16.msra.mxu0 %v9876_v53  ;;  %7788 = vmatprep.mubr.bf16.mxu0 %v7914_v29 }
 0x265   :  { %9265 = vmatprep.subr.bf16.mxu0 %v9877_v50  ;;  %9256 = vmatpush3.bf16.msra.mxu1 %v9872_v21 }
 0x267   :  { %v8993_v15 = vpop.f32.mrf.mxu1 }
 0x268   :  { %9266 = vmatpush3.bf16.msra.mxu0 %v9878_v12  ;;  %7749 = vmatmul.mubr.bf16.vlgmr.msra.gmra.mxu1 %v7911_v10 }
 0x269   :  { %v8994_v0 = vpop.f32.mrf.mxu1  ;;  %9267 = vmatprep.subr.bf16.mxu0 %v9879_v61 }
 0x26a   :  { %v8995_v27 = vadd.f32 %v8994_v0, %v8993_v15 }
 0x26b   :  { %v8996_v30 = vpop.f32.mrf.mxu1 }
 0x26c   :  { %v7271_v7 = vadd.f32 %v8995_v27, %v7231_v2  ;;  %9268 = vmatpush3.bf16.msra.mxu0 %v9880_v33 }
 0x26d   :  { %v8997_v51 = vpop.f32.mrf.mxu1  ;;  %9269 = vmatprep.subr.bf16.mxu0 %v9881_v35 }
 0x270   :  { %9270 = vmatpush3.bf16.msra.mxu0 %v9882_v36 }
 0x271   :  { %9271 = vmatprep.subr.bf16.mxu0 %v9883_v38 }
 0x274   :  { %9272 = vmatpush3.bf16.msra.mxu0 %v9884_v31 }
 0x275   :  { %9273 = vmatprep.subr.bf16.mxu0 %v9885_v57 }
 0x278   :  { %9274 = vmatpush3.bf16.msra.mxu0 %v9886_v19 }
 0x279   :  { %9275 = vmatprep.subr.bf16.mxu0 %v9887_v34 }
 0x27c   :  { %v9015_v9 = vpop.f32.mrf.mxu0  ;;  %9276 = vmatpush3.bf16.msra.mxu0 %v9888_v23 }
 0x27d   :  { %9277 = vmatprep.subr.bf16.mxu0 %v9889_v11 }
 0x27e   :  { %v9016_v56 = vpop.f32.mrf.mxu0 }
 0x27f   :  { %v9017_v60 = vadd.f32 %v9016_v56, %v9015_v9 }
 0x280   :  { %v9018_v37 = vpop.f32.mrf.mxu0  ;;  %9278 = vmatpush3.bf16.msra.mxu0 %v9890_v43 }
 0x281   :  { %v7311_v46 = vadd.f32 %v9017_v60, %v7271_v7 }
 0x282   :  { %v9019_v54 = vpop.f32.mrf.mxu0 }
 0x283   :  { %7789 = vmatmul.mubr.bf16.vlgmr.msra.gmra.mxu0 %v7913_v48 }
 0x287   :  { %v9037_v58 = vpop.f32.mrf.mxu1 }
 0x289   :  { %v9038_v59 = vpop.f32.mrf.mxu1 }
 0x28a   :  { %v9039_v63 = vadd.f32 %v9038_v59, %v9037_v58 }
 0x28b   :  { %v9040_v18 = vpop.f32.mrf.mxu1 }
 0x28c   :  { %v7351_v28 = vadd.f32 %v9039_v63, %v7311_v46 }
 0x28d   :  { %v9041_v49 = vpop.f32.mrf.mxu1 }
 0x2a3   :  { %v9059_v44 = vpop.f32.mrf.mxu0 }
 0x2a5   :  { %v9060_v55 = vpop.f32.mrf.mxu0 }
 0x2a6   :  { %v9061_v4 = vadd.f32 %v9060_v55, %v9059_v44 }
 0x2a7   :  { %v9081_v24 = vpop.f32.mrf.mxu1  ;;  %v9062_v6 = vpop.f32.mrf.mxu0 }
 0x2a8   :  { %v7391_v47 = vadd.f32 %v9061_v4, %v7351_v28 }
 0x2a9   :  { %v9082_v5 = vpop.f32.mrf.mxu1  ;;  %v9063_v20 = vpop.f32.mrf.mxu0 }
 0x2aa   :  { %v9083_v45 = vadd.f32 %v9082_v5, %v9081_v24 }
 0x2ab   :  { %v9084_v22 = vpop.f32.mrf.mxu1 }
 0x2ac   :  { %v7431_v39 = vadd.f32 %v9083_v45, %v7391_v47 }
 0x2ad   :  { %v9085_v8 = vpop.f32.mrf.mxu1 }
 0x2c3   :  { %v9103_v17 = vpop.f32.mrf.mxu0 }
 0x2c5   :  { %v9104_v26 = vpop.f32.mrf.mxu0 }
 0x2c6   :  { %v9105_v42 = vadd.f32 %v9104_v26, %v9103_v17 }
 0x2c7   :  { %v9125_v40 = vpop.f32.mrf.mxu1  ;;  %v9106_v14 = vpop.f32.mrf.mxu0 }
 0x2c8   :  { %v7471_v2 = vadd.f32 %v9105_v42, %v7431_v39 }
 0x2c9   :  { %v9126_v52 = vpop.f32.mrf.mxu1  ;;  %v9107_v16 = vpop.f32.mrf.mxu0 }
 0x2ca   :  { %v9127_v41 = vadd.f32 %v9126_v52, %v9125_v40 }
 0x2cb   :  { %v9128_v25 = vpop.f32.mrf.mxu1 }
 0x2cc   :  { %v7511_v13 = vadd.f32 %v9127_v41, %v7471_v2 }
 0x2cd   :  { %v9129_v1 = vpop.f32.mrf.mxu1 }
 0x2e3   :  { %v9147_v3 = vpop.f32.mrf.mxu0 }
 0x2e5   :  { %v9148_v15 = vpop.f32.mrf.mxu0 }
 0x2e6   :  { %v9149_v50 = vadd.f32 %v9148_v15, %v9147_v3 }
 0x2e7   :  { %v9169_v53 = vpop.f32.mrf.mxu1  ;;  %v9150_v0 = vpop.f32.mrf.mxu0 }
 0x2e8   :  { %v7551_v27 = vadd.f32 %v9149_v50, %v7511_v13 }
 0x2e9   :  { %v9170_v32 = vpop.f32.mrf.mxu1  ;;  %v9151_v12 = vpop.f32.mrf.mxu0 }
 0x2ea   :  { %v9171_v62 = vadd.f32 %v9170_v32, %v9169_v53 }
 0x2eb   :  { %v9172_v29 = vpop.f32.mrf.mxu1 }
 0x2ec   :  { %v7591_v30 = vadd.f32 %v9171_v62, %v7551_v27 }
 0x2ed   :  { %v9173_v21 = vpop.f32.mrf.mxu1 }
 0x303   :  { %v9191_v7 = vpop.f32.mrf.mxu0 }
 0x305   :  { %v9192_v61 = vpop.f32.mrf.mxu0 }
 0x306   :  { %v9193_v60 = vadd.f32 %v9192_v61, %v9191_v7 }
 0x307   :  { %v9194_v51 = vpop.f32.mrf.mxu0  ;;  %v9213_v33 = vpop.f32.mrf.mxu1 }
 0x308   :  { %v7631_v37 = vadd.f32 %v9193_v60, %v7591_v30 }
 0x309   :  { %v9195_v10 = vpop.f32.mrf.mxu0  ;;  %v9214_v35 = vpop.f32.mrf.mxu1 }
 0x30a   :  { %v9215_v43 = vadd.f32 %v9214_v35, %v9213_v33 }
 0x30b   :  { %v9216_v36 = vpop.f32.mrf.mxu1 }
 0x30c   :  { %v7671_v54 = vadd.f32 %v9215_v43, %v7631_v37 }
 0x30d   :  { %v9217_v38 = vpop.f32.mrf.mxu1 }
 0x323   :  { %v9235_v31 = vpop.f32.mrf.mxu0 }
 0x325   :  { %v9236_v57 = vpop.f32.mrf.mxu0 }
 0x326   :  { %v9237_v46 = vadd.f32 %v9236_v57, %v9235_v31 }
 0x327   :  { %v9238_v19 = vpop.f32.mrf.mxu0 }
 0x328   :  { %v9257_v9 = vpop.f32.mrf.mxu1  ;;  %v7711_v48 = vadd.f32 %v9237_v46, %v7671_v54 }
 0x329   :  { %v9239_v34 = vpop.f32.mrf.mxu0 }
 0x32a   :  { %v9258_v23 = vpop.f32.mrf.mxu1 }
 0x32b   :  { %v9259_v58 = vadd.f32 %v9258_v23, %v9257_v9 }
 0x32c   :  { %v9260_v11 = vpop.f32.mrf.mxu1 }
 0x32d   :  { %v7751_v18 = vadd.f32 %v9259_v58, %v7711_v48 }
 0x32e   :  { %v9261_v56 = vpop.f32.mrf.mxu1 }
 0x343   :  { %v9279_v59 = vpop.f32.mrf.mxu0 }
 0x345   :  { %v9280_v63 = vpop.f32.mrf.mxu0 }
 0x346   :  { %v9281_v28 = vadd.f32 %v9280_v63, %v9279_v59 }
 0x347   :  { %v9282_v49 = vpop.f32.mrf.mxu0 }
 0x348   :  { %v7791_v44 = vadd.f32 %v9281_v28, %v7751_v18 }
 0x349   :  { %v9283_v24 = vpop.f32.mrf.mxu0 }
 0x34a   :  { %7796 = vst [vmem:[%s10837_s5] sm:$0xff] %v7791_v44 }
 0x34b   :  { %7801 = vsyncpa [#allocation4], 1 }
 0x34c   :  { %7802 = vsyncpa [#allocation6], 1 }
 0x34d   :  { %7803 = vsyncpa [#allocation9], 1 }

</bundles_post_ra>
